<compile_context>
chip_gen: v5e
topology: v5e:2x2
jax: 0.10.0
libtpu: 0.0.40
codegen_flags: <defaults>
</compile_context>

<pallas_src>
import functools

import jax
import jax.numpy as jnp
from jax.experimental import pallas as pl
from jax.experimental.pallas import tpu as pltpu


# ---------------------------------------------------------------------------
# Fast path
# ---------------------------------------------------------------------------
def _d2s_fast_kernel(p_ref, x_ref, o_ref, *, block_size, d, H, W,
                     mm_dtype, precision):
    b = block_size
    dH = d * H
    i = pl.program_id(1)  # height-offset group handled by this grid step

    acc = None
    for j in range(b):  # b is small (2 for this module); static unroll
        a_j = x_ref[0, j * dH:(j + 1) * dH, :]          # (d*H, W), rows = (r, h)
        if a_j.dtype != mm_dtype:
            a_j = a_j.astype(mm_dtype)
        # one-hot width scatter:  (d*H, W) @ (W, W*b) -> (d*H, W*b)
        y = jnp.dot(a_j, p_ref[j],
                    precision=precision,
                    preferred_element_type=jnp.float32)
        acc = y if acc is None else acc + y             # disjoint columns per j

    # Height interleave via a single sublane-strided store:
    # output-view row b*m + i  <-  acc[m]   (m = r*H + h)
    o_ref[0, pl.ds(i, dH, b), :] = acc.astype(o_ref.dtype)


def _depth_to_space_fast(x, block_size):
    B, C, H, W = x.shape
    b = block_size
    d = C // (b * b)
    Hb, Wb = H * b, W * b
    dH = d * H

    if x.dtype == jnp.bfloat16:
        mm_dtype, precision = jnp.bfloat16, None          # exact, native MXU rate
    else:
        mm_dtype, precision = jnp.float32, jax.lax.Precision.HIGHEST  # exact copy

    # Host-precomputed one-hot width-scatter selectors: P[j, w, w*b + j] = 1.
    j_ids = jnp.arange(b, dtype=jnp.int32)[:, None, None]
    w_ids = jnp.arange(W, dtype=jnp.int32)[None, :, None]
    wp_ids = jnp.arange(Wb, dtype=jnp.int32)[None, None, :]
    p = (wp_ids == w_ids * b + j_ids).astype(mm_dtype)     # (b, W, Wb)

    # Free (layout-preserving) views: channels/rows merged, lane dims untouched.
    x2 = x.reshape(B, C * H, W)

    kernel = functools.partial(_d2s_fast_kernel, block_size=b, d=d, H=H, W=W,
                               mm_dtype=mm_dtype, precision=precision)

    out2 = pl.pallas_call(
        kernel,
        out_shape=jax.ShapeDtypeStruct((B, d * Hb, Wb), x.dtype),
        grid_spec=pltpu.PrefetchScalarGridSpec(
            num_scalar_prefetch=0,
            grid=(B, b),
            in_specs=[
                pl.BlockSpec((b, W, Wb), lambda n, i: (0, 0, 0)),        # selectors
                pl.BlockSpec((1, b * dH, W), lambda n, i: (n, i, 0)),    # group i
            ],
            out_specs=pl.BlockSpec((1, d * Hb, Wb), lambda n, i: (n, 0, 0)),
        ),
        compiler_params=pltpu.CompilerParams(
            dimension_semantics=("parallel", "arbitrary"),
            vmem_limit_bytes=64 * 1024 * 1024),
    )(p, x2)

    return out2.reshape(B, d, Hb, Wb)


# ---------------------------------------------------------------------------
# Safe fallback (previously validated formulation)
# ---------------------------------------------------------------------------
def _d2s_safe_kernel(x_ref, o_ref, *, block_size, out_depth):
    b = block_size
    d = out_depth
    _, C, H, W = x_ref.shape
    _, _, Hb, Wb = o_ref.shape

    x = x_ref[0].astype(jnp.float32)                       # (C, H, W)

    hp = jax.lax.broadcasted_iota(jnp.int32, (Hb, H), 0)
    hh = jax.lax.broadcasted_iota(jnp.int32, (Hb, H), 1)
    ww = jax.lax.broadcasted_iota(jnp.int32, (W, Wb), 0)
    wp = jax.lax.broadcasted_iota(jnp.int32, (W, Wb), 1)

    acc = jnp.zeros((d, Hb, Wb), jnp.float32)
    for i in range(b):
        q_i = (hp == hh * b + i).astype(jnp.float32)
        q_i_b = jnp.broadcast_to(q_i[None, :, :], (d, Hb, H))
        for j in range(b):
            p_j = (wp == ww * b + j).astype(jnp.float32)
            p_j_b = jnp.broadcast_to(p_j[None, :, :], (d, W, Wb))
            c0 = (i * b + j) * d
            blk = x[c0:c0 + d]
            t = jax.lax.dot_general(
                q_i_b, blk, dimension_numbers=(((2,), (1,)), ((0,), (0,))),
                preferred_element_type=jnp.float32,
                precision=jax.lax.Precision.HIGHEST)
            t2 = jax.lax.dot_general(
                t, p_j_b, dimension_numbers=(((2,), (1,)), ((0,), (0,))),
                preferred_element_type=jnp.float32,
                precision=jax.lax.Precision.HIGHEST)
            acc = acc + t2
    o_ref[0] = acc.astype(o_ref.dtype)


def _depth_to_space_safe(x, block_size):
    B, C, H, W = x.shape
    b = block_size
    d = C // (b * b)
    Hb, Wb = H * b, W * b
    kernel = functools.partial(_d2s_safe_kernel, block_size=b, out_depth=d)
    return pl.pallas_call(
        kernel,
        out_shape=jax.ShapeDtypeStruct((B, d, Hb, Wb), x.dtype),
        grid_spec=pltpu.PrefetchScalarGridSpec(
            num_scalar_prefetch=0,
            grid=(B,),
            in_specs=[pl.BlockSpec((1, C, H, W), lambda n: (n, 0, 0, 0))],
            out_specs=pl.BlockSpec((1, d, Hb, Wb), lambda n: (n, 0, 0, 0)),
        ),
        compiler_params=pltpu.CompilerParams(
            dimension_semantics=("parallel",)),
    )(x)


# ---------------------------------------------------------------------------
# Public entry point
# ---------------------------------------------------------------------------
def depth_to_space(x, block_size):
    """Pallas TPU DepthToSpace.  x: (B, C, H, W) NCHW, C % block_size**2 == 0."""
    B, C, H, W = x.shape
    assert C % (block_size * block_size) == 0, "C must be divisible by block_size**2"
    try:
        out = _depth_to_space_fast(x, block_size)
        jax.block_until_ready(out)
        return out
    except Exception:
        # Compatibility fallback (e.g. strided sublane stores unsupported
        # on this toolchain): use the previously validated formulation.
        return _depth_to_space_safe(x, block_size)


def depth_to_space_ref(x, block_size):
    """Pure-JAX reference with the exact PyTorch module semantics."""
    B, C, H, W = x.shape
    b = block_size
    d = C // (b * b)
    y = x.reshape(B, b, b, d, H, W)                # (n, i, j, r, h, w)
    y = jnp.transpose(y, (0, 3, 4, 1, 5, 2))       # (n, r, h, i, w, j)
    return y.reshape(B, d, H * b, W * b)


if __name__ == "__main__":
    key = jax.random.PRNGKey(0)
    B, C, H, W = 2, 8, 16, 16
    block_size = 2  # DepthToSpace(block_size=2); C = 8 -> out depth d = 2

    x = jax.random.normal(key, (B, C, H, W), dtype=jnp.float32)

    out = depth_to_space(x, block_size)
    out = jax.block_until_ready(out)

    ref = depth_to_space_ref(x, block_size)
    assert out.shape == (B, C // (block_size ** 2), H * block_size, W * block_size)
    assert out.dtype == x.dtype
    assert jnp.allclose(out, ref, rtol=1e-6, atol=1e-6), "mismatch vs reference"

    print("KERNEL_OK")
</pallas_src>

<mosaic_0001>
module attributes {stable_mosaic.version = 11 : i64} {
  func.func @_d2s_fast_kernel(%arg0: i32, %arg1: i32, %arg2: memref<2x16x32xf32, #tpu.memory_space<vmem>>, %arg3: memref<1x64x16xf32, #tpu.memory_space<vmem>>, %arg4: memref<1x64x32xf32, #tpu.memory_space<vmem>>) attributes {dimension_semantics = [#tpu.dimension_semantics<parallel>, #tpu.dimension_semantics<arbitrary>], iteration_bounds = array<i64: 2, 2>, scalar_prefetch = 0 : i64, scratch_operands = 0 : i64, tpu.core_type = #tpu.core_type<tc>, window_params = [{pipeline_mode = #tpu.pipeline_mode<synchronous>, transform_indices = @transform_0, window_bounds = array<i64: 2, 16, 32>}, {transform_indices = @transform_1, window_bounds = array<i64: 1, 64, 16>}, {transform_indices = @transform_2, window_bounds = array<i64: 1, 64, 32>}]} {
    %c0 = arith.constant 0 : index
    %c0_0 = arith.constant 0 : index
    %c0_1 = arith.constant 0 : index
    %0 = vector.load %arg3[%c0, %c0_0, %c0_1] : memref<1x64x16xf32, #tpu.memory_space<vmem>>, vector<1x32x16xf32>
    %1 = vector.shape_cast %0 : vector<1x32x16xf32> to vector<32x16xf32>
    %c0_2 = arith.constant 0 : index
    %c0_3 = arith.constant 0 : index
    %c0_4 = arith.constant 0 : index
    %2 = vector.load %arg2[%c0_2, %c0_3, %c0_4] : memref<2x16x32xf32, #tpu.memory_space<vmem>>, vector<1x16x32xf32>
    %3 = vector.shape_cast %2 : vector<1x16x32xf32> to vector<16x32xf32>
    %cst = arith.constant dense<0.000000e+00> : vector<32x32xf32>
    %4 = tpu.matmul %1, %3, %cst {dimension_numbers = #tpu.dot_dimension_numbers<[1], [0], [0], [1], [0, 0, 1, 1], [], []>, precision = #tpu.contract_precision<fp32>} : vector<32x16xf32>, vector<16x32xf32>, vector<32x32xf32> -> vector<32x32xf32>
    %c0_5 = arith.constant 0 : index
    %c32 = arith.constant 32 : index
    %c0_6 = arith.constant 0 : index
    %5 = vector.load %arg3[%c0_5, %c32, %c0_6] : memref<1x64x16xf32, #tpu.memory_space<vmem>>, vector<1x32x16xf32>
    %6 = vector.shape_cast %5 : vector<1x32x16xf32> to vector<32x16xf32>
    %c1 = arith.constant 1 : index
    %c0_7 = arith.constant 0 : index
    %c0_8 = arith.constant 0 : index
    %7 = vector.load %arg2[%c1, %c0_7, %c0_8] : memref<2x16x32xf32, #tpu.memory_space<vmem>>, vector<1x16x32xf32>
    %8 = vector.shape_cast %7 : vector<1x16x32xf32> to vector<16x32xf32>
    %cst_9 = arith.constant dense<0.000000e+00> : vector<32x32xf32>
    %9 = tpu.matmul %6, %8, %cst_9 {dimension_numbers = #tpu.dot_dimension_numbers<[1], [0], [0], [1], [0, 0, 1, 1], [], []>, precision = #tpu.contract_precision<fp32>} : vector<32x16xf32>, vector<16x32xf32>, vector<32x32xf32> -> vector<32x32xf32>
    %10 = arith.addf %4, %9 : vector<32x32xf32>
    %c0_10 = arith.constant 0 : index
    %11 = arith.index_cast %arg1 : i32 to index
    %c0_11 = arith.constant 0 : index
    %12 = tpu.strided_load %arg4[%c0_10, %11, %c0_11] {strides = array<i32: 1, 2, 1>} : memref<1x64x32xf32, #tpu.memory_space<vmem>>, vector<1x32x32xf32>
    %13 = vector.shape_cast %12 : vector<1x32x32xf32> to vector<32x32xf32>
    %14 = vector.shape_cast %10 : vector<32x32xf32> to vector<1x32x32xf32>
    tpu.strided_store %arg4[%c0_10, %11, %c0_11], %14 {strides = array<i32: 1, 2, 1>} : memref<1x64x32xf32, #tpu.memory_space<vmem>>, vector<1x32x32xf32>
    return
  }
  func.func @transform_0(%arg0: i32, %arg1: i32) -> (i32, i32, i32) {
    %c0_i32 = arith.constant 0 : i32
    %c0_i32_0 = arith.constant 0 : i32
    %c0_i32_1 = arith.constant 0 : i32
    %c0_i32_2 = arith.constant 0 : i32
    return %c0_i32, %c0_i32_0, %c0_i32_1 : i32, i32, i32
  }
  func.func @transform_1(%arg0: i32, %arg1: i32) -> (i32, i32, i32) {
    %c0_i32 = arith.constant 0 : i32
    %c0_i32_0 = arith.constant 0 : i32
    return %arg0, %arg1, %c0_i32 : i32, i32, i32
  }
  func.func @transform_2(%arg0: i32, %arg1: i32) -> (i32, i32, i32) {
    %c0_i32 = arith.constant 0 : i32
    %c0_i32_0 = arith.constant 0 : i32
    %c0_i32_1 = arith.constant 0 : i32
    return %arg0, %c0_i32, %c0_i32_0 : i32, i32, i32
  }
}

module attributes {stable_mosaic.version = 11 : i64} {
  func.func @_d2s_safe_kernel(%arg0: i32, %arg1: memref<1x8x16x16xf32, #tpu.memory_space<vmem>>, %arg2: memref<1x2x32x32xf32, #tpu.memory_space<vmem>>) attributes {dimension_semantics = [#tpu.dimension_semantics<parallel>], iteration_bounds = array<i64: 2>, scalar_prefetch = 0 : i64, scratch_operands = 0 : i64, tpu.core_type = #tpu.core_type<tc>, window_params = [{transform_indices = @transform_0, window_bounds = array<i64: 1, 8, 16, 16>}, {transform_indices = @transform_1, window_bounds = array<i64: 1, 2, 32, 32>}]} {
    %c0 = arith.constant 0 : index
    %c0_0 = arith.constant 0 : index
    %c0_1 = arith.constant 0 : index
    %c0_2 = arith.constant 0 : index
    %0 = vector.load %arg1[%c0, %c0_0, %c0_1, %c0_2] : memref<1x8x16x16xf32, #tpu.memory_space<vmem>>, vector<1x8x16x16xf32>
    %1 = vector.shape_cast %0 : vector<1x8x16x16xf32> to vector<8x16x16xf32>
    %2 = tpu.iota {dimensions = array<i32: 0>} : vector<32x16xi32>
    %3 = tpu.iota {dimensions = array<i32: 1>} : vector<32x16xi32>
    %4 = tpu.iota {dimensions = array<i32: 0>} : vector<16x32xi32>
    %5 = tpu.iota {dimensions = array<i32: 1>} : vector<16x32xi32>
    %cst = arith.constant 0.000000e+00 : f32
    %6 = vector.broadcast %cst : f32 to vector<2x32x32xf32>
    %c2_i32 = arith.constant 2 : i32
    %7 = vector.broadcast %c2_i32 : i32 to vector<32x16xi32>
    %8 = arith.muli %3, %7 : vector<32x16xi32>
    %c0_i32 = arith.constant 0 : i32
    %9 = vector.broadcast %c0_i32 : i32 to vector<32x16xi32>
    %10 = arith.addi %8, %9 : vector<32x16xi32>
    %11 = arith.cmpi eq, %2, %10 : vector<32x16xi32>
    %12 = arith.extui %11 : vector<32x16xi1> to vector<32x16xi32>
    %13 = arith.sitofp %12 : vector<32x16xi32> to vector<32x16xf32>
    %14 = vector.shape_cast %13 : vector<32x16xf32> to vector<1x32x16xf32>
    %15 = vector.shape_cast %14 : vector<1x32x16xf32> to vector<1x32x16xf32>
    %16 = vector.broadcast %15 : vector<1x32x16xf32> to vector<2x32x16xf32>
    %c2_i32_3 = arith.constant 2 : i32
    %17 = vector.broadcast %c2_i32_3 : i32 to vector<16x32xi32>
    %18 = arith.muli %4, %17 : vector<16x32xi32>
    %c0_i32_4 = arith.constant 0 : i32
    %19 = vector.broadcast %c0_i32_4 : i32 to vector<16x32xi32>
    %20 = arith.addi %18, %19 : vector<16x32xi32>
    %21 = arith.cmpi eq, %5, %20 : vector<16x32xi32>
    %22 = arith.extui %21 : vector<16x32xi1> to vector<16x32xi32>
    %23 = arith.sitofp %22 : vector<16x32xi32> to vector<16x32xf32>
    %24 = vector.shape_cast %23 : vector<16x32xf32> to vector<1x16x32xf32>
    %25 = vector.shape_cast %24 : vector<1x16x32xf32> to vector<1x16x32xf32>
    %26 = vector.broadcast %25 : vector<1x16x32xf32> to vector<2x16x32xf32>
    %27 = vector.extract_strided_slice %1 {offsets = [0, 0, 0], sizes = [2, 16, 16], strides = [1, 1, 1]} : vector<8x16x16xf32> to vector<2x16x16xf32>
    %cst_5 = arith.constant dense<0.000000e+00> : vector<2x32x16xf32>
    %28 = tpu.matmul %16, %27, %cst_5 {dimension_numbers = #tpu.dot_dimension_numbers<[2], [1], [1], [2], [0, 0, 0, 1, 1, 2], [0], [0]>, precision = #tpu.contract_precision<fp32>} : vector<2x32x16xf32>, vector<2x16x16xf32>, vector<2x32x16xf32> -> vector<2x32x16xf32>
    %cst_6 = arith.constant dense<0.000000e+00> : vector<2x32x32xf32>
    %29 = tpu.matmul %28, %26, %cst_6 {dimension_numbers = #tpu.dot_dimension_numbers<[2], [1], [1], [2], [0, 0, 0, 1, 1, 2], [0], [0]>, precision = #tpu.contract_precision<fp32>} : vector<2x32x16xf32>, vector<2x16x32xf32>, vector<2x32x32xf32> -> vector<2x32x32xf32>
    %30 = arith.addf %6, %29 : vector<2x32x32xf32>
    %c2_i32_7 = arith.constant 2 : i32
    %31 = vector.broadcast %c2_i32_7 : i32 to vector<16x32xi32>
    %32 = arith.muli %4, %31 : vector<16x32xi32>
    %c1_i32 = arith.constant 1 : i32
    %33 = vector.broadcast %c1_i32 : i32 to vector<16x32xi32>
    %34 = arith.addi %32, %33 : vector<16x32xi32>
    %35 = arith.cmpi eq, %5, %34 : vector<16x32xi32>
    %36 = arith.extui %35 : vector<16x32xi1> to vector<16x32xi32>
    %37 = arith.sitofp %36 : vector<16x32xi32> to vector<16x32xf32>
    %38 = vector.shape_cast %37 : vector<16x32xf32> to vector<1x16x32xf32>
    %39 = vector.shape_cast %38 : vector<1x16x32xf32> to vector<1x16x32xf32>
    %40 = vector.broadcast %39 : vector<1x16x32xf32> to vector<2x16x32xf32>
    %41 = vector.extract_strided_slice %1 {offsets = [2, 0, 0], sizes = [2, 16, 16], strides = [1, 1, 1]} : vector<8x16x16xf32> to vector<2x16x16xf32>
    %cst_8 = arith.constant dense<0.000000e+00> : vector<2x32x16xf32>
    %42 = tpu.matmul %16, %41, %cst_8 {dimension_numbers = #tpu.dot_dimension_numbers<[2], [1], [1], [2], [0, 0, 0, 1, 1, 2], [0], [0]>, precision = #tpu.contract_precision<fp32>} : vector<2x32x16xf32>, vector<2x16x16xf32>, vector<2x32x16xf32> -> vector<2x32x16xf32>
    %cst_9 = arith.constant dense<0.000000e+00> : vector<2x32x32xf32>
    %43 = tpu.matmul %42, %40, %cst_9 {dimension_numbers = #tpu.dot_dimension_numbers<[2], [1], [1], [2], [0, 0, 0, 1, 1, 2], [0], [0]>, precision = #tpu.contract_precision<fp32>} : vector<2x32x16xf32>, vector<2x16x32xf32>, vector<2x32x32xf32> -> vector<2x32x32xf32>
    %44 = arith.addf %30, %43 : vector<2x32x32xf32>
    %c2_i32_10 = arith.constant 2 : i32
    %45 = vector.broadcast %c2_i32_10 : i32 to vector<32x16xi32>
    %46 = arith.muli %3, %45 : vector<32x16xi32>
    %c1_i32_11 = arith.constant 1 : i32
    %47 = vector.broadcast %c1_i32_11 : i32 to vector<32x16xi32>
    %48 = arith.addi %46, %47 : vector<32x16xi32>
    %49 = arith.cmpi eq, %2, %48 : vector<32x16xi32>
    %50 = arith.extui %49 : vector<32x16xi1> to vector<32x16xi32>
    %51 = arith.sitofp %50 : vector<32x16xi32> to vector<32x16xf32>
    %52 = vector.shape_cast %51 : vector<32x16xf32> to vector<1x32x16xf32>
    %53 = vector.shape_cast %52 : vector<1x32x16xf32> to vector<1x32x16xf32>
    %54 = vector.broadcast %53 : vector<1x32x16xf32> to vector<2x32x16xf32>
    %c2_i32_12 = arith.constant 2 : i32
    %55 = vector.broadcast %c2_i32_12 : i32 to vector<16x32xi32>
    %56 = arith.muli %4, %55 : vector<16x32xi32>
    %c0_i32_13 = arith.constant 0 : i32
    %57 = vector.broadcast %c0_i32_13 : i32 to vector<16x32xi32>
    %58 = arith.addi %56, %57 : vector<16x32xi32>
    %59 = arith.cmpi eq, %5, %58 : vector<16x32xi32>
    %60 = arith.extui %59 : vector<16x32xi1> to vector<16x32xi32>
    %61 = arith.sitofp %60 : vector<16x32xi32> to vector<16x32xf32>
    %62 = vector.shape_cast %61 : vector<16x32xf32> to vector<1x16x32xf32>
    %63 = vector.shape_cast %62 : vector<1x16x32xf32> to vector<1x16x32xf32>
    %64 = vector.broadcast %63 : vector<1x16x32xf32> to vector<2x16x32xf32>
    %65 = vector.extract_strided_slice %1 {offsets = [4, 0, 0], sizes = [2, 16, 16], strides = [1, 1, 1]} : vector<8x16x16xf32> to vector<2x16x16xf32>
    %cst_14 = arith.constant dense<0.000000e+00> : vector<2x32x16xf32>
    %66 = tpu.matmul %54, %65, %cst_14 {dimension_numbers = #tpu.dot_dimension_numbers<[2], [1], [1], [2], [0, 0, 0, 1, 1, 2], [0], [0]>, precision = #tpu.contract_precision<fp32>} : vector<2x32x16xf32>, vector<2x16x16xf32>, vector<2x32x16xf32> -> vector<2x32x16xf32>
    %cst_15 = arith.constant dense<0.000000e+00> : vector<2x32x32xf32>
    %67 = tpu.matmul %66, %64, %cst_15 {dimension_numbers = #tpu.dot_dimension_numbers<[2], [1], [1], [2], [0, 0, 0, 1, 1, 2], [0], [0]>, precision = #tpu.contract_precision<fp32>} : vector<2x32x16xf32>, vector<2x16x32xf32>, vector<2x32x32xf32> -> vector<2x32x32xf32>
    %68 = arith.addf %44, %67 : vector<2x32x32xf32>
    %c2_i32_16 = arith.constant 2 : i32
    %69 = vector.broadcast %c2_i32_16 : i32 to vector<16x32xi32>
    %70 = arith.muli %4, %69 : vector<16x32xi32>
    %c1_i32_17 = arith.constant 1 : i32
    %71 = vector.broadcast %c1_i32_17 : i32 to vector<16x32xi32>
    %72 = arith.addi %70, %71 : vector<16x32xi32>
    %73 = arith.cmpi eq, %5, %72 : vector<16x32xi32>
    %74 = arith.extui %73 : vector<16x32xi1> to vector<16x32xi32>
    %75 = arith.sitofp %74 : vector<16x32xi32> to vector<16x32xf32>
    %76 = vector.shape_cast %75 : vector<16x32xf32> to vector<1x16x32xf32>
    %77 = vector.shape_cast %76 : vector<1x16x32xf32> to vector<1x16x32xf32>
    %78 = vector.broadcast %77 : vector<1x16x32xf32> to vector<2x16x32xf32>
    %79 = vector.extract_strided_slice %1 {offsets = [6, 0, 0], sizes = [2, 16, 16], strides = [1, 1, 1]} : vector<8x16x16xf32> to vector<2x16x16xf32>
    %cst_18 = arith.constant dense<0.000000e+00> : vector<2x32x16xf32>
    %80 = tpu.matmul %54, %79, %cst_18 {dimension_numbers = #tpu.dot_dimension_numbers<[2], [1], [1], [2], [0, 0, 0, 1, 1, 2], [0], [0]>, precision = #tpu.contract_precision<fp32>} : vector<2x32x16xf32>, vector<2x16x16xf32>, vector<2x32x16xf32> -> vector<2x32x16xf32>
    %cst_19 = arith.constant dense<0.000000e+00> : vector<2x32x32xf32>
    %81 = tpu.matmul %80, %78, %cst_19 {dimension_numbers = #tpu.dot_dimension_numbers<[2], [1], [1], [2], [0, 0, 0, 1, 1, 2], [0], [0]>, precision = #tpu.contract_precision<fp32>} : vector<2x32x16xf32>, vector<2x16x32xf32>, vector<2x32x32xf32> -> vector<2x32x32xf32>
    %82 = arith.addf %68, %81 : vector<2x32x32xf32>
    %c0_20 = arith.constant 0 : index
    %c0_21 = arith.constant 0 : index
    %c0_22 = arith.constant 0 : index
    %c0_23 = arith.constant 0 : index
    %83 = vector.load %arg2[%c0_20, %c0_21, %c0_22, %c0_23] : memref<1x2x32x32xf32, #tpu.memory_space<vmem>>, vector<1x2x32x32xf32>
    %84 = vector.shape_cast %83 : vector<1x2x32x32xf32> to vector<2x32x32xf32>
    %85 = vector.shape_cast %82 : vector<2x32x32xf32> to vector<1x2x32x32xf32>
    tpu.vector_store %arg2[%c0_20, %c0_21, %c0_22, %c0_23], %85 {strides = array<i32>} : memref<1x2x32x32xf32, #tpu.memory_space<vmem>>, vector<1x2x32x32xf32>,
    return
  }
  func.func @transform_0(%arg0: i32) -> (i32, i32, i32, i32) {
    %c0_i32 = arith.constant 0 : i32
    %c0_i32_0 = arith.constant 0 : i32
    %c0_i32_1 = arith.constant 0 : i32
    %c0_i32_2 = arith.constant 0 : i32
    return %arg0, %c0_i32, %c0_i32_0, %c0_i32_1 : i32, i32, i32, i32
  }
  func.func @transform_1(%arg0: i32) -> (i32, i32, i32, i32) {
    %c0_i32 = arith.constant 0 : i32
    %c0_i32_0 = arith.constant 0 : i32
    %c0_i32_1 = arith.constant 0 : i32
    %c0_i32_2 = arith.constant 0 : i32
    return %arg0, %c0_i32, %c0_i32_0, %c0_i32_1 : i32, i32, i32, i32
  }
}

</mosaic_0001>

<bundles_post_ra>
// kernel: tpu_custom_call.1
= control target key start
LH: loop header
LB: loop body
LE: loop exit
PB: predicated region body
PF: predicated region fallthrough
CT: control target
= control target key end

     0   :  { %s908_s9 = smov 0   ;;  %s910_s10 = smov 0   ;;  %s1037_s0 = inlined_call_operand.vmem [shape: f32[2,16,32], index: 0, kind: input, shape index: {}]   ;;  %s1038_s1 = inlined_call_operand.vmem [shape: f32[2,128,16], index: 1, kind: input, shape index: {}]   ;;  %s1039_s2 = inlined_call_operand.vmem [shape: f32[2,64,32], index: 2, kind: output, shape index: {}]  }
   0x1   :  { %s912_s11 = smov 0   ;;  %s914_s12 = smov 0  }
   0x2   :  { %s916_s13 = smov 0  }
   0x3 LB: > { %s21_s14 = sadd.s32 1, %s883_s11  ;;  %s24_s15 = sadd.s32 1, %s887_s12  ;;  %s891_s13 = sphi %s916_s13, %s12_s13   ;;  %s887_s12 = sphi %s914_s12, %s1043_s12   ;;  %s883_s11 = sphi %s912_s11, %s1042_s11   ;;  %s879_s10 = sphi %s910_s10, %s1041_s10   ;;  %s875_s9 = sphi %s908_s9, %s1040_s9  }
   0x4   : > { %p22_p0 = scmp.ge.s32.totalorder %s21_s14, 2  ;;  %p799_p1 = scmp.ge.s32.totalorder %s891_s13, 1 }
   0x5   : > { %p131_p2 = scmp.lt.s32.totalorder %s891_s13, 5 }
   0x6   : > { %s1045_s14 = smov (%p22_p0, %s21_s14), 0  ;;  %s1047_s15 = smov (!%p22_p0, %s24_s15), %s887_s12 }
   0x7   : > { %p132_p3 = pnand %p799_p1, %p131_p2  ;;  %p26_p4 = scmp.ge.s32.totalorder %s1047_s15, 2 }
   0x8   : > { %s800_s20 = sshll.u32 (!%p132_p3), %s875_s9, 3  ;;  %p158_p5 = scmp.lt.s32.totalorder (!%p132_p3), %s879_s10, 1 }
   0x9   : > { %s1049_s15 = smov (%p26_p4, %s1047_s15), 0  ;;  %135 = sbr.rel (%p132_p3) target bundleno = 254 (0xfe), region = 28 }
   0xa   : > { %p160_p6 = scmp.lt.s32.totalorder (!%p132_p3), %s800_s20, 15 }
   0xe   : > { %v806_v0 = vld [vmem:[%s1037_s0 + $0x18] sm:$0xff]  ;;  %v805_v1 = vld [vmem:[%s1037_s0 + $0x10] sm:$0xff]  ;;  %v177_v2 = vld [vmem:[%s1037_s0 + $0x8] sm:$0xff]  ;;  %s1051_s10 = smov (!%p158_p5, %s879_s10), 1  ;;  %s1053_s20 = smov (!%p160_p6, %s800_s20), 15  ;;  %vm185_vm0 = vcmask 130048  }
   0xf   : > { %v212_v3 = vand.u32 4294901760, %v806_v0  ;;  %v214_v4 = vand.u32 4294901760, %v805_v1  ;;  %v476_v5 = vand.u32 4294901760, %v177_v2  ;;  %v176_v6 = vld [vmem:[%s1037_s0] sm:$0xff]  ;;  %s801_s25 = sshll.u32 %s1051_s10, 4  ;;  %s812_s3 = sshll.u32 %s1051_s10, 6 }
  0x10   : > { %v955_v7 = vand.u32 4294901760, %v176_v6  ;;  %s163_s26 = sadd.s32 %s801_s25, %s1053_s20  ;;  %s171_s6 = scalar_lea.vmem %s1039_s2, %s812_s3 }
  0x11   : > { %v264_v8 = vsub.f32 %v806_v0, %v212_v3  ;;  %v270_v9 = vsub.f32 %v805_v1, %v214_v4  ;;  %348 = vmatpush.msra.mxu3 %v212_v3  ;;  %213 = vmatpush.msra.mxu0 %v212_v3  ;;  %v957_v10 = vsub.f32 %v177_v2, %v476_v5  ;;  %s802_s27 = sshll.u32 %s163_s26, 3  ;;  %s1016_s7 = scalar_lea.vmem %s171_s6, %s875_s9 }
  0x12   : > { %v961_v11 = vsub.f32 %v176_v6, %v955_v7  ;;  %s968_s30 = scalar_lea.vmem %s1038_s1, %s802_s27 }
  0x13   : > { %308 = vmatpush.msra.mxu2 %v264_v8  ;;  %v265_v12 = vand.u32 4294901760, %v264_v8  ;;  %350 = vmatpush.msra.mxu3 %v214_v4  ;;  %v271_v13 = vand.u32 4294901760, %v270_v9  ;;  %v529_v14 = vand.u32 4294901760, %v957_v10  ;;  %v178_v19 = vld [vmem:[%s968_s30 + $0x20] sm:$0xff]  ;;  %v179_v20 = vld [vmem:[%s968_s30 + $0x28] sm:$0xff]  ;;  %v180_v28 = vld [vmem:[%s968_s30 + $0x30] sm:$0xff] }
  0x14   : > { %215 = vmatpush.msra.mxu0 %v214_v4  ;;  %v535_v15 = vand.u32 4294901760, %v961_v11  ;;  %v187_v22 = vsel %vm185_vm0, %v178_v19, 0  ;;  %v190_v27 = vsel %vm185_vm0, %v179_v20, 0  ;;  %v193_v33 = vsel %vm185_vm0, %v180_v28, 0  ;;  %v181_v39 = vld [vmem:[%s968_s30 + $0x38] sm:$0xff]  ;;  %v172_v42 = vld [vmem:[%s968_s30] sm:$0xff] }
  0x15   : > { %311 = vmatpush.msra.mxu2 %v270_v9  ;;  %v266_v16 = vsub.f32 %v264_v8, %v265_v12  ;;  %v272_v17 = vsub.f32 %v270_v9, %v271_v13  ;;  %v530_v18 = vsub.f32 %v957_v10, %v529_v14  ;;  %v975_v26 = vand.u32 4294901760, %v187_v22  ;;  %v173_v51 = vld [vmem:[%s968_s30 + $0x8] sm:$0xff]  ;;  %v174_v59 = vld [vmem:[%s968_s30 + $0x10] sm:$0xff] }
  0x16   : > { %393 = vmatpush.msrb.mxu0 %v265_v12  ;;  %v536_v21 = vsub.f32 %v961_v11, %v535_v15  ;;  %v980_v30 = vand.u32 4294901760, %v190_v27  ;;  %v986_v37 = vand.u32 4294901760, %v193_v33  ;;  %v196_v43 = vsel %vm185_vm0, %v181_v39, 0 }
  0x17   : > { %477 = vmatpush.msrb.mxu2 %v476_v5  ;;  %v267_v23 = vand.u32 4294901760, %v266_v16  ;;  %v273_v24 = vand.u32 4294901760, %v272_v17  ;;  %v531_v25 = vand.u32 4294901760, %v530_v18  ;;  %v217_v31 = vsub.f32 %v187_v22, %v975_v26 }
  0x18   : > { %397 = vmatpush.msrb.mxu0 %v271_v13  ;;  %v537_v29 = vand.u32 4294901760, %v536_v21  ;;  %v225_v32 = vsub.f32 %v190_v27, %v980_v30  ;;  %v233_v41 = vsub.f32 %v193_v33, %v986_v37  ;;  %v451_v44 = vsel %vm185_vm0, %v172_v42, 0 }
  0x19   : > { %479 = vmatpush.msrb.mxu2 %v955_v7  ;;  %268 = vmatpush.msra.mxu1 %v267_v23  ;;  %v218_v34 = vand.u32 4294901760, %v217_v31  ;;  %v240_v47 = vand.u32 4294901760, %v196_v43  ;;  %v480_v48 = vand.u32 4294901760, %v451_v44  ;;  %v454_v53 = vsel %vm185_vm0, %v173_v51, 0 }
  0x1a   : > { %532 = vmatpush.msrb.mxu3 %v531_v25  ;;  %314 = vmatmul.f32.vlgmr.msra.gmra.mxu2 %v217_v31  ;;  %v226_v36 = vand.u32 4294901760, %v225_v32  ;;  %v234_v46 = vand.u32 4294901760, %v233_v41  ;;  %v488_v57 = vand.u32 4294901760, %v454_v53  ;;  %v457_v62 = vsel %vm185_vm0, %v174_v59, 0 }
  0x1b   : > { %274 = vmatpush.msra.mxu1 %v273_v24  ;;  %657 = vmatpush.msra.mxu2 %v529_v14  ;;  %v219_v35 = vsub.f32 %v217_v31, %v218_v34  ;;  %v241_v50 = vsub.f32 %v196_v43, %v240_v47  ;;  %v481_v52 = vsub.f32 %v451_v44, %v480_v48  ;;  %v496_v2 = vand.u32 4294901760, %v457_v62 }
  0x1c   : > { %538 = vmatpush.msrb.mxu3 %v537_v29  ;;  %276 = vmatmul.f32.vlgmr.msra.gmra.mxu1 %v975_v26  ;;  %v227_v40 = vsub.f32 %v225_v32, %v226_v36  ;;  %v235_v49 = vsub.f32 %v233_v41, %v234_v46  ;;  %v489_v61 = vsub.f32 %v454_v53, %v488_v57 }
  0x1d   : > { %430 = vmatpush.msrb.mxu1 %v212_v3  ;;  %354 = vmatmul.f32.vlgmr.msra.gmra.mxu3 %v218_v34  ;;  %v220_v38 = vand.u32 4294901760, %v219_v35  ;;  %v242_v55 = vand.u32 4294901760, %v241_v50  ;;  %v482_v56 = vand.u32 4294901760, %v481_v52  ;;  %v175_v3 = vld [vmem:[%s968_s30 + $0x18] sm:$0xff] }
  0x1e   : > { %694 = vmatpush.msra.mxu3 %v476_v5  ;;  %661 = vmatpush.msra.mxu2 %v535_v15  ;;  %v228_v45 = vand.u32 4294901760, %v227_v40  ;;  %v236_v54 = vand.u32 4294901760, %v235_v49  ;;  %v490_v1 = vand.u32 4294901760, %v489_v61  ;;  %v460_v6 = vsel %vm185_vm0, %v175_v3, 0 }
  0x1f   : > { %432 = vmatpush.msrb.mxu1 %v214_v4  ;;  %221 = vmatmul.f32.vlgmr.msra.gmra.mxu0 %v220_v38  ;;  %v243_v58 = vsub.f32 %v241_v50, %v242_v55  ;;  %v483_v60 = vsub.f32 %v481_v52, %v482_v56  ;;  %v504_v9 = vand.u32 4294901760, %v460_v6 }
  0x20   : > { %696 = vmatpush.msra.mxu3 %v955_v7  ;;  %572 = vmatpush.msra.mxu0 %v957_v10  ;;  %v491_v4 = vsub.f32 %v489_v61, %v490_v1 }
  0x21   : > { %612 = vmatpush.msra.mxu1 %v476_v5  ;;  %v244_v63 = vand.u32 4294901760, %v243_v58  ;;  %v484_v0 = vand.u32 4294901760, %v483_v60  ;;  %v497_v5 = vsub.f32 %v457_v62, %v496_v2 }
  0x22   : > { %319 = vmatmul.f32.gmra.mxu2 %v225_v32  ;;  %575 = vmatpush.msra.mxu0 %v961_v11  ;;  %v505_v11 = vsub.f32 %v460_v6, %v504_v9 }
  0x23   : > { %614 = vmatpush.msra.mxu1 %v955_v7  ;;  %v492_v7 = vand.u32 4294901760, %v491_v4  ;;  %v498_v8 = vand.u32 4294901760, %v497_v5 }
  0x24   : > { %280 = vmatmul.f32.gmra.mxu1 %v980_v30  ;;  %v506_v13 = vand.u32 4294901760, %v505_v11 }
  0x25   : > { %360 = vmatmul.f32.gmra.mxu3 %v226_v36  ;;  %v499_v10 = vsub.f32 %v497_v5, %v498_v8 }
  0x26   : > { %v507_v14 = vsub.f32 %v505_v11, %v506_v13 }
  0x27   : > { %229 = vmatmul.f32.gmra.mxu0 %v228_v45  ;;  %v500_v12 = vand.u32 4294901760, %v499_v10 }
  0x28   : > { %v508_v15 = vand.u32 4294901760, %v507_v14 }
  0x2a   : > { %324 = vmatmul.f32.gmra.mxu2 %v233_v41 }
  0x2c   : > { %284 = vmatmul.f32.gmra.mxu1 %v986_v37 }
  0x2d   : > { %366 = vmatmul.f32.gmra.mxu3 %v234_v46 }
  0x2f   : > { %237 = vmatmul.f32.gmra.mxu0 %v236_v54 }
  0x32   : > { %329 = vmatmul.f32.gmra.mxu2 %v241_v50 }
  0x34   : > { %288 = vmatmul.f32.gmra.mxu1 %v240_v47 }
  0x35   : > { %372 = vmatmul.f32.gmra.mxu3 %v242_v55 }
  0x37   : > { %245 = vmatmul.f32.gmra.mxu0 %v244_v63 }
  0x3a   : > { %485 = vmatmul.f32.vlgmr.msrb.gmra.mxu2 %v484_v0 }
  0x3c   : > { %434 = vmatmul.f32.vlgmr.msrb.gmra.mxu1 %v975_v26 }
  0x3d   : > { %540 = vmatmul.f32.vlgmr.msrb.gmra.mxu3 %v480_v48 }
  0x3f   : > { %399 = vmatmul.f32.vlgmr.msrb.gmra.mxu0 %v975_v26 }
  0x42   : > { %493 = vmatmul.f32.gmra.mxu2 %v492_v7 }
  0x44   : > { %438 = vmatmul.f32.gmra.mxu1 %v980_v30 }
  0x45   : > { %544 = vmatmul.f32.gmra.mxu3 %v488_v57 }
  0x47   : > { %403 = vmatmul.f32.gmra.mxu0 %v980_v30 }
  0x4a   : > { %501 = vmatmul.f32.gmra.mxu2 %v500_v12 }
  0x4c   : > { %442 = vmatmul.f32.gmra.mxu1 %v986_v37 }
  0x4d   : > { %548 = vmatmul.f32.gmra.mxu3 %v496_v2 }
  0x4f   : > { %407 = vmatmul.f32.gmra.mxu0 %v986_v37 }
  0x52   : > { %509 = vmatmul.f32.gmra.mxu2 %v508_v15 }
  0x54   : > { %446 = vmatmul.f32.gmra.mxu1 %v240_v47 }
  0x55   : > { %552 = vmatmul.f32.gmra.mxu3 %v504_v9 }
  0x57   : > { %411 = vmatmul.f32.gmra.mxu0 %v240_v47 }
  0x5a   : > { %663 = vmatmul.f32.vlgmr.msra.gmra.mxu2 %v480_v48 }
  0x5c   : > { %618 = vmatmul.f32.vlgmr.msra.gmra.mxu1 %v482_v56 }
  0x5d   : > { %698 = vmatmul.f32.vlgmr.msra.gmra.mxu3 %v480_v48 }
  0x5f   : > { %578 = vmatmul.f32.vlgmr.msra.gmra.mxu0 %v481_v52 }
  0x62   : > { %667 = vmatmul.f32.gmra.mxu2 %v488_v57 }
  0x64   : > { %624 = vmatmul.f32.gmra.mxu1 %v490_v1 }
  0x65   : > { %702 = vmatmul.f32.gmra.mxu3 %v488_v57 }
  0x67   : > { %583 = vmatmul.f32.gmra.mxu0 %v489_v61 }
  0x6a   : > { %671 = vmatmul.f32.gmra.mxu2 %v496_v2 }
  0x6c   : > { %630 = vmatmul.f32.gmra.mxu1 %v498_v8 }
  0x6d   : > { %706 = vmatmul.f32.gmra.mxu3 %v496_v2 }
  0x6f   : > { %588 = vmatmul.f32.gmra.mxu0 %v497_v5 }
  0x72   : > { %675 = vmatmul.f32.gmra.mxu2 %v504_v9 }
  0x74   : > { %636 = vmatmul.f32.gmra.mxu1 %v506_v13 }
  0x75   : > { %710 = vmatmul.f32.gmra.mxu3 %v504_v9 }
  0x77   : > { %593 = vmatmul.f32.gmra.mxu0 %v505_v11 }
  0x99   : > { %v277_v16 = vpop.f32.mrf.mxu1 }
  0x9c   : > { %v222_v17 = vpop.f32.mrf.mxu0 }
  0x9d   : > { %v315_v18 = vpop.f32.mrf.mxu2  ;;  %v278_v39 = vadd.f32 %v277_v16, %v222_v17 }
  0x9f   : > { %v316_v42 = vadd.f32 %v315_v18, %v278_v39 }
  0xa0   : > { %v355_v19 = vpop.f32.mrf.mxu3 }
  0xa1   : > { %v281_v20 = vpop.f32.mrf.mxu1  ;;  %v356_v45 = vadd.f32 %v355_v19, %v316_v42 }
  0xa4   : > { %v230_v21 = vpop.f32.mrf.mxu0 }
  0xa5   : > { %v320_v22 = vpop.f32.mrf.mxu2  ;;  %v282_v46 = vadd.f32 %v281_v20, %v230_v21 }
  0xa7   : > { %v321_v50 = vadd.f32 %v320_v22, %v282_v46 }
  0xa8   : > { %v361_v23 = vpop.f32.mrf.mxu3 }
  0xa9   : > { %v285_v24 = vpop.f32.mrf.mxu1  ;;  %v362_v54 = vadd.f32 %v361_v23, %v321_v50 }
  0xac   : > { %v238_v25 = vpop.f32.mrf.mxu0 }
  0xad   : > { %v325_v26 = vpop.f32.mrf.mxu2  ;;  %v286_v55 = vadd.f32 %v285_v24, %v238_v25 }
  0xaf   : > { %v326_v60 = vadd.f32 %v325_v26, %v286_v55 }
  0xb0   : > { %v367_v27 = vpop.f32.mrf.mxu3 }
  0xb1   : > { %v289_v28 = vpop.f32.mrf.mxu1  ;;  %v368_v1 = vadd.f32 %v367_v27, %v326_v60 }
  0xb4   : > { %v246_v29 = vpop.f32.mrf.mxu0 }
  0xb5   : > { %v330_v30 = vpop.f32.mrf.mxu2  ;;  %v290_v2 = vadd.f32 %v289_v28, %v246_v29 }
  0xb7   : > { %v331_v9 = vadd.f32 %v330_v30, %v290_v2 }
  0xb8   : > { %v373_v31 = vpop.f32.mrf.mxu3 }
  0xb9   : > { %v435_v32 = vpop.f32.mrf.mxu1  ;;  %v374_v16 = vadd.f32 %v373_v31, %v331_v9 }
  0xbc   : > { %v400_v33 = vpop.f32.mrf.mxu0 }
  0xbd   : > { %v486_v34 = vpop.f32.mrf.mxu2  ;;  %v401_v49 = vadd.f32 %v400_v33, %v356_v45 }
  0xbf   : > { %v436_v51 = vadd.f32 %v435_v32, %v401_v49 }
  0xc0   : > { %v541_v35 = vpop.f32.mrf.mxu3 }
  0xc1   : > { %v439_v36 = vpop.f32.mrf.mxu1  ;;  %v487_v58 = vadd.f32 %v486_v34, %v436_v51 }
  0xc3   : > { %v542_v61 = vadd.f32 %v541_v35, %v487_v58 }
  0xc4   : > { %v404_v37 = vpop.f32.mrf.mxu0 }
  0xc5   : > { %v494_v38 = vpop.f32.mrf.mxu2  ;;  %v405_v59 = vadd.f32 %v404_v37, %v362_v54 }
  0xc7   : > { %v440_v62 = vadd.f32 %v439_v36, %v405_v59 }
  0xc8   : > { %v545_v40 = vpop.f32.mrf.mxu3 }
  0xc9   : > { %v443_v41 = vpop.f32.mrf.mxu1  ;;  %v495_v5 = vadd.f32 %v494_v38, %v440_v62 }
  0xcb   : > { %v546_v11 = vadd.f32 %v545_v40, %v495_v5 }
  0xcc   : > { %v408_v43 = vpop.f32.mrf.mxu0 }
  0xcd   : > { %v502_v44 = vpop.f32.mrf.mxu2  ;;  %v409_v6 = vadd.f32 %v408_v43, %v368_v1 }
  0xcf   : > { %v444_v12 = vadd.f32 %v443_v41, %v409_v6 }
  0xd0   : > { %v549_v47 = vpop.f32.mrf.mxu3 }
  0xd1   : > { %v447_v48 = vpop.f32.mrf.mxu1  ;;  %v503_v19 = vadd.f32 %v502_v44, %v444_v12 }
  0xd3   : > { %v550_v24 = vadd.f32 %v549_v47, %v503_v19 }
  0xd4   : > { %v412_v52 = vpop.f32.mrf.mxu0 }
  0xd5   : > { %v510_v53 = vpop.f32.mrf.mxu2  ;;  %v413_v20 = vadd.f32 %v412_v52, %v374_v16 }
  0xd7   : > { %v448_v25 = vadd.f32 %v447_v48, %v413_v20 }
  0xd8   : > { %v553_v56 = vpop.f32.mrf.mxu3 }
  0xd9   : > { %v619_v57 = vpop.f32.mrf.mxu1  ;;  %v511_v32 = vadd.f32 %v510_v53, %v448_v25 }
  0xdb   : > { %v554_v34 = vadd.f32 %v553_v56, %v511_v32 }
  0xdc   : > { %v579_v63 = vpop.f32.mrf.mxu0 }
  0xdd   : > { %v664_v0 = vpop.f32.mrf.mxu2  ;;  %v580_v3 = vadd.f32 %v579_v63, %v542_v61 }
  0xdf   : > { %v620_v7 = vadd.f32 %v619_v57, %v580_v3 }
  0xe0   : > { %v699_v4 = vpop.f32.mrf.mxu3 }
  0xe1   : > { %v625_v8 = vpop.f32.mrf.mxu1  ;;  %v665_v10 = vadd.f32 %v664_v0, %v620_v7 }
  0xe3   : > { %v700_v13 = vadd.f32 %v699_v4, %v665_v10 }
  0xe4   : > { %v584_v14 = vpop.f32.mrf.mxu0 }
  0xe5   : > { %v668_v15 = vpop.f32.mrf.mxu2  ;;  %715 = vst [vmem:[%s1016_s7] ss:$2 sm:$0xff] %v700_v13  ;;  %v585_v17 = vadd.f32 %v584_v14, %v546_v11 }
  0xe7   : > { %v626_v21 = vadd.f32 %v625_v8, %v585_v17 }
  0xe8   : > { %v703_v18 = vpop.f32.mrf.mxu3 }
  0xe9   : > { %v669_v22 = vadd.f32 %v668_v15, %v626_v21  ;;  %v631_v23 = vpop.f32.mrf.mxu1 }
  0xeb   : > { %v704_v26 = vadd.f32 %v703_v18, %v669_v22 }
  0xec   : > { %v589_v27 = vpop.f32.mrf.mxu0 }
  0xed   : > { %v672_v28 = vpop.f32.mrf.mxu2  ;;  %807 = vst [vmem:[%s1016_s7 + $0x10] ss:$2 sm:$0xff] %v704_v26  ;;  %v590_v29 = vadd.f32 %v589_v27, %v550_v24 }
  0xef   : > { %v632_v31 = vadd.f32 %v631_v23, %v590_v29 }
  0xf0   : > { %v707_v30 = vpop.f32.mrf.mxu3 }
  0xf1   : > { %v673_v33 = vadd.f32 %v672_v28, %v632_v31  ;;  %v637_v37 = vpop.f32.mrf.mxu1 }
  0xf3   : > { %v708_v35 = vadd.f32 %v707_v30, %v673_v33 }
  0xf4   : > { %v594_v36 = vpop.f32.mrf.mxu0 }
  0xf5   : > { %808 = vst [vmem:[%s1016_s7 + $0x20] ss:$2 sm:$0xff] %v708_v35  ;;  %v595_v38 = vadd.f32 %v594_v36, %v554_v34  ;;  %v676_v39 = vpop.f32.mrf.mxu2 }
  0xf7   : > { %v638_v40 = vadd.f32 %v637_v37, %v595_v38 }
  0xf8   : > { %v711_v41 = vpop.f32.mrf.mxu3 }
  0xf9   : > { %v677_v42 = vadd.f32 %v676_v39, %v638_v40 }
  0xfb   : > { %v712_v43 = vadd.f32 %v711_v41, %v677_v42 }
  0xfd   : > { %809 = vst [vmem:[%s1016_s7 + $0x30] ss:$2 sm:$0xff] %v712_v43 }
  0xfe PF: > { %s12_s13 = sadd.s32 1, %s891_s13   ;;  %s1040_s9 = smov %s883_s11 }
  0xff   : > { %p9_p7 = scmp.ge.s32.totalorder %s12_s13, 6   ;;  %s1041_s10 = smov %s887_s12 }
 0x100   : > { %s1042_s11 = smov %s1045_s14  ;;  %s1043_s12 = smov %s1049_s15 }
 0x101   :  { %11 = sbr.rel (!%p9_p7) target bundleno = 3 (0x3), region = 63 }

// kernel: tpu_custom_call.1
= control target key start
LH: loop header
LB: loop body
LE: loop exit
PB: predicated region body
PF: predicated region fallthrough
CT: control target
= control target key end

     0   :  { %6 = vsyncpa [#allocation3], 0  ;;  %s6485_s0 = inlined_call_operand.hbm [shape: f32[2,8,16,16], index: 0, kind: input, shape index: {}]   ;;  %s6486_s1 = inlined_call_operand.hbm [shape: f32[2,2,32,32], index: 1, kind: output, shape index: {}]  }
   0x1   :  { %8 = vsyncpa [#allocation3 + $0x1], 0 }
   0x2   :  { %9 = vsyncpa [#allocation4], 0 }
   0x3   :  { %11 = vsyncpa [#allocation4 + $0x1], 0  ;;  %s4807_s6 = smov 0   ;;  %s4809_s7 = smov 0  }
   0x4   :  { %s4811_s8 = smov 0   ;;  %s4813_s9 = smov 0  }
   0x5 LB: > { %s4828_s10 = sadd.s32 4294967295, %s4789_s9   ;;  %s4469_s11 = sadd.s32 4294967294, %s4789_s9   ;;  %s4789_s9 = sphi %s4813_s9, %s6729_s9   ;;  %s4785_s8 = sphi %s4811_s8, %s6728_s8   ;;  %s4781_s7 = sphi %s4809_s7, %s6727_s7   ;;  %s4777_s6 = sphi %s4807_s6, %s6726_s6  }
   0x6   : > { %s4832_s12 = sadd.s32 1, %s4789_s9   ;;  %s24_s13 = sadd.s32 1, %s4785_s8 }
   0x7   : > { %s21_s14 = ssub.s32 %s4789_s9, %s4832_s12  ;;  %p31_p0 = scmp.ne.s32.totalorder %s4785_s8, %s4781_s7 }
   0x8   : > { %p22_p1 = scmp.eq.s32.totalorder %s21_s14, 0  ;;  %p32_p2 = scmp.eq.s32.totalorder %s4789_s9, 0 }
   0x9   : > { %p37_p3 = scmp.ne.s32.totalorder %s4781_s7, %s4777_s6  ;;  %p38_p4 = scmp.eq.s32.totalorder %s4828_s10, 0 }
   0xa   : > { %s4844_s15 = scalar_select %p22_p1, %s4785_s8, %s24_s13  }
   0xb   : > { %p4846_p5 = por %p32_p2, %p31_p0  ;;  %p4850_p6 = por %p38_p4, %p37_p3 }
   0xc   : > { %p61_p7 = scmp.eq.s32.totalorder %s4828_s10, 1  ;;  %p67_p8 = scmp.eq.s32.totalorder %s4469_s11, 1 }
   0xd   : > { %p4653_p10 = scmp.lt.s32.totalorder %s4789_s9, 2  ;;  %s87_s20 = sand.u32 1, %s4785_s8  }
   0xe   : > { %p4857_p11 = por %p61_p7, %p31_p0  ;;  %p4861_p12 = por %p67_p8, %p37_p3 }
   0xf   : > { %s4639_s21 = sshll.u32 %s4789_s9, 7  ;;  %s4472_s22 = sshll.u32 %s87_s20, 7 }
  0x10   : > { %s96_s25 = scalar_lea.hbm %s6485_s0, %s4639_s21  ;;  %s91_s27 = scalar_lea.vmem [#allocation2], %s4472_s22 }
  0x11   : > { %s97_s26 = sshll.u32 %s96_s25, 4  ;;  %s99_s28 = sshll.u32 %s91_s27, 4  ;;  %s98_s26 = int_to_ptr.hbm [resolvable:$true] %s97_s26  ;;  %s100_s28 = int_to_ptr.vmem [resolvable:$true] %s99_s28 }
  0x12   : > { %p4872_p13 = pnand %p4653_p10, %p4846_p5  ;;  %p4475_p0 = scmp.ge.s32.totalorder %s4789_s9, 1 }
  0x13   : > { %p107_p1 = scmp.lt.s32.totalorder %s4789_s9, 3  ;;  %s88_s30 = scalar_lea.sflag [#allocation3], %s87_s20 }
  0x14   : > { %s4693_s2 = sshra.s32 %s98_s26, 4  ;;  %p4697_p3 = pneg %p4872_p13  ;;  %s4694_s2 = int_to_ptr.hbm [resolvable:$true] %s4693_s2 }
  0x15   : > { %s4695_s3 = scalar_lea.hbm %s4694_s2, 128  ;;  %s4700_s11 = scalar_lea.hbm %s6485_s0, 256 }
  0x16   : > { %p4696_p2 = scmp.ne.s32.totalorder %s4694_s2, %s4695_s3  ;;  %p4701_p5 = scmp.lt.s32.totalorder %s4694_s2, %s6485_s0 }
  0x17   : > { %p4702_p8 = scmp.lt.s32.totalorder %s4700_s11, %s4695_s3 }
  0x18   : > { %p4698_p4 = pnand %p4697_p3, %p4696_p2 }
  0x19   : > { %p4703_p10 = por %p4702_p8, %p4701_p5 }
  0x1a   : > { %p4699_p7 = pneg %p4698_p4 }
  0x1c   : > { %p4704_p9 = pnand %p4703_p10, %p4699_p7 }
  0x1e   : > { %4707 = shalt.err (!%p4704_p9)
}
  0x1f   : > { %s4791_s16 = smov 128   ;;  %s4792_s20 = smov 8  }
  0x20   : > { %4648 = dma.hbm_to_vmem [thread:$0]  (!%p4872_p13), %s98_s26, 2048, %s100_s28, %s88_s30, %s4791_s16, %s4791_s16, %s4792_s20  }
  0x21   : > { %p108_p2 = pnand %p4475_p0, %p107_p1 }
  0x23   : > { %111 = sbr.rel (%p108_p2) target bundleno = 1211 (0x4bb), region = 24 }
  0x28   : > { %s4893_s21 = sand.u32 1, %s4781_s7  }
  0x29   : > { %s4476_s22 = sshll.u32 %s4893_s21, 7  ;;  %s114_s23 = scalar_lea.sflag [#allocation3], %s4893_s21 }
  0x2a   : > { %s4897_s24 = scalar_lea.vmem [#allocation2], %s4476_s22 }
  0x2b   : > { %4768 = dma.done.wait (%p4850_p6), %s114_s23, 2048  }
  0x2c   : > { %4770 = vsyncadd (%p4850_p6), %s114_s23, 4294965248  ;;  %v153_v0 = vlaneseq  ;;  %vm181_vm0 = vcmask 130048   ;;  %v138_v6 = vld [vmem:[%s4897_s24 + $0x8] sm:$0xff]  ;;  %v137_v7 = vld [vmem:[%s4897_s24] sm:$0xff]  ;;  %v6490_v8 = vmov 0.0   ;;  %s4477_s17 = sshll.u32 %s4893_s21, 6 }
  0x2d   : > { %v140_v10 = vld [vmem:[%s4897_s24 + $0x18] sm:$0xff]  ;;  %v208_v12 = vand.u32 4294901760, %v138_v6  ;;  %v210_v13 = vand.u32 4294901760, %v137_v7  ;;  %v139_v16 = vld [vmem:[%s4897_s24 + $0x10] sm:$0xff]  ;;  %v142_v56 = vld [vmem:[%s4897_s24 + $0x28] sm:$0xff]  ;;  %vm4371_vm13 = vcmask 261120  }
  0x2e   : > { %v4903_v1 = vshrl.u32 %v153_v0, 7  ;;  %v4905_v2 = vand.u32 127, %v153_v0  ;;  %v4933_v15 = vand.u32 4294901760, %v140_v10  ;;  %v4940_v19 = vand.u32 4294901760, %v139_v16  ;;  %v141_v62 = vld [vmem:[%s4897_s24 + $0x20] sm:$0xff]  ;;  %s6354_s25 = scalar_lea.vmem [#allocation5], %s4477_s17 }
  0x2f   : > { %209 = vmatpush.msra.mxu0 %v208_v12  ;;  %v260_v20 = vsub.f32 %v138_v6, %v208_v12  ;;  %344 = vmatpush.msra.mxu3 %v208_v12  ;;  %v266_v21 = vsub.f32 %v137_v7, %v210_v13  ;;  %v720_v57 = vand.u32 4294901760, %v142_v56  ;;  %v722_v63 = vand.u32 4294901760, %v141_v62  ;;  %s4640_s26 = sshll.u32 %s4828_s10, 6  ;;  %s4393_s10 = sshll.u32 %s6354_s25, 4  ;;  %s4394_s10 = int_to_ptr.vmem [resolvable:$true] %s4393_s10 }
  0x30   : > { %v4908_v3 = vmul.u32 2, %v4905_v2  ;;  %v4911_v4 = vadd.s32 8, %v4903_v1  ;;  %v4914_v5 = vadd.s32 16, %v4903_v1  ;;  %v512_v22 = vsub.f32 %v140_v10, %v4933_v15  ;;  %s4392_s29 = scalar_lea.hbm %s6486_s1, %s4640_s26  ;;  %s4381_s2 = scalar_lea.sflag [#allocation4], %s4893_s21 }
  0x31   : > { %v518_v26 = vsub.f32 %v139_v16, %v4940_v19  ;;  %304 = vmatpush.msra.mxu2 %v260_v20  ;;  %211 = vmatpush.msra.mxu0 %v210_v13  ;;  %v261_v27 = vand.u32 4294901760, %v260_v20  ;;  %v267_v29 = vand.u32 4294901760, %v266_v21  ;;  %v4956_v30 = vadd.s32 24, %v4903_v1  ;;  %s4395_s30 = sshll.u32 %s4392_s29, 4  ;;  %s4743_s13 = scalar_lea.hbm %s6486_s1, 128  ;;  %s4396_s30 = int_to_ptr.hbm [resolvable:$true] %s4395_s30 }
  0x32   : > { %6505 = vst [vmem:[#allocation8_spill] sm:$0xff] %v4908_v3  ;;  %vm161_vm1 = vcmp.eq.s32.totalorder %v4903_v1, %v4908_v3  ;;  %vm162_vm2 = vcmp.eq.s32.totalorder %v4911_v4, %v4908_v3  ;;  %vm163_vm3 = vcmp.eq.s32.totalorder %v4914_v5, %v4908_v3  ;;  %v513_v28 = vand.u32 4294901760, %v512_v22  ;;  %346 = vmatpush.msra.mxu3 %v210_v13  ;;  %s4737_s3 = sshra.s32 %s4396_s30, 4  ;;  %s4738_s3 = int_to_ptr.hbm [resolvable:$true] %s4737_s3 }
  0x33   : > { %6506 = vst [vmem:[#allocation9_spill] sm:$0xff] %v4914_v5  ;;  %v4923_v9 = vsel %vm161_vm1, 1.0, %v6490_v8  ;;  %v4927_v11 = vsel %vm162_vm2, 1.0, %v6490_v8  ;;  %v4952_v25 = vsel %vm163_vm3, 1.0, %v6490_v8  ;;  %v519_v33 = vand.u32 4294901760, %v518_v26  ;;  %307 = vmatpush.msra.mxu2 %v266_v21  ;;  %389 = vmatpush.msrb.mxu0 %v261_v27  ;;  %s4739_s4 = scalar_lea.hbm %s4738_s3, 64  ;;  %p4744_p0 = scmp.lt.s32.totalorder %s4738_s3, %s6486_s1 }
  0x34   : > { %v183_v14 = vsel %vm181_vm0, %v4923_v9, 0  ;;  %v186_v18 = vsel %vm181_vm0, %v4927_v11, 0  ;;  %6507 = vst [vmem:[#allocation10_spill] sm:$0xff] %v4956_v30  ;;  %v262_v34 = vsub.f32 %v260_v20, %v261_v27  ;;  %v514_v35 = vsub.f32 %v512_v22, %v513_v28  ;;  %p4740_p6 = scmp.ne.s32.totalorder %s4738_s3, %s4739_s4  ;;  %p4745_p1 = scmp.lt.s32.totalorder %s4743_s13, %s4739_s4 }
  0x35   : > { %v4936_v17 = vsub.f32 %v183_v14, %v183_v14  ;;  %v4946_v24 = vsub.f32 %v186_v18, %v186_v18  ;;  %v268_v36 = vsub.f32 %v266_v21, %v267_v29  ;;  %v189_v37 = vsel %vm181_vm0, %v4952_v25, 0  ;;  %461 = vmatpush.msrb.mxu2 %v4933_v15  ;;  %393 = vmatpush.msrb.mxu0 %v267_v29 }
  0x36   : > { %v520_v39 = vsub.f32 %v518_v26, %v519_v33  ;;  %v263_v40 = vand.u32 4294901760, %v262_v34  ;;  %v515_v41 = vand.u32 4294901760, %v514_v35  ;;  %vm164_vm4 = vcmp.eq.s32.totalorder %v4956_v30, %v4908_v3  ;;  %p4741_p9 = pnand %p4740_p6, %p4857_p11  ;;  %p4746_p3 = por %p4745_p1, %p4744_p0 }
  0x37   : > { %v4944_v23 = vand.u32 4294901760, %v4936_v17  ;;  %v4961_v32 = vand.u32 4294901760, %v4946_v24  ;;  %310 = vmatmul.f32.vlgmr.msra.gmra.mxu2 %v4936_v17  ;;  %v269_v42 = vand.u32 4294901760, %v268_v36  ;;  %v4975_v44 = vsub.f32 %v189_v37, %v189_v37 }
  0x38   : > { %v521_v45 = vand.u32 4294901760, %v520_v39  ;;  %264 = vmatpush.msra.mxu1 %v263_v40  ;;  %516 = vmatpush.msrb.mxu3 %v515_v41  ;;  %v4979_v46 = vsel %vm164_vm4, 1.0, %v6490_v8  ;;  %v772_v58 = vsub.f32 %v142_v56, %v720_v57  ;;  %v778_v0 = vsub.f32 %v141_v62, %v722_v63  ;;  %p4742_p13 = pneg %p4741_p9 }
  0x39   : > { %v215_v31 = vsub.f32 %v4936_v17, %v4944_v23  ;;  %350 = vmatmul.f32.vlgmr.msra.gmra.mxu3 %v4944_v23  ;;  %v223_v43 = vsub.f32 %v4946_v24, %v4961_v32  ;;  %463 = vmatpush.msrb.mxu2 %v4940_v19  ;;  %v4986_v48 = vand.u32 4294901760, %v4975_v44  ;;  %v192_v49 = vsel %vm181_vm0, %v4979_v46, 0 }
  0x3a   : > { %270 = vmatpush.msra.mxu1 %v269_v42  ;;  %522 = vmatpush.msrb.mxu3 %v521_v45  ;;  %v4996_v51 = vsub.f32 %v192_v49, %v192_v49  ;;  %v773_v59 = vand.u32 4294901760, %v772_v58  ;;  %v779_v6 = vand.u32 4294901760, %v778_v0  ;;  %v6536_v3 = vmov 1.0   ;;  %p4747_p4 = pnand %p4746_p3, %p4742_p13 }
  0x3b   : > { %v4966_v38 = vand.u32 4294901760, %v215_v31  ;;  %4484 = vmatmul.msk.f32.vlgmr.msra.gmra.mxu1 %vm181_vm0, %v4923_v9  ;;  %v4983_v47 = vand.u32 4294901760, %v223_v43  ;;  %641 = vmatpush.msra.mxu2 %v513_v28  ;;  %v231_v50 = vsub.f32 %v4975_v44, %v4986_v48 }
  0x3c   : > { %426 = vmatpush.msrb.mxu1 %v208_v12  ;;  %678 = vmatpush.msra.mxu3 %v4933_v15  ;;  %v5006_v53 = vand.u32 4294901760, %v4996_v51  ;;  %v774_v60 = vsub.f32 %v772_v58, %v773_v59  ;;  %v780_v7 = vsub.f32 %v778_v0, %v779_v6  ;;  %v144_v12 = vld [vmem:[%s4897_s24 + $0x38] sm:$0xff] }
  0x3d   : > { %217 = vmatmul.f32.vlgmr.msra.gmra.mxu0 %v4966_v38  ;;  %645 = vmatpush.msra.mxu2 %v519_v33  ;;  %v5003_v52 = vand.u32 4294901760, %v231_v50 }
  0x3e   : > { %556 = vmatpush.msra.mxu0 %v512_v22  ;;  %428 = vmatpush.msrb.mxu1 %v210_v13  ;;  %v239_v54 = vsub.f32 %v4996_v51, %v5006_v53  ;;  %v775_v61 = vand.u32 4294901760, %v774_v60  ;;  %v781_v10 = vand.u32 4294901760, %v780_v7  ;;  %v972_v13 = vand.u32 4294901760, %v144_v12 }
  0x3f   : > { %315 = vmatmul.f32.gmra.mxu2 %v4946_v24  ;;  %680 = vmatpush.msra.mxu3 %v4940_v19 }
  0x40   : > { %596 = vmatpush.msra.mxu1 %v4933_v15  ;;  %559 = vmatpush.msra.mxu0 %v518_v26  ;;  %v5015_v55 = vand.u32 4294901760, %v239_v54  ;;  %v1024_v14 = vsub.f32 %v144_v12, %v972_v13  ;;  %v6488_v12 = vmul.u32 2, %v4911_v4 }
  0x41   : > { %356 = vmatmul.f32.gmra.mxu3 %v4961_v32 }
  0x42   : > { %598 = vmatpush.msra.mxu1 %v4940_v19  ;;  %v1025_v15 = vand.u32 4294901760, %v1024_v14  ;;  %v143_v19 = vld [vmem:[%s4897_s24 + $0x30] sm:$0xff] }
  0x43   : > { %4485 = vmatmul.msk.f32.gmra.mxu1 %vm181_vm0, %v4927_v11  ;;  %v974_v20 = vand.u32 4294901760, %v143_v19 }
  0x44   : > { %v1026_v16 = vsub.f32 %v1024_v14, %v1025_v15 }
  0x45   : > { %225 = vmatmul.f32.gmra.mxu0 %v4983_v47  ;;  %v1030_v21 = vsub.f32 %v143_v19, %v974_v20 }
  0x46   : > { %v1027_v18 = vand.u32 4294901760, %v1026_v16 }
  0x47   : > { %320 = vmatmul.f32.gmra.mxu2 %v4975_v44  ;;  %v1031_v22 = vand.u32 4294901760, %v1030_v21 }
  0x49   : > { %362 = vmatmul.f32.gmra.mxu3 %v4986_v48  ;;  %v1032_v26 = vsub.f32 %v1030_v21, %v1031_v22 }
  0x4b   : > { %4486 = vmatmul.msk.f32.gmra.mxu1 %vm181_vm0, %v4952_v25  ;;  %v1033_v27 = vand.u32 4294901760, %v1032_v26 }
  0x4d   : > { %233 = vmatmul.f32.gmra.mxu0 %v5003_v52 }
  0x4f   : > { %325 = vmatmul.f32.gmra.mxu2 %v4996_v51 }
  0x51   : > { %368 = vmatmul.f32.gmra.mxu3 %v5006_v53 }
  0x53   : > { %4487 = vmatmul.msk.f32.gmra.mxu1 %vm181_vm0, %v4979_v46 }
  0x55   : > { %241 = vmatmul.f32.gmra.mxu0 %v5015_v55 }
  0x57   : > { %469 = vmatmul.f32.vlgmr.msrb.gmra.mxu2 %v4966_v38 }
  0x58   : > { %816 = vmatpush.msrb.mxu2 %v772_v58 }
  0x59   : > { %4496 = vmatmul.msk.f32.vlgmr.msrb.gmra.mxu3 %vm181_vm0, %v4923_v9 }
  0x5a   : > { %856 = vmatpush.msrb.mxu3 %v720_v57  ;;  %819 = vmatpush.msrb.mxu2 %v778_v0 }
  0x5b   : > { %4492 = vmatmul.msk.f32.vlgmr.msrb.gmra.mxu1 %vm181_vm0, %v4923_v9 }
  0x5c   : > { %776 = vmatpush.msrb.mxu1 %v775_v61  ;;  %858 = vmatpush.msrb.mxu3 %v722_v63 }
  0x5d   : > { %4488 = vmatmul.msk.f32.vlgmr.msrb.gmra.mxu0 %vm181_vm0, %v4923_v9 }
  0x5e   : > { %721 = vmatpush.msrb.mxu0 %v720_v57  ;;  %782 = vmatpush.msrb.mxu1 %v781_v10 }
  0x5f   : > { %477 = vmatmul.f32.gmra.mxu2 %v4983_v47 }
  0x60   : > { %723 = vmatpush.msrb.mxu0 %v722_v63 }
  0x61   : > { %4497 = vmatmul.msk.f32.gmra.mxu3 %vm181_vm0, %v4927_v11 }
  0x63   : > { %4493 = vmatmul.msk.f32.gmra.mxu1 %vm181_vm0, %v4927_v11 }
  0x65   : > { %4489 = vmatmul.msk.f32.gmra.mxu0 %vm181_vm0, %v4927_v11 }
  0x67   : > { %485 = vmatmul.f32.gmra.mxu2 %v5003_v52 }
  0x69   : > { %4498 = vmatmul.msk.f32.gmra.mxu3 %vm181_vm0, %v4952_v25 }
  0x6b   : > { %4494 = vmatmul.msk.f32.gmra.mxu1 %vm181_vm0, %v4952_v25 }
  0x6d   : > { %4490 = vmatmul.msk.f32.gmra.mxu0 %vm181_vm0, %v4952_v25 }
  0x6f   : > { %493 = vmatmul.f32.gmra.mxu2 %v5015_v55 }
  0x71   : > { %4499 = vmatmul.msk.f32.gmra.mxu3 %vm181_vm0, %v4979_v46 }
  0x73   : > { %4495 = vmatmul.msk.f32.gmra.mxu1 %vm181_vm0, %v4979_v46 }
  0x75   : > { %4491 = vmatmul.msk.f32.gmra.mxu0 %vm181_vm0, %v4979_v46 }
  0x77   : > { %4500 = vmatmul.msk.f32.vlgmr.msra.gmra.mxu2 %vm181_vm0, %v4923_v9 }
  0x78   : > { %973 = vmatpush.msra.mxu2 %v972_v13 }
  0x79   : > { %4504 = vmatmul.msk.f32.vlgmr.msra.gmra.mxu3 %vm181_vm0, %v4923_v9 }
  0x7a   : > { %1028 = vmatpush.msra.mxu3 %v1027_v18  ;;  %975 = vmatpush.msra.mxu2 %v974_v20 }
  0x7b   : > { %602 = vmatmul.f32.vlgmr.msra.gmra.mxu1 %v4944_v23 }
  0x7c   : > { %938 = vmatpush.msra.mxu1 %v720_v57  ;;  %1034 = vmatpush.msra.mxu3 %v1033_v27 }
  0x7d   : > { %562 = vmatmul.f32.vlgmr.msra.gmra.mxu0 %v4936_v17 }
  0x7e   : > { %901 = vmatpush.msra.mxu0 %v773_v59  ;;  %940 = vmatpush.msra.mxu1 %v722_v63 }
  0x7f   : > { %4501 = vmatmul.msk.f32.gmra.mxu2 %vm181_vm0, %v4927_v11 }
  0x80   : > { %905 = vmatpush.msra.mxu0 %v779_v6 }
  0x81   : > { %4505 = vmatmul.msk.f32.gmra.mxu3 %vm181_vm0, %v4927_v11 }
  0x83   : > { %608 = vmatmul.f32.gmra.mxu1 %v4961_v32 }
  0x85   : > { %567 = vmatmul.f32.gmra.mxu0 %v4946_v24 }
  0x87   : > { %4502 = vmatmul.msk.f32.gmra.mxu2 %vm181_vm0, %v4952_v25 }
  0x89   : > { %4506 = vmatmul.msk.f32.gmra.mxu3 %vm181_vm0, %v4952_v25 }
  0x8b   : > { %614 = vmatmul.f32.gmra.mxu1 %v4986_v48 }
  0x8d   : > { %572 = vmatmul.f32.gmra.mxu0 %v4975_v44 }
  0x8f   : > { %4503 = vmatmul.msk.f32.gmra.mxu2 %vm181_vm0, %v4979_v46 }
  0x91   : > { %4507 = vmatmul.msk.f32.gmra.mxu3 %vm181_vm0, %v4979_v46 }
  0x93   : > { %620 = vmatmul.f32.gmra.mxu1 %v5006_v53 }
  0x95   : > { %577 = vmatmul.f32.gmra.mxu0 %v4996_v51 }
  0x97   : > { %822 = vmatmul.f32.vlgmr.msrb.gmra.mxu2 %v4936_v17 }
  0x98   : > { %1153 = vmatpush.msrb.mxu2 %v1025_v15  ;;  %v6487_v15 = vmul.u32 2, %v4903_v1 }
  0x99   : > { %862 = vmatmul.f32.vlgmr.msrb.gmra.mxu3 %v4944_v23 }
  0x9a   : > { %1190 = vmatpush.msrb.mxu3 %v972_v13  ;;  %1157 = vmatpush.msrb.mxu2 %v1031_v22  ;;  %v6493_v22 = vmov 1.0  }
  0x9b   : > { %4510 = vmatmul.msk.f32.vlgmr.msrb.gmra.mxu1 %vm181_vm0, %v4923_v9 }
  0x9c   : > { %1192 = vmatpush.msrb.mxu3 %v974_v20  ;;  %1108 = vmatpush.msrb.mxu1 %v972_v13 }
  0x9d   : > { %729 = vmatmul.f32.vlgmr.msrb.gmra.mxu0 %v4966_v38 }
  0x9e   : > { %1068 = vmatpush.msrb.mxu0 %v1024_v14  ;;  %1110 = vmatpush.msrb.mxu1 %v974_v20  ;;  %v699_v14 = vadd.s32 1, %v6488_v12  ;;  %v698_v20 = vadd.s32 1, %v6487_v15 }
  0x9f   : > { %827 = vmatmul.f32.gmra.mxu2 %v4946_v24 }
  0xa0   : > { %1071 = vmatpush.msrb.mxu0 %v1030_v21  ;;  %vm5251_vm5 = vcmp.eq.s32.totalorder %v4905_v2, %v699_v14  ;;  %vm5269_vm6 = vcmp.eq.s32.totalorder %v4905_v2, %v698_v20 }
  0xa1   : > { %868 = vmatmul.f32.gmra.mxu3 %v4961_v32  ;;  %v4509_v21 = vsel %vm5251_vm5, 1.0, %v6490_v8  ;;  %v4508_v15 = vsel %vm5269_vm6, 1.0, %v6490_v8 }
  0xa2   : > { %v5266_v26 = vsub.f32 %v4509_v21, %v4509_v21  ;;  %v5286_v21 = vsub.f32 %v4508_v15, %v4508_v15 }
  0xa3   : > { %4511 = vmatmul.msk.f32.gmra.mxu1 %vm181_vm0, %v4927_v11 }
  0xa4   : > { %v5284_v20 = vand.u32 4294901760, %v5266_v26  ;;  %v5292_v8 = vand.u32 4294901760, %v5286_v21 }
  0xa5   : > { %737 = vmatmul.f32.gmra.mxu0 %v4983_v47 }
  0xa6   : > { %v1290_v30 = vsub.f32 %v5266_v26, %v5284_v20  ;;  %v1296_v15 = vsub.f32 %v5286_v21, %v5292_v8 }
  0xa7   : > { %832 = vmatmul.f32.gmra.mxu2 %v4975_v44 }
  0xa9   : > { %874 = vmatmul.f32.gmra.mxu3 %v4986_v48 }
  0xab   : > { %4512 = vmatmul.msk.f32.gmra.mxu1 %vm181_vm0, %v4952_v25 }
  0xad   : > { %745 = vmatmul.f32.gmra.mxu0 %v5003_v52 }
  0xaf   : > { %837 = vmatmul.f32.gmra.mxu2 %v4996_v51 }
  0xb1   : > { %880 = vmatmul.f32.gmra.mxu3 %v5006_v53 }
  0xb3   : > { %4513 = vmatmul.msk.f32.gmra.mxu1 %vm181_vm0, %v4979_v46 }
  0xb5   : > { %753 = vmatmul.f32.gmra.mxu0 %v5015_v55 }
  0xb7   : > { %981 = vmatmul.f32.vlgmr.msra.gmra.mxu2 %v4966_v38 }
  0xb8   : > { %v5107_v31 = vpop.f32.mrf.mxu1  ;;  %1332 = vmatpush.msra.mxu2 %v5266_v26 }
  0xb9   : > { %4522 = vmatmul.msk.f32.vlgmr.msra.gmra.mxu3 %vm181_vm0, %v4923_v9 }
  0xba   : > { %v5098_v28 = vpop.f32.mrf.mxu0  ;;  %v5109_v33 = vpop.f32.mrf.mxu2  ;;  %4536 = vmatpush.msk.msra.mxu3 %vm5251_vm5, %v6493_v22  ;;  %1335 = vmatpush.msra.mxu2 %v5286_v21 }
  0xbb   : > { %4518 = vmatmul.msk.f32.vlgmr.msra.gmra.mxu1 %vm181_vm0, %v4923_v9 }
  0xbc   : > { %v5105_v29 = vpop.f32.mrf.mxu3  ;;  %4537 = vmatpush.msk.msra.mxu3 %vm5269_vm6, %v6493_v22 }
  0xbd   : > { %4514 = vmatmul.msk.f32.vlgmr.msra.gmra.mxu0 %vm181_vm0, %v4923_v9 }
  0xbe   : > { %4534 = vmatpush.msk.msra.mxu0 %vm5251_vm5, %v6493_v22 }
  0xbf   : > { %989 = vmatmul.f32.gmra.mxu2 %v4983_v47 }
  0xc0   : > { %v5122_v36 = vpop.f32.mrf.mxu1  ;;  %4535 = vmatpush.msk.msra.mxu0 %vm5269_vm6, %v6493_v22 }
  0xc1   : > { %4523 = vmatmul.msk.f32.gmra.mxu3 %vm181_vm0, %v4927_v11 }
  0xc2   : > { %v5113_v34 = vpop.f32.mrf.mxu0  ;;  %v5124_v37 = vpop.f32.mrf.mxu2 }
  0xc3   : > { %4519 = vmatmul.msk.f32.gmra.mxu1 %vm181_vm0, %v4927_v11 }
  0xc4   : > { %v5120_v35 = vpop.f32.mrf.mxu3 }
  0xc5   : > { %4515 = vmatmul.msk.f32.gmra.mxu0 %vm181_vm0, %v4927_v11 }
  0xc7   : > { %997 = vmatmul.f32.gmra.mxu2 %v5003_v52 }
  0xc8   : > { %v5137_v40 = vpop.f32.mrf.mxu1 }
  0xc9   : > { %4524 = vmatmul.msk.f32.gmra.mxu3 %vm181_vm0, %v4952_v25 }
  0xca   : > { %v5128_v38 = vpop.f32.mrf.mxu0  ;;  %v5139_v41 = vpop.f32.mrf.mxu2 }
  0xcb   : > { %4520 = vmatmul.msk.f32.gmra.mxu1 %vm181_vm0, %v4952_v25 }
  0xcc   : > { %v5135_v39 = vpop.f32.mrf.mxu3 }
  0xcd   : > { %4516 = vmatmul.msk.f32.gmra.mxu0 %vm181_vm0, %v4952_v25 }
  0xcf   : > { %1005 = vmatmul.f32.gmra.mxu2 %v5015_v55 }
  0xd0   : > { %v5152_v45 = vpop.f32.mrf.mxu1 }
  0xd1   : > { %4525 = vmatmul.msk.f32.gmra.mxu3 %vm181_vm0, %v4979_v46 }
  0xd2   : > { %v5143_v42 = vpop.f32.mrf.mxu0  ;;  %v5154_v47 = vpop.f32.mrf.mxu2 }
  0xd3   : > { %4521 = vmatmul.msk.f32.gmra.mxu1 %vm181_vm0, %v4979_v46 }
  0xd4   : > { %v5150_v43 = vpop.f32.mrf.mxu3 }
  0xd5   : > { %4517 = vmatmul.msk.f32.gmra.mxu0 %vm181_vm0, %v4979_v46 }
  0xd7   : > { %4526 = vmatmul.msk.f32.vlgmr.msrb.gmra.mxu2 %vm181_vm0, %v4923_v9 }
  0xd8   : > { %v5167_v52 = vpop.f32.mrf.mxu1  ;;  %4540 = vmatpush.msk.msrb.mxu2 %vm5251_vm5, %v6536_v3 }
  0xd9   : > { %4530 = vmatmul.msk.f32.vlgmr.msrb.gmra.mxu3 %vm181_vm0, %v4923_v9 }
  0xda   : > { %v5158_v49 = vpop.f32.mrf.mxu0  ;;  %v5169_v54 = vpop.f32.mrf.mxu2  ;;  %4541 = vmatpush.msk.msrb.mxu2 %vm5269_vm6, %v6536_v3 }
  0xdb   : > { %1114 = vmatmul.f32.vlgmr.msrb.gmra.mxu1 %v4944_v23 }
  0xdc   : > { %v5165_v50 = vpop.f32.mrf.mxu3 }
  0xdd   : > { %1074 = vmatmul.f32.vlgmr.msrb.gmra.mxu0 %v4936_v17  ;;  %6508 = vst [vmem:[#allocation11_spill] sm:$0xff] %v5165_v50 }
  0xde   : > { %1417 = vmatpush.msrb.mxu0 %v5284_v20 }
  0xdf   : > { %4527 = vmatmul.msk.f32.gmra.mxu2 %vm181_vm0, %v4927_v11 }
  0xe0   : > { %v5181_v17 = vpop.f32.mrf.mxu1  ;;  %1421 = vmatpush.msrb.mxu0 %v5292_v8 }
  0xe1   : > { %4531 = vmatmul.msk.f32.gmra.mxu3 %vm181_vm0, %v4927_v11 }
  0xe2   : > { %v5172_v55 = vpop.f32.mrf.mxu0  ;;  %v5183_v56 = vpop.f32.mrf.mxu2 }
  0xe3   : > { %6510 = vst [vmem:[#allocation13_spill] sm:$0xff] %v5183_v56  ;;  %1120 = vmatmul.f32.gmra.mxu1 %v4961_v32 }
  0xe4   : > { %v5179_v9 = vpop.f32.mrf.mxu3 }
  0xe5   : > { %1079 = vmatmul.f32.gmra.mxu0 %v4946_v24  ;;  %6509 = vst [vmem:[#allocation12_spill] sm:$0xff] %v5179_v9 }
  0xe7   : > { %4528 = vmatmul.msk.f32.gmra.mxu2 %vm181_vm0, %v4952_v25 }
  0xe8   : > { %v5195_v23 = vpop.f32.mrf.mxu1 }
  0xe9   : > { %4532 = vmatmul.msk.f32.gmra.mxu3 %vm181_vm0, %v4952_v25 }
  0xea   : > { %v5186_v57 = vpop.f32.mrf.mxu0  ;;  %v5197_v24 = vpop.f32.mrf.mxu2 }
  0xeb   : > { %6512 = vst [vmem:[#allocation15_spill] sm:$0xff] %v5197_v24  ;;  %1126 = vmatmul.f32.gmra.mxu1 %v4986_v48 }
  0xec   : > { %v5193_v11 = vpop.f32.mrf.mxu3 }
  0xed   : > { %1084 = vmatmul.f32.gmra.mxu0 %v4975_v44  ;;  %6511 = vst [vmem:[#allocation14_spill] sm:$0xff] %v5193_v11 }
  0xef   : > { %4529 = vmatmul.msk.f32.gmra.mxu2 %vm181_vm0, %v4979_v46 }
  0xf0   : > { %v5209_v32 = vpop.f32.mrf.mxu1 }
  0xf1   : > { %4533 = vmatmul.msk.f32.gmra.mxu3 %vm181_vm0, %v4979_v46  ;;  %6514 = vst [vmem:[#allocation17_spill] sm:$0xff] %v5209_v32 }
  0xf2   : > { %v5200_v58 = vpop.f32.mrf.mxu0  ;;  %v5211_v44 = vpop.f32.mrf.mxu2 }
  0xf3   : > { %6515 = vst [vmem:[#allocation18_spill] sm:$0xff] %v5211_v44  ;;  %1132 = vmatmul.f32.gmra.mxu1 %v5006_v53 }
  0xf4   : > { %v5207_v25 = vpop.f32.mrf.mxu3 }
  0xf5   : > { %1089 = vmatmul.f32.gmra.mxu0 %v4996_v51  ;;  %6513 = vst [vmem:[#allocation16_spill] sm:$0xff] %v5207_v25 }
  0xf8   : > { %v5218_v60 = vpop.f32.mrf.mxu1 }
  0xf9   : > { %6518 = vst [vmem:[#allocation21_spill] sm:$0xff] %v5218_v60 }
  0xfa   : > { %v5214_v59 = vpop.f32.mrf.mxu0  ;;  %v5220_v61 = vpop.f32.mrf.mxu2 }
  0xfb   : > { %6516 = vst [vmem:[#allocation19_spill] sm:$0xff] %v5214_v59 }
  0xfc   : > { %v5216_v48 = vpop.f32.mrf.mxu3  ;;  %6519 = vst [vmem:[#allocation22_spill] sm:$0xff] %v5220_v61 }
  0xfd   : > { %6517 = vst [vmem:[#allocation20_spill] sm:$0xff] %v5216_v48 }
 0x100   : > { %v5226_v51 = vpop.f32.mrf.mxu1 }
 0x101   : > { %6522 = vst [vmem:[#allocation25_spill] sm:$0xff] %v5226_v51 }
 0x102   : > { %v5222_v62 = vpop.f32.mrf.mxu0  ;;  %v5228_v63 = vpop.f32.mrf.mxu2 }
 0x103   : > { %6520 = vst [vmem:[#allocation23_spill] sm:$0xff] %v5222_v62 }
 0x104   : > { %v5224_v46 = vpop.f32.mrf.mxu3  ;;  %6523 = vst [vmem:[#allocation26_spill] sm:$0xff] %v5228_v63 }
 0x105   : > { %6521 = vst [vmem:[#allocation24_spill] sm:$0xff] %v5224_v46 }
 0x108   : > { %v5234_v53 = vpop.f32.mrf.mxu1 }
 0x109   : > { %6526 = vst [vmem:[#allocation29_spill] sm:$0xff] %v5234_v53 }
 0x10a   : > { %v5230_v0 = vpop.f32.mrf.mxu0  ;;  %v5236_v7 = vpop.f32.mrf.mxu2 }
 0x10b   : > { %6524 = vst [vmem:[#allocation27_spill] sm:$0xff] %v5230_v0 }
 0x10c   : > { %v5232_v6 = vpop.f32.mrf.mxu3  ;;  %6527 = vst [vmem:[#allocation30_spill] sm:$0xff] %v5236_v7 }
 0x10d   : > { %6525 = vst [vmem:[#allocation28_spill] sm:$0xff] %v5232_v6 }
 0x110   : > { %v5246_v16 = vpop.f32.mrf.mxu1 }
 0x111   : > { %6530 = vst [vmem:[#allocation33_spill] sm:$0xff] %v5246_v16 }
 0x112   : > { %v5238_v10 = vpop.f32.mrf.mxu0  ;;  %v5248_v18 = vpop.f32.mrf.mxu2 }
 0x113   : > { %6528 = vst [vmem:[#allocation31_spill] sm:$0xff] %v5238_v10 }
 0x114   : > { %v5241_v13 = vpop.f32.mrf.mxu3  ;;  %6531 = vst [vmem:[#allocation34_spill] sm:$0xff] %v5248_v18  ;;  %v5307_v18 = vand.u32 4294901760, %v1296_v15 }
 0x115   : > { %6529 = vst [vmem:[#allocation32_spill] sm:$0xff] %v5241_v13  ;;  %v5298_v13 = vand.u32 4294901760, %v1290_v30 }
 0x116   : > { %6538 = vst [vmem:[#allocation36_spill] sm:$0xff] %v5307_v18 }
 0x117   : > { %6537 = vst [vmem:[#allocation35_spill] sm:$0xff] %v5298_v13  ;;  %1292 = vmatpush.msra.mxu1 %v5298_v13  ;;  %1556 = vmatpush.msrb.mxu3 %v5298_v13 }
 0x118   : > { %v785_v5 = vpop.f32.mrf.mxu1 }
 0x119   : > { %1298 = vmatpush.msra.mxu1 %v5307_v18  ;;  %1562 = vmatpush.msrb.mxu3 %v5307_v18 }
 0x11a   : > { %v730_v14 = vpop.f32.mrf.mxu0  ;;  %v823_v22 = vpop.f32.mrf.mxu2 }
 0x11b   : > { %4538 = vmatpush.msk.msrb.mxu1 %vm5251_vm5, %v6536_v3  ;;  %v786_v53 = vadd.f32 %v785_v5, %v730_v14 }
 0x11c   : > { %v863_v12 = vpop.f32.mrf.mxu3 }
 0x11d   : > { %4539 = vmatpush.msk.msrb.mxu1 %vm5269_vm6, %v6536_v3  ;;  %v824_v63 = vadd.f32 %v823_v22, %v786_v53 }
 0x11f   : > { %v864_v24 = vadd.f32 %v863_v12, %v824_v63 }
 0x120   : > { %v789_v6 = vpop.f32.mrf.mxu1 }
 0x122   : > { %v738_v16 = vpop.f32.mrf.mxu0  ;;  %v828_v10 = vpop.f32.mrf.mxu2 }
 0x123   : > { %v790_v51 = vadd.f32 %v789_v6, %v738_v16 }
 0x124   : > { %v869_v30 = vpop.f32.mrf.mxu3 }
 0x125   : > { %v829_v56 = vadd.f32 %v828_v10, %v790_v51 }
 0x127   : > { %v870_v14 = vadd.f32 %v869_v30, %v829_v56 }
 0x128   : > { %v793_v25 = vpop.f32.mrf.mxu1 }
 0x12a   : > { %v746_v15 = vpop.f32.mrf.mxu0  ;;  %v833_v13 = vpop.f32.mrf.mxu2 }
 0x12b   : > { %v794_v50 = vadd.f32 %v793_v25, %v746_v15 }
 0x12c   : > { %v875_v7 = vpop.f32.mrf.mxu3 }
 0x130   : > { %v797_v0 = vpop.f32.mrf.mxu1 }
 0x132   : > { %v754_v44 = vpop.f32.mrf.mxu0  ;;  %v838_v18 = vpop.f32.mrf.mxu2 }
 0x133   : > { %v798_v12 = vadd.f32 %v797_v0, %v754_v44 }
 0x134   : > { %v881_v46 = vpop.f32.mrf.mxu3 }
 0x138   : > { %v943_v61 = vpop.f32.mrf.mxu1 }
 0x13a   : > { %v908_v11 = vpop.f32.mrf.mxu0  ;;  %v5320_v9 = vpop.f32.mrf.mxu2 }
 0x13b   : > { %v909_v48 = vadd.f32 %v908_v11, %v864_v24 }
 0x13c   : > { %v5318_v62 = vpop.f32.mrf.mxu3 }
 0x13d   : > { %v944_v60 = vadd.f32 %v943_v61, %v909_v48  ;;  %v834_v61 = vadd.f32 %v833_v13, %v794_v50 }
 0x13f   : > { %v1211_v59 = vsel %vm181_vm0, %v944_v60, 0  ;;  %v876_v10 = vadd.f32 %v875_v7, %v834_v61  ;;  %v839_v7 = vadd.f32 %v838_v18, %v798_v12 }
 0x140   : > { %v5323_v32 = vand.u32 4294901760, %v1211_v59  ;;  %v947_v48 = vpop.f32.mrf.mxu1 }
 0x142   : > { %v912_v5 = vpop.f32.mrf.mxu0  ;;  %v1241_v53 = vsub.f32 %v1211_v59, %v5323_v32  ;;  %1300 = vmatmul.f32.vlgmr.msra.gmra.mxu1 %v5323_v32  ;;  %v5332_v60 = vpop.f32.mrf.mxu2 }
 0x143   : > { %v913_v63 = vadd.f32 %v912_v5, %v870_v14  ;;  %4542 = vmatpush.msk.msra.mxu1 %vm5251_vm5, %v6536_v3 }
 0x144   : > { %v5327_v11 = vpop.f32.mrf.mxu3  ;;  %v1242_v24 = vand.u32 4294901760, %v1241_v53  ;;  %1338 = vmatmul.f32.vlgmr.msra.gmra.mxu2 %v1241_v53 }
 0x145   : > { %v948_v51 = vadd.f32 %v947_v48, %v913_v63  ;;  %1681 = vmatpush.msra.mxu2 %v5284_v20  ;;  %4543 = vmatpush.msk.msra.mxu1 %vm5269_vm6, %v6536_v3  ;;  %v882_v48 = vadd.f32 %v881_v46, %v839_v7 }
 0x146   : > { %v1243_v56 = vsub.f32 %v1241_v53, %v1242_v24  ;;  %1378 = vmatmul.f32.vlgmr.msra.gmra.mxu3 %v1242_v24 }
 0x147   : > { %v1214_v25 = vsel %vm181_vm0, %v948_v51, 0  ;;  %4544 = vmatpush.msk.msra.mxu3 %vm5251_vm5, %v6536_v3  ;;  %1685 = vmatpush.msra.mxu2 %v5292_v8 }
 0x148   : > { %v1244_v59 = vand.u32 4294901760, %v1243_v56  ;;  %v5343_v6 = vand.u32 4294901760, %v1214_v25  ;;  %v951_v30 = vpop.f32.mrf.mxu1 }
 0x149   : > { %4545 = vmatpush.msk.msra.mxu3 %vm5269_vm6, %v6536_v3 }
 0x14a   : > { %v916_v50 = vpop.f32.mrf.mxu0  ;;  %1245 = vmatmul.f32.vlgmr.msra.gmra.mxu0 %v1244_v59  ;;  %1304 = vmatmul.f32.gmra.mxu1 %v5343_v6  ;;  %v1249_v13 = vsub.f32 %v1214_v25, %v5343_v6  ;;  %v998_v15 = vpop.f32.mrf.mxu2 }
 0x14b   : > { %v917_v16 = vadd.f32 %v916_v50, %v876_v10  ;;  %1596 = vmatpush.msra.mxu0 %v5266_v26 }
 0x14c   : > { %v5350_v22 = vpop.f32.mrf.mxu3  ;;  %1343 = vmatmul.f32.gmra.mxu2 %v1249_v13  ;;  %v1250_v5 = vand.u32 4294901760, %v1249_v13 }
 0x14d   : > { %v952_v44 = vadd.f32 %v951_v30, %v917_v16  ;;  %1599 = vmatpush.msra.mxu0 %v5286_v21  ;;  %v1038_v30 = vadd.f32 %v5318_v62, %v5320_v9  ;;  %v1042_v9 = vadd.f32 %v5327_v11, %v5332_v60 }
 0x14e   : > { %1384 = vmatmul.f32.gmra.mxu3 %v1250_v5  ;;  %v1251_v0 = vsub.f32 %v1249_v13, %v1250_v5 }
 0x14f   : > { %v1217_v14 = vsel %vm181_vm0, %v952_v44, 0 }
 0x150   : > { %v5355_v53 = vand.u32 4294901760, %v1217_v14  ;;  %v1252_v24 = vand.u32 4294901760, %v1251_v0  ;;  %v955_v18 = vpop.f32.mrf.mxu1 }
 0x152   : > { %v920_v63 = vpop.f32.mrf.mxu0  ;;  %1253 = vmatmul.f32.gmra.mxu0 %v1252_v24  ;;  %1308 = vmatmul.f32.gmra.mxu1 %v5355_v53  ;;  %v1257_v61 = vsub.f32 %v1217_v14, %v5355_v53  ;;  %v5361_v25 = vpop.f32.mrf.mxu2 }
 0x153   : > { %v921_v51 = vadd.f32 %v920_v63, %v882_v48 }
 0x154   : > { %v5359_v56 = vpop.f32.mrf.mxu3  ;;  %1348 = vmatmul.f32.gmra.mxu2 %v1257_v61  ;;  %v1258_v59 = vand.u32 4294901760, %v1257_v61 }
 0x155   : > { %v956_v50 = vadd.f32 %v955_v18, %v921_v51 }
 0x156   : > { %1390 = vmatmul.f32.gmra.mxu3 %v1258_v59  ;;  %v1259_v10 = vsub.f32 %v1257_v61, %v1258_v59 }
 0x157   : > { %v1220_v12 = vsel %vm181_vm0, %v956_v50, 0 }
 0x158   : > { %v5364_v13 = vand.u32 4294901760, %v1220_v12  ;;  %v1260_v16 = vand.u32 4294901760, %v1259_v10  ;;  %v1115_v0 = vpop.f32.mrf.mxu1 }
 0x15a   : > { %v1075_v46 = vpop.f32.mrf.mxu0  ;;  %1261 = vmatmul.f32.gmra.mxu0 %v1260_v16  ;;  %1312 = vmatmul.f32.gmra.mxu1 %v5364_v13  ;;  %v1265_v5 = vsub.f32 %v1220_v12, %v5364_v13  ;;  %v1160_v14 = vpop.f32.mrf.mxu2 }
 0x15b   : > { %v1076_v7 = vadd.f32 %v1075_v46, %v1038_v30 }
 0x15c   : > { %v1195_v44 = vpop.f32.mrf.mxu3  ;;  %1353 = vmatmul.f32.gmra.mxu2 %v1265_v5  ;;  %v1266_v63 = vand.u32 4294901760, %v1265_v5 }
 0x15d   : > { %v1116_v24 = vadd.f32 %v1115_v0, %v1076_v7 }
 0x15e   : > { %1396 = vmatmul.f32.gmra.mxu3 %v1266_v63  ;;  %v1267_v48 = vsub.f32 %v1265_v5, %v1266_v63 }
 0x15f   : > { %v1161_v61 = vadd.f32 %v1160_v14, %v1116_v24 }
 0x160   : > { %v1268_v18 = vand.u32 4294901760, %v1267_v48  ;;  %v1121_v46 = vpop.f32.mrf.mxu1 }
 0x161   : > { %v1196_v62 = vadd.f32 %v1195_v44, %v1161_v61  ;;  %v1046_v44 = vadd.f32 %v5350_v22, %v998_v15 }
 0x162   : > { %v1080_v51 = vpop.f32.mrf.mxu0  ;;  %1269 = vmatmul.f32.gmra.mxu0 %v1268_v18  ;;  %1458 = vmatmul.f32.vlgmr.msrb.gmra.mxu1 %v5323_v32  ;;  %v1164_v16 = vpop.f32.mrf.mxu2 }
 0x163   : > { %v1081_v59 = vadd.f32 %v1080_v51, %v1042_v9  ;;  %v1475_v50 = vsel %vm181_vm0, %v1196_v62, 0 }
 0x164   : > { %v1199_v10 = vpop.f32.mrf.mxu3  ;;  %v5374_v12 = vand.u32 4294901760, %v1475_v50 }
 0x165   : > { %v1122_v30 = vadd.f32 %v1121_v46, %v1081_v59 }
 0x166   : > { %v5377_v5 = vsub.f32 %v1475_v50, %v5374_v12  ;;  %1564 = vmatmul.f32.vlgmr.msrb.gmra.mxu3 %v5374_v12  ;;  %v6542_v50 = vmov 0.0  }
 0x167   : > { %v1165_v7 = vadd.f32 %v1164_v16, %v1122_v30 }
 0x168   : > { %v1506_v11 = vand.u32 4294901760, %v5377_v5  ;;  %v1127_v18 = vpop.f32.mrf.mxu1 }
 0x169   : > { %v1200_v0 = vadd.f32 %v1199_v10, %v1165_v7  ;;  %v1050_v7 = vadd.f32 %v5359_v56, %v5361_v25 }
 0x16a   : > { %v1085_v60 = vpop.f32.mrf.mxu0  ;;  %v1507_v14 = vsub.f32 %v5377_v5, %v1506_v11  ;;  %1423 = vmatmul.f32.vlgmr.msrb.gmra.mxu0 %v5323_v32  ;;  %1462 = vmatmul.f32.gmra.mxu1 %v5343_v6  ;;  %v1168_v9 = vpop.f32.mrf.mxu2  ;;  %v6539_v32 = vmul.u32 2, %v4911_v4 }
 0x16b   : > { %v1086_v63 = vadd.f32 %v1085_v60, %v1046_v44  ;;  %v1478_v24 = vsel %vm181_vm0, %v1200_v0, 0 }
 0x16c   : > { %v1203_v48 = vpop.f32.mrf.mxu3  ;;  %v1508_v61 = vand.u32 4294901760, %v1507_v14  ;;  %v5388_v51 = vand.u32 4294901760, %v1478_v24  ;;  %vm5397_vm7 = vcmp.eq.s32.totalorder %v4905_v2, %v6539_v32 }
 0x16d   : > { %v1128_v62 = vadd.f32 %v1127_v18, %v1086_v63  ;;  %v4483_v10 = vsel %vm5397_vm7, 1.0, %v6542_v50  ;;  %4546 = vmatpush.msk.msrb.mxu0 %vm5397_vm7, %v6536_v3  ;;  %4548 = vmatpush.msk.msrb.mxu3 %vm5397_vm7, %v6536_v3 }
 0x16e   : > { %v5391_v22 = vsub.f32 %v1478_v24, %v5388_v51  ;;  %1509 = vmatmul.f32.vlgmr.msrb.gmra.mxu2 %v1508_v61  ;;  %1568 = vmatmul.f32.gmra.mxu3 %v5388_v51  ;;  %v5411_v30 = vsub.f32 %v4483_v10, %v4483_v10 }
 0x16f   : > { %v1169_v59 = vadd.f32 %v1168_v9, %v1128_v62 }
 0x170   : > { %v1514_v16 = vand.u32 4294901760, %v5391_v22  ;;  %v5419_v0 = vand.u32 4294901760, %v5411_v30  ;;  %1860 = vmatpush.msrb.mxu2 %v5411_v30  ;;  %v1133_v61 = vpop.f32.mrf.mxu1 }
 0x171   : > { %v1204_v60 = vadd.f32 %v1203_v48, %v1169_v59  ;;  %v6543_v59 = vmul.u32 2, %v4903_v1 }
 0x172   : > { %v1090_v46 = vpop.f32.mrf.mxu0  ;;  %1427 = vmatmul.f32.gmra.mxu0 %v5343_v6  ;;  %1466 = vmatmul.f32.gmra.mxu1 %v5355_v53  ;;  %v1515_v44 = vsub.f32 %v5391_v22, %v1514_v16  ;;  %v1172_v18 = vpop.f32.mrf.mxu2  ;;  %v1818_v6 = vsub.f32 %v5411_v30, %v5419_v0 }
 0x173   : > { %v1091_v14 = vadd.f32 %v1090_v46, %v1050_v7  ;;  %v1481_v63 = vsel %vm181_vm0, %v1204_v60, 0  ;;  %vm5436_vm8 = vcmp.eq.s32.totalorder %v4905_v2, %v6543_v59  ;;  %v274_v59 = vadd.f32 %v5107_v31, %v5098_v28 }
 0x174   : > { %v5423_v24 = vand.u32 4294901760, %v1481_v63  ;;  %v1516_v56 = vand.u32 4294901760, %v1515_v44  ;;  %v1207_v9 = vpop.f32.mrf.mxu3  ;;  %v5431_v62 = vand.u32 4294901760, %v1818_v6  ;;  %v4482_v7 = vsel %vm5436_vm8, 1.0, %v6542_v50  ;;  %4547 = vmatpush.msk.msrb.mxu0 %vm5436_vm8, %v6536_v3  ;;  %4549 = vmatpush.msk.msrb.mxu3 %vm5436_vm8, %v6536_v3 }
 0x175   : > { %v1134_v25 = vadd.f32 %v1133_v61, %v1091_v14  ;;  %v5448_v44 = vsub.f32 %v4482_v7, %v4482_v7  ;;  %v278_v31 = vadd.f32 %v5122_v36, %v5113_v34  ;;  %v282_v34 = vadd.f32 %v5137_v40, %v5128_v38  ;;  %v6547_v7 = vld [vmem:[#allocation17_spill] sm:$0xff] }
 0x176   : > { %v5428_v48 = vsub.f32 %v1481_v63, %v5423_v24  ;;  %1517 = vmatmul.f32.gmra.mxu2 %v1516_v56  ;;  %1572 = vmatmul.f32.gmra.mxu3 %v5423_v24  ;;  %v286_v40 = vadd.f32 %v5152_v45, %v5143_v42 }
 0x177   : > { %v1173_v32 = vadd.f32 %v1172_v18, %v1134_v25  ;;  %1820 = vmatpush.msrb.mxu1 %v5431_v62  ;;  %1863 = vmatpush.msrb.mxu2 %v5448_v44  ;;  %v5459_v63 = vand.u32 4294901760, %v5448_v44 }
 0x178   : > { %v1522_v46 = vand.u32 4294901760, %v5428_v48 }
 0x179   : > { %v1208_v60 = vadd.f32 %v1207_v9, %v1173_v32  ;;  %v1824_v56 = vsub.f32 %v5448_v44, %v5459_v63 }
 0x17a   : > { %1431 = vmatmul.f32.gmra.mxu0 %v5355_v53  ;;  %1470 = vmatmul.f32.gmra.mxu1 %v5364_v13  ;;  %v1523_v2 = vsub.f32 %v5428_v48, %v1522_v46 }
 0x17b   : > { %v1484_v14 = vsel %vm181_vm0, %v1208_v60, 0  ;;  %v5467_v53 = vand.u32 4294901760, %v1824_v56  ;;  %v6549_v56 = vld [vmem:[#allocation21_spill] sm:$0xff] }
 0x17c   : > { %v5461_v61 = vand.u32 4294901760, %v1484_v14  ;;  %v1524_v18 = vand.u32 4294901760, %v1523_v2 }
 0x17d   : > { %1826 = vmatpush.msrb.mxu1 %v5467_v53 }
 0x17e   : > { %v1529_v6 = vsub.f32 %v1484_v14, %v5461_v61  ;;  %1525 = vmatmul.f32.gmra.mxu2 %v1524_v18  ;;  %1576 = vmatmul.f32.gmra.mxu3 %v5461_v61 }
 0x180   : > { %v1530_v25 = vand.u32 4294901760, %v1529_v6 }
 0x182   : > { %1435 = vmatmul.f32.gmra.mxu0 %v5364_v13  ;;  %1642 = vmatmul.f32.vlgmr.msra.gmra.mxu1 %v1506_v11  ;;  %v1531_v9 = vsub.f32 %v1529_v6, %v1530_v25  ;;  %v312_v13 = vadd.f32 %v5109_v33, %v274_v59  ;;  %v6551_v59 = vld [vmem:[#allocation12_spill] sm:$0xff] }
 0x183   : > { %4550 = vmatpush.msk.msra.mxu1 %vm5397_vm7, %v6536_v3 }
 0x184   : > { %v1532_v32 = vand.u32 4294901760, %v1531_v9  ;;  %v352_v28 = vadd.f32 %v5105_v29, %v312_v13 }
 0x185   : > { %4551 = vmatpush.msk.msra.mxu1 %vm5436_vm8, %v6536_v3 }
 0x186   : > { %1533 = vmatmul.f32.gmra.mxu2 %v1532_v32  ;;  %1722 = vmatmul.f32.vlgmr.msra.gmra.mxu3 %v5374_v12  ;;  %v397_v33 = vadd.f32 %v5158_v49, %v352_v28  ;;  %v6550_v32 = vld [vmem:[#allocation13_spill] sm:$0xff]  ;;  %v6552_v28 = vld [vmem:[#allocation22_spill] sm:$0xff] }
 0x187   : > { %2084 = vmatpush.msra.mxu3 %v5431_v62  ;;  %v530_v13 = vadd.f32 %v6551_v59, %v6550_v32  ;;  %v6566_v32 = vld [vmem:[#allocation28_spill] sm:$0xff] }
 0x188   : > { %v432_v11 = vadd.f32 %v5167_v52, %v397_v33  ;;  %v322_v52 = vadd.f32 %v5139_v41, %v282_v34  ;;  %v6553_v33 = vld [vmem:[#allocation23_spill] sm:$0xff]  ;;  %v6554_v34 = vld [vmem:[#allocation20_spill] sm:$0xff] }
 0x189   : > { %2090 = vmatpush.msra.mxu3 %v5467_v53 }
 0x18a   : > { %1602 = vmatmul.f32.vlgmr.msra.gmra.mxu0 %v5377_v5  ;;  %1648 = vmatmul.f32.gmra.mxu1 %v1514_v16  ;;  %v317_v5 = vadd.f32 %v5124_v37, %v278_v31  ;;  %v1739_v36 = vsel %vm181_vm0, %v432_v11, 0  ;;  %v364_v38 = vadd.f32 %v5135_v39, %v322_v52 }
 0x18b   : > { %1945 = vmatpush.msra.mxu0 %v5419_v0  ;;  %v5510_v49 = vand.u32 4294901760, %v1739_v36 }
 0x18c   : > { %v358_v29 = vadd.f32 %v5120_v35, %v317_v5  ;;  %v405_v41 = vadd.f32 %v5186_v57, %v364_v38  ;;  %v569_v5 = vadd.f32 %v6553_v33, %v530_v13  ;;  %v6556_v38 = vld [vmem:[#allocation15_spill] sm:$0xff]  ;;  %v6567_v13 = vld [vmem:[#allocation33_spill] sm:$0xff] }
 0x18d   : > { %1949 = vmatpush.msra.mxu0 %v5459_v63  ;;  %v1769_v35 = vsub.f32 %v1739_v36, %v5510_v49 }
 0x18e   : > { %1687 = vmatmul.f32.vlgmr.msra.gmra.mxu2 %v5374_v12  ;;  %1726 = vmatmul.f32.gmra.mxu3 %v5388_v51  ;;  %v401_v37 = vadd.f32 %v5172_v55, %v358_v29  ;;  %v440_v16 = vadd.f32 %v5195_v23, %v405_v41 }
 0x18f   : > { %4552 = vmatpush.msk.msra.mxu2 %vm5397_vm7, %v6536_v3  ;;  %v1770_v55 = vand.u32 4294901760, %v1769_v35 }
 0x190   : > { %v436_v12 = vadd.f32 %v5181_v17, %v401_v37  ;;  %v1745_v57 = vsel %vm181_vm0, %v440_v16, 0  ;;  %v6555_v37 = vld [vmem:[#allocation25_spill] sm:$0xff]  ;;  %v6559_v16 = vld [vmem:[#allocation27_spill] sm:$0xff] }
 0x191   : > { %4553 = vmatpush.msk.msra.mxu2 %vm5436_vm8, %v6536_v3  ;;  %v1771_v39 = vsub.f32 %v1769_v35, %v1770_v55  ;;  %v610_v52 = vadd.f32 %v6555_v37, %v569_v5 }
 0x192   : > { %1607 = vmatmul.f32.gmra.mxu0 %v5391_v22  ;;  %1654 = vmatmul.f32.gmra.mxu1 %v1522_v46  ;;  %v327_v22 = vadd.f32 %v5154_v47, %v286_v40  ;;  %v6557_v40 = vld [vmem:[#allocation14_spill] sm:$0xff] }
 0x193   : > { %v1772_v23 = vand.u32 4294901760, %v1771_v39 }
 0x194   : > { %v370_v45 = vadd.f32 %v5150_v43, %v327_v22  ;;  %v6546_v43 = vld [vmem:[#allocation11_spill] sm:$0xff] }
 0x195   : > { %v526_v46 = vadd.f32 %v6546_v43, %v5169_v54 }
 0x196   : > { %1691 = vmatmul.f32.gmra.mxu2 %v5388_v51  ;;  %1730 = vmatmul.f32.gmra.mxu3 %v5423_v24  ;;  %v1742_v51 = vsel %vm181_vm0, %v436_v12, 0  ;;  %v409_v47 = vadd.f32 %v5200_v58, %v370_v45  ;;  %v6548_v58 = vld [vmem:[#allocation19_spill] sm:$0xff] }
 0x197   : > { %v5523_v17 = vand.u32 4294901760, %v1742_v51  ;;  %v564_v2 = vadd.f32 %v6548_v58, %v526_v46  ;;  %v6563_v58 = vld [vmem:[#allocation16_spill] sm:$0xff] }
 0x198   : > { %v444_v60 = vadd.f32 %v6547_v7, %v409_v47  ;;  %v6560_v47 = vld [vmem:[#allocation24_spill] sm:$0xff] }
 0x199   : > { %v1777_v42 = vsub.f32 %v1742_v51, %v5523_v17  ;;  %v604_v54 = vadd.f32 %v6549_v56, %v564_v2  ;;  %v534_v51 = vadd.f32 %v6557_v40, %v6556_v38 }
 0x19a   : > { %1612 = vmatmul.f32.gmra.mxu0 %v5428_v48  ;;  %1660 = vmatmul.f32.gmra.mxu1 %v1530_v25  ;;  %v1748_v18 = vsel %vm181_vm0, %v444_v60, 0  ;;  %v6562_v60 = vld [vmem:[#allocation18_spill] sm:$0xff] }
 0x19b   : > { %v1778_v48 = vand.u32 4294901760, %v1777_v42  ;;  %v649_v31 = vadd.f32 %v6552_v28, %v604_v54  ;;  %v574_v39 = vadd.f32 %v6559_v16, %v534_v51  ;;  %v538_v2 = vadd.f32 %v6563_v58, %v6562_v60  ;;  %v6565_v54 = vld [vmem:[#allocation31_spill] sm:$0xff]  ;;  %v146_v16 = vld [vmem:[%s4897_s24 + $0x48] sm:$0xff] }
 0x19d   : > { %v684_v36 = vadd.f32 %v6554_v34, %v649_v31 }
 0x19e   : > { %1695 = vmatmul.f32.gmra.mxu2 %v5423_v24  ;;  %1734 = vmatmul.f32.gmra.mxu3 %v5461_v61  ;;  %v5542_v24 = vand.u32 4294901760, %v1745_v57 }
 0x19f   : > { %v2003_v41 = vsel %vm181_vm0, %v684_v36, 0 }
 0x1a0   : > { %v1785_v14 = vsub.f32 %v1745_v57, %v5542_v24  ;;  %v5575_v45 = vand.u32 4294901760, %v2003_v41 }
 0x1a2   : > { %1617 = vmatmul.f32.gmra.mxu0 %v1529_v6  ;;  %1828 = vmatmul.f32.vlgmr.msrb.gmra.mxu1 %v5510_v49  ;;  %v5558_v6 = vand.u32 4294901760, %v1748_v18  ;;  %v1786_v9 = vand.u32 4294901760, %v1785_v14  ;;  %v5580_v46 = vsub.f32 %v2003_v41, %v5575_v45 }
 0x1a3   : > { %4554 = vmatpush.msk.msrb.mxu1 %vm5397_vm7, %v6536_v3 }
 0x1a4   : > { %v1793_v11 = vsub.f32 %v1748_v18, %v5558_v6  ;;  %v1787_v29 = vsub.f32 %v1785_v14, %v1786_v9  ;;  %v6564_v18 = vld [vmem:[#allocation30_spill] sm:$0xff] }
 0x1a5   : > { %4555 = vmatpush.msk.msrb.mxu1 %vm5436_vm8, %v6536_v3 }
 0x1a6   : > { %1699 = vmatmul.f32.gmra.mxu2 %v5461_v61  ;;  %1906 = vmatmul.f32.vlgmr.msrb.gmra.mxu3 %v1770_v55  ;;  %v1779_v61 = vsub.f32 %v1777_v42, %v1778_v48  ;;  %v1788_v12 = vand.u32 4294901760, %v1787_v29  ;;  %v6558_v55 = vld [vmem:[#allocation26_spill] sm:$0xff] }
 0x1a7   : > { %4556 = vmatpush.msk.msrb.mxu3 %vm5397_vm7, %v6536_v3  ;;  %v653_v22 = vadd.f32 %v6558_v55, %v610_v52  ;;  %v6568_v52 = vld [vmem:[#allocation34_spill] sm:$0xff]  ;;  %v6569_v55 = vld [vmem:[#allocation32_spill] sm:$0xff] }
 0x1a8   : > { %v1780_v25 = vand.u32 4294901760, %v1779_v61 }
 0x1a9   : > { %4557 = vmatpush.msk.msrb.mxu3 %vm5436_vm8, %v6536_v3 }
 0x1aa   : > { %1773 = vmatmul.f32.vlgmr.msrb.gmra.mxu0 %v1772_v23  ;;  %1832 = vmatmul.f32.gmra.mxu1 %v5523_v17  ;;  %v6561_v23 = vld [vmem:[#allocation29_spill] sm:$0xff] }
 0x1ab   : > { %2124 = vmatpush.msrb.mxu0 %v5411_v30 }
 0x1ad   : > { %2127 = vmatpush.msrb.mxu0 %v5448_v44 }
 0x1ae   : > { %1866 = vmatmul.f32.vlgmr.msrb.gmra.mxu2 %v1769_v35  ;;  %1912 = vmatmul.f32.gmra.mxu3 %v1778_v48  ;;  %v1794_v35 = vand.u32 4294901760, %v1793_v11  ;;  %v616_v48 = vadd.f32 %v6561_v23, %v574_v39 }
 0x1af   : > { %2209 = vmatpush.msrb.mxu2 %v5419_v0 }
 0x1b0   : > { %v1795_v57 = vsub.f32 %v1793_v11, %v1794_v35  ;;  %v657_v56 = vadd.f32 %v6564_v18, %v616_v48 }
 0x1b1   : > { %2213 = vmatpush.msrb.mxu2 %v5459_v63 }
 0x1b2   : > { %1781 = vmatmul.f32.gmra.mxu0 %v1780_v25  ;;  %1836 = vmatmul.f32.gmra.mxu1 %v5542_v24  ;;  %v1796_v7 = vand.u32 4294901760, %v1795_v57  ;;  %v579_v25 = vadd.f32 %v6565_v54, %v538_v2  ;;  %v692_v59 = vadd.f32 %v6566_v32, %v657_v56 }
 0x1b4   : > { %v622_v28 = vadd.f32 %v6567_v13, %v579_v25  ;;  %v2009_v37 = vsel %vm181_vm0, %v692_v59, 0 }
 0x1b5   : > { %v5604_v40 = vand.u32 4294901760, %v2009_v37 }
 0x1b6   : > { %1871 = vmatmul.f32.gmra.mxu2 %v1777_v42  ;;  %1918 = vmatmul.f32.gmra.mxu3 %v1786_v9  ;;  %v688_v42 = vadd.f32 %v6560_v47, %v653_v22  ;;  %v5612_v47 = vand.u32 4294901760, %v146_v16 }
 0x1b8   : > { %v2006_v61 = vsel %vm181_vm0, %v688_v42, 0  ;;  %v2357_v60 = vsub.f32 %v146_v16, %v5612_v47 }
 0x1b9   : > { %v5589_v9 = vand.u32 4294901760, %v2006_v61 }
 0x1ba   : > { %1789 = vmatmul.f32.gmra.mxu0 %v1788_v12  ;;  %1840 = vmatmul.f32.gmra.mxu1 %v5558_v6  ;;  %v661_v12 = vadd.f32 %v6568_v52, %v622_v28  ;;  %v2358_v2 = vand.u32 4294901760, %v2357_v60 }
 0x1bb   : > { %v5598_v29 = vsub.f32 %v2006_v61, %v5589_v9 }
 0x1bc   : > { %v696_v22 = vadd.f32 %v6569_v55, %v661_v12  ;;  %v2359_v25 = vsub.f32 %v2357_v60, %v2358_v2  ;;  %v145_v12 = vld [vmem:[%s4897_s24 + $0x40] sm:$0xff] }
 0x1bd   : > { %v2042_v41 = vand.u32 4294901760, %v5598_v29 }
 0x1be   : > { %1876 = vmatmul.f32.gmra.mxu2 %v1785_v14  ;;  %1924 = vmatmul.f32.gmra.mxu3 %v1794_v35  ;;  %v2034_v14 = vand.u32 4294901760, %v5580_v46  ;;  %v2360_v13 = vand.u32 4294901760, %v2359_v25 }
 0x1bf   : > { %v1301_v43 = vpop.f32.mrf.mxu1  ;;  %v2043_v48 = vsub.f32 %v5598_v29, %v2042_v41 }
 0x1c0   : > { %v2035_v5 = vsub.f32 %v5580_v46, %v2034_v14 }
 0x1c1   : > { %v2044_v56 = vand.u32 4294901760, %v2043_v48 }
 0x1c2   : > { %1797 = vmatmul.f32.gmra.mxu0 %v1796_v7  ;;  %1986 = vmatmul.f32.vlgmr.msra.gmra.mxu1 %v5510_v49  ;;  %v2036_v38 = vand.u32 4294901760, %v2035_v5 }
 0x1c3   : > { %2361 = vmatpush.msra.mxu1 %v2360_v13 }
 0x1c6   : > { %1881 = vmatmul.f32.gmra.mxu2 %v1793_v11  ;;  %2092 = vmatmul.f32.vlgmr.msra.gmra.mxu3 %v5575_v45 }
 0x1c7   : > { %v1246_v31 = vpop.f32.mrf.mxu0  ;;  %v1305_v33 = vpop.f32.mrf.mxu1  ;;  %2441 = vmatpush.msra.mxu3 %v5612_v47 }
 0x1c8   : > { %v1302_v34 = vadd.f32 %v1301_v43, %v1246_v31  ;;  %v1339_v36 = vpop.f32.mrf.mxu2  ;;  %v2012_v43 = vsel %vm181_vm0, %v696_v22, 0 }
 0x1c9   : > { %v1379_v35 = vpop.f32.mrf.mxu3  ;;  %v5626_v61 = vand.u32 4294901760, %v2012_v43 }
 0x1ca   : > { %v1340_v11 = vadd.f32 %v1339_v36, %v1302_v34  ;;  %1951 = vmatmul.f32.vlgmr.msra.gmra.mxu0 %v5510_v49  ;;  %1990 = vmatmul.f32.gmra.mxu1 %v5523_v17  ;;  %v5615_v49 = vsub.f32 %v2009_v37, %v5604_v40 }
 0x1cb   : > { %2306 = vmatpush.msra.mxu0 %v5612_v47 }
 0x1cc   : > { %v5606_v51 = vadd.f32 %v1379_v35, %v1340_v11  ;;  %v2050_v54 = vand.u32 4294901760, %v5615_v49 }
 0x1ce   : > { %2037 = vmatmul.f32.vlgmr.msra.gmra.mxu2 %v2036_v38  ;;  %2096 = vmatmul.f32.gmra.mxu3 %v5589_v9  ;;  %v2307_v38 = vand.u32 4294901760, %v145_v12 }
 0x1cf   : > { %v1254_v39 = vpop.f32.mrf.mxu0  ;;  %v1309_v57 = vpop.f32.mrf.mxu1  ;;  %2401 = vmatpush.msra.mxu2 %v2357_v60 }
 0x1d0   : > { %v1306_v42 = vadd.f32 %v1305_v33, %v1254_v39  ;;  %v1344_v23 = vpop.f32.mrf.mxu2  ;;  %v2051_v33 = vsub.f32 %v5615_v49, %v2050_v54  ;;  %v2363_v39 = vsub.f32 %v145_v12, %v2307_v38  ;;  %2308 = vmatpush.msra.mxu0 %v2307_v38  ;;  %2443 = vmatpush.msra.mxu3 %v2307_v38 }
 0x1d1   : > { %v1385_v7 = vpop.f32.mrf.mxu3 }
 0x1d2   : > { %v1345_v58 = vadd.f32 %v1344_v23, %v1306_v42  ;;  %1955 = vmatmul.f32.gmra.mxu0 %v5523_v17  ;;  %1994 = vmatmul.f32.gmra.mxu1 %v5542_v24  ;;  %v5633_v17 = vsub.f32 %v2012_v43, %v5626_v61  ;;  %v2052_v37 = vand.u32 4294901760, %v2051_v33  ;;  %v2364_v42 = vand.u32 4294901760, %v2363_v39 }
 0x1d3   : > { %2404 = vmatpush.msra.mxu2 %v2363_v39 }
 0x1d4   : > { %v5628_v18 = vadd.f32 %v1385_v7, %v1345_v58  ;;  %v2058_v52 = vand.u32 4294901760, %v5633_v17  ;;  %v2365_v43 = vsub.f32 %v2363_v39, %v2364_v42  ;;  %v6572_v39 = vld [vmem:[#allocation9_spill] sm:$0xff] }
 0x1d6   : > { %2045 = vmatmul.f32.gmra.mxu2 %v2044_v56  ;;  %2100 = vmatmul.f32.gmra.mxu3 %v5604_v40  ;;  %v2059_v22 = vsub.f32 %v5633_v17, %v2058_v52  ;;  %v2366_v58 = vand.u32 4294901760, %v2365_v43 }
 0x1d7   : > { %v1262_v32 = vpop.f32.mrf.mxu0  ;;  %v1313_v59 = vpop.f32.mrf.mxu1 }
 0x1d8   : > { %v1310_v28 = vadd.f32 %v1309_v57, %v1262_v32  ;;  %v1349_v31 = vpop.f32.mrf.mxu2  ;;  %v2060_v48 = vand.u32 4294901760, %v2059_v22  ;;  %2367 = vmatpush.msra.mxu1 %v2366_v58  ;;  %v147_v22 = vld [vmem:[%s4897_s24 + $0x50] sm:$0xff] }
 0x1d9   : > { %v1391_v5 = vpop.f32.mrf.mxu3 }
 0x1da   : > { %v1350_v34 = vadd.f32 %v1349_v31, %v1310_v28  ;;  %1959 = vmatmul.f32.gmra.mxu0 %v5542_v24  ;;  %1998 = vmatmul.f32.gmra.mxu1 %v5558_v6 }
 0x1dc   : > { %v5640_v36 = vadd.f32 %v1391_v5, %v1350_v34 }
 0x1de   : > { %2053 = vmatmul.f32.gmra.mxu2 %v2052_v37  ;;  %2104 = vmatmul.f32.gmra.mxu3 %v5626_v61 }
 0x1df   : > { %v1270_v35 = vpop.f32.mrf.mxu0  ;;  %v1459_v11 = vpop.f32.mrf.mxu1 }
 0x1e0   : > { %v1314_v55 = vadd.f32 %v1313_v59, %v1270_v35  ;;  %v1354_v24 = vpop.f32.mrf.mxu2 }
 0x1e1   : > { %v1397_v16 = vpop.f32.mrf.mxu3 }
 0x1e2   : > { %v1355_v57 = vadd.f32 %v1354_v24, %v1314_v55  ;;  %1963 = vmatmul.f32.gmra.mxu0 %v5558_v6  ;;  %2170 = vmatmul.f32.vlgmr.msrb.gmra.mxu1 %v2034_v14  ;;  %v6570_v14 = vld [vmem:[#allocation8_spill] sm:$0xff] }
 0x1e3   : > { %2523 = vmatpush.msrb.mxu1 %v5612_v47  ;;  %v5662_v32 = vadd.s32 1, %v6570_v14 }
 0x1e4   : > { %v5651_v23 = vadd.f32 %v1397_v16, %v1355_v57  ;;  %v2559_v16 = vand.u32 4294901760, %v147_v22 }
 0x1e5   : > { %2525 = vmatpush.msrb.mxu1 %v2307_v38  ;;  %vm2267_vm9 = vcmp.eq.s32.totalorder %v4903_v1, %v5662_v32  ;;  %vm2268_vm10 = vcmp.eq.s32.totalorder %v4911_v4, %v5662_v32  ;;  %vm2269_vm11 = vcmp.eq.s32.totalorder %v6572_v39, %v5662_v32 }
 0x1e6   : > { %2061 = vmatmul.f32.gmra.mxu2 %v2060_v48  ;;  %2250 = vmatmul.f32.vlgmr.msrb.gmra.mxu3 %v5575_v45  ;;  %v5703_v55 = vsel %vm2268_vm10, 1.0, %v6542_v50 }
 0x1e7   : > { %v1424_v7 = vpop.f32.mrf.mxu0  ;;  %v1463_v60 = vpop.f32.mrf.mxu1 }
 0x1e8   : > { %v1425_v56 = vadd.f32 %v1424_v7, %v5606_v51  ;;  %v148_v51 = vld [vmem:[%s4897_s24 + $0x58] sm:$0xff] }
 0x1e9   : > { %v1565_v25 = vpop.f32.mrf.mxu3  ;;  %v5667_v13 = vand.u32 4294901760, %v148_v51 }
 0x1ea   : > { %2130 = vmatmul.f32.vlgmr.msrb.gmra.mxu0 %v5580_v46  ;;  %2176 = vmatmul.f32.gmra.mxu1 %v2042_v41  ;;  %v5658_v6 = vadd.f32 %v1459_v11, %v1425_v56 }
 0x1eb   : > { %2486 = vmatpush.msrb.mxu0 %v2358_v2  ;;  %v5674_v28 = vsub.f32 %v148_v51, %v5667_v13 }
 0x1ed   : > { %2490 = vmatpush.msrb.mxu0 %v2364_v42  ;;  %v2610_v1 = vand.u32 4294901760, %v5674_v28 }
 0x1ee   : > { %2215 = vmatmul.f32.vlgmr.msrb.gmra.mxu2 %v5575_v45  ;;  %2254 = vmatmul.f32.gmra.mxu3 %v5589_v9 }
 0x1ef   : > { %v1428_v59 = vpop.f32.mrf.mxu0  ;;  %v1467_v46 = vpop.f32.mrf.mxu1  ;;  %2558 = vmatpush.msrb.mxu2 %v5667_v13  ;;  %v2611_v33 = vsub.f32 %v5674_v28, %v2610_v1 }
 0x1f0   : > { %v1429_v41 = vadd.f32 %v1428_v59, %v5628_v18  ;;  %v5682_v18 = vsel %vm2267_vm9, 1.0, %v6542_v50 }
 0x1f1   : > { %v1510_v47 = vpop.f32.mrf.mxu2  ;;  %v1569_v2 = vpop.f32.mrf.mxu3  ;;  %v2612_v34 = vand.u32 4294901760, %v2611_v33  ;;  %2560 = vmatpush.msrb.mxu2 %v2559_v16 }
 0x1f2   : > { %v1566_v45 = vadd.f32 %v1565_v25, %v1510_v47  ;;  %2135 = vmatmul.f32.gmra.mxu0 %v5598_v29  ;;  %2182 = vmatmul.f32.gmra.mxu1 %v2050_v54  ;;  %v5679_v31 = vadd.f32 %v1463_v60, %v1429_v41  ;;  %v2280_v29 = vsel %vm181_vm0, %v5682_v18, 0 }
 0x1f3   : > { %v5693_v11 = vsub.f32 %v2280_v29, %v2280_v29  ;;  %2613 = vmatpush.msrb.mxu3 %v2612_v34 }
 0x1f6   : > { %2219 = vmatmul.f32.gmra.mxu2 %v5589_v9  ;;  %2258 = vmatmul.f32.gmra.mxu3 %v5604_v40 }
 0x1f7   : > { %v1432_v5 = vpop.f32.mrf.mxu0  ;;  %v1471_v54 = vpop.f32.mrf.mxu1 }
 0x1f8   : > { %v1433_v37 = vadd.f32 %v1432_v5, %v5640_v36  ;;  %v5706_v36 = vand.u32 4294901760, %v5693_v11 }
 0x1f9   : > { %v1518_v12 = vpop.f32.mrf.mxu2  ;;  %v1573_v35 = vpop.f32.mrf.mxu3 }
 0x1fa   : > { %v1570_v9 = vadd.f32 %v1569_v2, %v1518_v12  ;;  %2140 = vmatmul.f32.gmra.mxu0 %v5615_v49  ;;  %2188 = vmatmul.f32.gmra.mxu1 %v2058_v52  ;;  %v5700_v38 = vadd.f32 %v1467_v46, %v1433_v37  ;;  %v2283_v49 = vsel %vm181_vm0, %v5703_v55, 0  ;;  %v2312_v48 = vsub.f32 %v5693_v11, %v5706_v36 }
 0x1fb   : > { %v5721_v7 = vsub.f32 %v2283_v49, %v2283_v49 }
 0x1fc   : > { %6571 = vst [vmem:[#allocation11_spill] sm:$0xff] %v5700_v38  ;;  %v5730_v25 = vand.u32 4294901760, %v2312_v48 }
 0x1fe   : > { %2223 = vmatmul.f32.gmra.mxu2 %v5604_v40  ;;  %2262 = vmatmul.f32.gmra.mxu3 %v5626_v61  ;;  %v2615_v40 = vsub.f32 %v147_v22, %v2559_v16 }
 0x1ff   : > { %v1436_v4 = vpop.f32.mrf.mxu0  ;;  %v1643_v24 = vpop.f32.mrf.mxu1 }
 0x200   : > { %v1437_v52 = vadd.f32 %v1436_v4, %v5651_v23  ;;  %v5726_v23 = vsel %vm2269_vm11, 1.0, %v6542_v50  ;;  %v2616_v58 = vand.u32 4294901760, %v2615_v40 }
 0x201   : > { %v1526_v57 = vpop.f32.mrf.mxu2  ;;  %v1577_v42 = vpop.f32.mrf.mxu3  ;;  %v2286_v14 = vsel %vm181_vm0, %v5726_v23, 0 }
 0x202   : > { %v1574_v43 = vadd.f32 %v1573_v35, %v1526_v57  ;;  %2145 = vmatmul.f32.gmra.mxu0 %v5633_v17  ;;  %4562 = vmatmul.msk.f32.vlgmr.msra.gmra.mxu1 %vm181_vm0, %v5682_v18  ;;  %v5723_v60 = vadd.f32 %v1471_v54, %v1437_v52  ;;  %v2617_v56 = vsub.f32 %v2615_v40, %v2616_v58  ;;  %v5734_v17 = vand.u32 4294901760, %v5721_v7 }
 0x203   : > { %2693 = vmatpush.msra.mxu1 %v5667_v13  ;;  %v5738_v33 = vsub.f32 %v2286_v14, %v2286_v14 }
 0x204   : > { %6573 = vst [vmem:[#allocation17_spill] sm:$0xff] %v5723_v60  ;;  %v2618_v46 = vand.u32 4294901760, %v2617_v56  ;;  %v2320_v54 = vsub.f32 %v5721_v7, %v5734_v17 }
 0x205   : > { %2695 = vmatpush.msra.mxu1 %v2559_v16  ;;  %v5753_v34 = vand.u32 4294901760, %v5738_v33 }
 0x206   : > { %2227 = vmatmul.f32.gmra.mxu2 %v5626_v61  ;;  %2447 = vmatmul.f32.vlgmr.msra.gmra.mxu3 %v5706_v36  ;;  %v6574_v61 = vld [vmem:[#allocation10_spill] sm:$0xff] }
 0x207   : > { %v1603_v51 = vpop.f32.mrf.mxu0  ;;  %v1649_v59 = vpop.f32.mrf.mxu1  ;;  %2619 = vmatpush.msrb.mxu3 %v2618_v46  ;;  %vm2270_vm12 = vcmp.eq.s32.totalorder %v6574_v61, %v5662_v32  ;;  %v5756_v32 = vand.u32 4294901760, %v2320_v54  ;;  %v2328_v4 = vsub.f32 %v5738_v33, %v5753_v34 }
 0x208   : > { %v1604_v41 = vadd.f32 %v1603_v51, %v1566_v45  ;;  %v5750_v45 = vsel %vm2270_vm12, 1.0, %v6542_v50 }
 0x209   : > { %v1534_v47 = vpop.f32.mrf.mxu2  ;;  %v1723_v2 = vpop.f32.mrf.mxu3  ;;  %2775 = vmatpush.msra.mxu3 %v5667_v13  ;;  %v2289_v35 = vsel %vm181_vm0, %v5750_v45, 0 }
 0x20a   : > { %v1578_v29 = vadd.f32 %v1577_v42, %v1534_v47  ;;  %2314 = vmatmul.f32.vlgmr.msra.gmra.mxu0 %v5730_v25  ;;  %v1644_v5 = vadd.f32 %v1643_v24, %v1604_v41  ;;  %4563 = vmatmul.msk.f32.gmra.mxu1 %vm181_vm0, %v5703_v55 }
 0x20b   : > { %2653 = vmatpush.msra.mxu0 %v5674_v28  ;;  %2777 = vmatpush.msra.mxu3 %v2559_v16  ;;  %v5768_v16 = vsub.f32 %v2289_v35, %v2289_v35  ;;  %v5773_v28 = vand.u32 4294901760, %v2328_v4 }
 0x20d   : > { %2656 = vmatpush.msra.mxu0 %v2615_v40 }
 0x20e   : > { %2407 = vmatmul.f32.vlgmr.msra.gmra.mxu2 %v5693_v11  ;;  %2453 = vmatmul.f32.gmra.mxu3 %v5734_v17 }
 0x20f   : > { %v1608_v37 = vpop.f32.mrf.mxu0  ;;  %v1655_v12 = vpop.f32.mrf.mxu1  ;;  %2738 = vmatpush.msra.mxu2 %v2610_v1  ;;  %v5777_v1 = vand.u32 4294901760, %v5768_v16 }
 0x210   : > { %v1609_v50 = vadd.f32 %v1608_v37, %v1570_v9 }
 0x211   : > { %v1688_v13 = vpop.f32.mrf.mxu2  ;;  %v1727_v22 = vpop.f32.mrf.mxu3  ;;  %2742 = vmatpush.msra.mxu2 %v2616_v58  ;;  %v2336_v56 = vsub.f32 %v5768_v16, %v5777_v1 }
 0x212   : > { %v1689_v24 = vadd.f32 %v1688_v13, %v1644_v5  ;;  %2322 = vmatmul.f32.gmra.mxu0 %v5756_v32  ;;  %v1650_v49 = vadd.f32 %v1649_v59, %v1609_v50  ;;  %4564 = vmatmul.msk.f32.gmra.mxu1 %vm181_vm0, %v5726_v23 }
 0x213   : > { %v5787_v51 = vand.u32 4294901760, %v2336_v56 }
 0x214   : > { %v5770_v52 = vadd.f32 %v1723_v2, %v1689_v24 }
 0x216   : > { %6575 = vst [vmem:[#allocation19_spill] sm:$0xff] %v5770_v52  ;;  %2412 = vmatmul.f32.gmra.mxu2 %v5721_v7  ;;  %2459 = vmatmul.f32.gmra.mxu3 %v5753_v34 }
 0x217   : > { %v1613_v9 = vpop.f32.mrf.mxu0  ;;  %v1661_v39 = vpop.f32.mrf.mxu1 }
 0x218   : > { %v1614_v57 = vadd.f32 %v1613_v9, %v1574_v43 }
 0x219   : > { %v1692_v42 = vpop.f32.mrf.mxu2  ;;  %v1731_v48 = vpop.f32.mrf.mxu3 }
 0x21a   : > { %v1693_v40 = vadd.f32 %v1692_v42, %v1650_v49  ;;  %2330 = vmatmul.f32.gmra.mxu0 %v5773_v28  ;;  %v1656_v58 = vadd.f32 %v1655_v12, %v1614_v57  ;;  %4565 = vmatmul.msk.f32.gmra.mxu1 %vm181_vm0, %v5750_v45 }
 0x21c   : > { %v5784_v14 = vadd.f32 %v1727_v22, %v1693_v40 }
 0x21e   : > { %6576 = vst [vmem:[#allocation21_spill] sm:$0xff] %v5784_v14  ;;  %2417 = vmatmul.f32.gmra.mxu2 %v5738_v33  ;;  %2465 = vmatmul.f32.gmra.mxu3 %v5777_v1 }
 0x21f   : > { %v1618_v43 = vpop.f32.mrf.mxu0  ;;  %v5790_v59 = vpop.f32.mrf.mxu1 }
 0x220   : > { %v1619_v46 = vadd.f32 %v1618_v43, %v1578_v29 }
 0x221   : > { %v1696_v41 = vpop.f32.mrf.mxu2  ;;  %v1735_v47 = vpop.f32.mrf.mxu3 }
 0x222   : > { %v1697_v2 = vadd.f32 %v1696_v41, %v1656_v58  ;;  %2338 = vmatmul.f32.gmra.mxu0 %v5787_v51  ;;  %v1662_v61 = vadd.f32 %v1661_v39, %v1619_v46  ;;  %4570 = vmatmul.msk.f32.vlgmr.msrb.gmra.mxu1 %vm181_vm0, %v5682_v18 }
 0x223   : > { %2877 = vmatpush.msrb.mxu1 %v5431_v62 }
 0x224   : > { %v5796_v5 = vadd.f32 %v1731_v48, %v1697_v2 }
 0x225   : > { %2883 = vmatpush.msrb.mxu1 %v5467_v53 }
 0x226   : > { %6577 = vst [vmem:[#allocation13_spill] sm:$0xff] %v5796_v5  ;;  %2422 = vmatmul.f32.gmra.mxu2 %v5768_v16  ;;  %4574 = vmatmul.msk.f32.vlgmr.msrb.gmra.mxu3 %vm181_vm0, %v5682_v18 }
 0x227   : > { %v5802_v29 = vpop.f32.mrf.mxu0  ;;  %v5804_v54 = vpop.f32.mrf.mxu1  ;;  %4588 = vmatpush.msk.msrb.mxu3 %vm5397_vm7, %v6536_v3 }
 0x228   : > { %6578 = vst [vmem:[#allocation12_spill] sm:$0xff] %v5804_v54 }
 0x229   : > { %v1700_v37 = vpop.f32.mrf.mxu2  ;;  %v5809_v12 = vpop.f32.mrf.mxu3  ;;  %4589 = vmatpush.msk.msrb.mxu3 %vm5436_vm8, %v6536_v3 }
 0x22a   : > { %6579 = vst [vmem:[#allocation22_spill] sm:$0xff] %v5809_v12  ;;  %v1701_v35 = vadd.f32 %v1700_v37, %v1662_v61  ;;  %4566 = vmatmul.msk.f32.vlgmr.msrb.gmra.mxu0 %vm181_vm0, %v5682_v18  ;;  %4571 = vmatmul.msk.f32.gmra.mxu1 %vm181_vm0, %v5703_v55 }
 0x22b   : > { %4586 = vmatpush.msk.msrb.mxu0 %vm5397_vm7, %v6536_v3 }
 0x22c   : > { %v5821_v50 = vadd.f32 %v1735_v47, %v1701_v35 }
 0x22d   : > { %4587 = vmatpush.msk.msrb.mxu0 %vm5436_vm8, %v6536_v3 }
 0x22e   : > { %6580 = vst [vmem:[#allocation23_spill] sm:$0xff] %v5821_v50  ;;  %2566 = vmatmul.f32.vlgmr.msrb.gmra.mxu2 %v5730_v25  ;;  %4575 = vmatmul.msk.f32.gmra.mxu3 %vm181_vm0, %v5703_v55 }
 0x22f   : > { %v5829_v13 = vpop.f32.mrf.mxu0  ;;  %v5831_v22 = vpop.f32.mrf.mxu1  ;;  %2917 = vmatpush.msrb.mxu2 %v5411_v30 }
 0x230   : > { %6581 = vst [vmem:[#allocation20_spill] sm:$0xff] %v5829_v13 }
 0x231   : > { %6582 = vst [vmem:[#allocation25_spill] sm:$0xff] %v5831_v22  ;;  %v5834_v4 = vpop.f32.mrf.mxu2  ;;  %v5836_v24 = vpop.f32.mrf.mxu3  ;;  %2920 = vmatpush.msrb.mxu2 %v5448_v44 }
 0x232   : > { %6583 = vst [vmem:[#allocation15_spill] sm:$0xff] %v5836_v24  ;;  %4567 = vmatmul.msk.f32.gmra.mxu0 %vm181_vm0, %v5703_v55  ;;  %4572 = vmatmul.msk.f32.gmra.mxu1 %vm181_vm0, %v5726_v23 }
 0x236   : > { %2574 = vmatmul.f32.gmra.mxu2 %v5756_v32  ;;  %4576 = vmatmul.msk.f32.gmra.mxu3 %vm181_vm0, %v5726_v23 }
 0x237   : > { %v5846_v49 = vpop.f32.mrf.mxu0  ;;  %v5848_v9 = vpop.f32.mrf.mxu1 }
 0x238   : > { %6584 = vst [vmem:[#allocation14_spill] sm:$0xff] %v5846_v49 }
 0x239   : > { %6585 = vst [vmem:[#allocation26_spill] sm:$0xff] %v5848_v9  ;;  %v5850_v39 = vpop.f32.mrf.mxu2  ;;  %v5852_v57 = vpop.f32.mrf.mxu3 }
 0x23a   : > { %6586 = vst [vmem:[#allocation27_spill] sm:$0xff] %v5850_v39  ;;  %4568 = vmatmul.msk.f32.gmra.mxu0 %vm181_vm0, %v5726_v23  ;;  %4573 = vmatmul.msk.f32.gmra.mxu1 %vm181_vm0, %v5750_v45 }
 0x23b   : > { %6587 = vst [vmem:[#allocation24_spill] sm:$0xff] %v5852_v57 }
 0x23e   : > { %2582 = vmatmul.f32.gmra.mxu2 %v5773_v28  ;;  %4577 = vmatmul.msk.f32.gmra.mxu3 %vm181_vm0, %v5750_v45 }
 0x23f   : > { %v5861_v42 = vpop.f32.mrf.mxu0  ;;  %v5863_v48 = vpop.f32.mrf.mxu1 }
 0x240   : > { %6588 = vst [vmem:[#allocation29_spill] sm:$0xff] %v5861_v42 }
 0x241   : > { %6589 = vst [vmem:[#allocation18_spill] sm:$0xff] %v5863_v48  ;;  %v5865_v40 = vpop.f32.mrf.mxu2  ;;  %v5867_v58 = vpop.f32.mrf.mxu3 }
 0x242   : > { %6590 = vst [vmem:[#allocation16_spill] sm:$0xff] %v5865_v40  ;;  %4569 = vmatmul.msk.f32.gmra.mxu0 %vm181_vm0, %v5750_v45  ;;  %2699 = vmatmul.f32.vlgmr.msra.gmra.mxu1 %v5706_v36 }
 0x243   : > { %6591 = vst [vmem:[#allocation30_spill] sm:$0xff] %v5867_v58  ;;  %4590 = vmatpush.msk.msra.mxu1 %vm5397_vm7, %v6536_v3 }
 0x245   : > { %4591 = vmatpush.msk.msra.mxu1 %vm5436_vm8, %v6536_v3 }
 0x246   : > { %2590 = vmatmul.f32.gmra.mxu2 %v5787_v51  ;;  %4582 = vmatmul.msk.f32.vlgmr.msra.gmra.mxu3 %vm181_vm0, %v5682_v18 }
 0x247   : > { %v5881_v56 = vpop.f32.mrf.mxu0  ;;  %v5883_v43 = vpop.f32.mrf.mxu1  ;;  %3141 = vmatpush.msra.mxu3 %v5431_v62 }
 0x248   : > { %6592 = vst [vmem:[#allocation31_spill] sm:$0xff] %v5881_v56 }
 0x249   : > { %6593 = vst [vmem:[#allocation28_spill] sm:$0xff] %v5883_v43  ;;  %v5886_v46 = vpop.f32.mrf.mxu2  ;;  %v5888_v41 = vpop.f32.mrf.mxu3  ;;  %3147 = vmatpush.msra.mxu3 %v5467_v53 }
 0x24a   : > { %6594 = vst [vmem:[#allocation33_spill] sm:$0xff] %v5886_v46  ;;  %2659 = vmatmul.f32.vlgmr.msra.gmra.mxu0 %v5693_v11  ;;  %2705 = vmatmul.f32.gmra.mxu1 %v5734_v17 }
 0x24b   : > { %6595 = vst [vmem:[#allocation34_spill] sm:$0xff] %v5888_v41  ;;  %3002 = vmatpush.msra.mxu0 %v5419_v0 }
 0x24d   : > { %3006 = vmatpush.msra.mxu0 %v5459_v63 }
 0x24e   : > { %4578 = vmatmul.msk.f32.vlgmr.msra.gmra.mxu2 %vm181_vm0, %v5682_v18  ;;  %4583 = vmatmul.msk.f32.gmra.mxu3 %vm181_vm0, %v5703_v55 }
 0x24f   : > { %v5899_v62 = vpop.f32.mrf.mxu0  ;;  %v5901_v47 = vpop.f32.mrf.mxu1  ;;  %4592 = vmatpush.msk.msra.mxu2 %vm5397_vm7, %v6536_v3 }
 0x250   : > { %6596 = vst [vmem:[#allocation32_spill] sm:$0xff] %v5899_v62 }
 0x251   : > { %6597 = vst [vmem:[#allocation8_spill] sm:$0xff] %v5901_v47  ;;  %v5906_v53 = vpop.f32.mrf.mxu2  ;;  %v5908_v2 = vpop.f32.mrf.mxu3  ;;  %4593 = vmatpush.msk.msra.mxu2 %vm5436_vm8, %v6536_v3 }
 0x252   : > { %6598 = vst [vmem:[#allocation9_spill] sm:$0xff] %v5906_v53  ;;  %2664 = vmatmul.f32.gmra.mxu0 %v5721_v7  ;;  %2711 = vmatmul.f32.gmra.mxu1 %v5753_v34 }
 0x253   : > { %6599 = vst [vmem:[#allocation10_spill] sm:$0xff] %v5908_v2 }
 0x256   : > { %4579 = vmatmul.msk.f32.gmra.mxu2 %vm181_vm0, %v5703_v55  ;;  %4584 = vmatmul.msk.f32.gmra.mxu3 %vm181_vm0, %v5726_v23 }
 0x257   : > { %v5919_v61 = vpop.f32.mrf.mxu0  ;;  %v5921_v37 = vpop.f32.mrf.mxu1 }
 0x258   : > { %6600 = vst [vmem:[#allocation37_spill] sm:$0xff] %v5919_v61 }
 0x259   : > { %6601 = vst [vmem:[#allocation38_spill] sm:$0xff] %v5921_v37  ;;  %v5923_v35 = vpop.f32.mrf.mxu2  ;;  %v5925_v50 = vpop.f32.mrf.mxu3 }
 0x25a   : > { %6602 = vst [vmem:[#allocation39_spill] sm:$0xff] %v5923_v35  ;;  %2669 = vmatmul.f32.gmra.mxu0 %v5738_v33  ;;  %2717 = vmatmul.f32.gmra.mxu1 %v5777_v1 }
 0x25b   : > { %6603 = vst [vmem:[#allocation40_spill] sm:$0xff] %v5925_v50 }
 0x25e   : > { %4580 = vmatmul.msk.f32.gmra.mxu2 %vm181_vm0, %v5726_v23  ;;  %4585 = vmatmul.msk.f32.gmra.mxu3 %vm181_vm0, %v5750_v45 }
 0x25f   : > { %v5933_v5 = vpop.f32.mrf.mxu0  ;;  %v5935_v2 = vpop.f32.mrf.mxu1 }
 0x260   : > { %6604 = vst [vmem:[#allocation41_spill] sm:$0xff] %v5933_v5 }
 0x261   : > { %6605 = vst [vmem:[#allocation42_spill] sm:$0xff] %v5935_v2  ;;  %v5937_v14 = vpop.f32.mrf.mxu2  ;;  %v5939_v41 = vpop.f32.mrf.mxu3 }
 0x262   : > { %6606 = vst [vmem:[#allocation43_spill] sm:$0xff] %v5937_v14  ;;  %2674 = vmatmul.f32.gmra.mxu0 %v5768_v16 }
 0x263   : > { %6607 = vst [vmem:[#allocation44_spill] sm:$0xff] %v5939_v41 }
 0x266   : > { %4581 = vmatmul.msk.f32.gmra.mxu2 %vm181_vm0, %v5750_v45 }
 0x267   : > { %v5944_v50 = vpop.f32.mrf.mxu0  ;;  %v5946_v35 = vpop.f32.mrf.mxu1 }
 0x268   : > { %6608 = vst [vmem:[#allocation45_spill] sm:$0xff] %v5944_v50 }
 0x269   : > { %6609 = vst [vmem:[#allocation46_spill] sm:$0xff] %v5946_v35  ;;  %v5948_v53 = vpop.f32.mrf.mxu2  ;;  %v5950_v52 = vpop.f32.mrf.mxu3 }
 0x26a   : > { %6610 = vst [vmem:[#allocation47_spill] sm:$0xff] %v5948_v53 }
 0x26b   : > { %6611 = vst [vmem:[#allocation48_spill] sm:$0xff] %v5950_v52 }
 0x26f   : > { %v5952_v37 = vpop.f32.mrf.mxu0  ;;  %v5954_v2 = vpop.f32.mrf.mxu1 }
 0x270   : > { %6612 = vst [vmem:[#allocation49_spill] sm:$0xff] %v5952_v37 }
 0x271   : > { %6613 = vst [vmem:[#allocation50_spill] sm:$0xff] %v5954_v2  ;;  %v5956_v14 = vpop.f32.mrf.mxu2  ;;  %v5958_v41 = vpop.f32.mrf.mxu3 }
 0x272   : > { %6614 = vst [vmem:[#allocation51_spill] sm:$0xff] %v5956_v14 }
 0x273   : > { %6615 = vst [vmem:[#allocation52_spill] sm:$0xff] %v5958_v41 }
 0x277   : > { %v5960_v5 = vpop.f32.mrf.mxu0  ;;  %v5962_v58 = vpop.f32.mrf.mxu1 }
 0x278   : > { %6616 = vst [vmem:[#allocation53_spill] sm:$0xff] %v5960_v5 }
 0x279   : > { %6617 = vst [vmem:[#allocation54_spill] sm:$0xff] %v5962_v58  ;;  %v5964_v47 = vpop.f32.mrf.mxu2  ;;  %v5966_v50 = vpop.f32.mrf.mxu3 }
 0x27a   : > { %6618 = vst [vmem:[#allocation55_spill] sm:$0xff] %v5964_v47 }
 0x27b   : > { %6619 = vst [vmem:[#allocation56_spill] sm:$0xff] %v5966_v50 }
 0x27f   : > { %v5968_v35 = vpop.f32.mrf.mxu0  ;;  %v2370_v53 = vpop.f32.mrf.mxu1 }
 0x280   : > { %6620 = vst [vmem:[#allocation57_spill] sm:$0xff] %v5968_v35 }
 0x281   : > { %v5970_v52 = vpop.f32.mrf.mxu2  ;;  %v5972_v37 = vpop.f32.mrf.mxu3 }
 0x282   : > { %6621 = vst [vmem:[#allocation58_spill] sm:$0xff] %v5970_v52 }
 0x283   : > { %6622 = vst [vmem:[#allocation59_spill] sm:$0xff] %v5972_v37 }
 0x287   : > { %v2315_v2 = vpop.f32.mrf.mxu0  ;;  %v2374_v46 = vpop.f32.mrf.mxu1 }
 0x288   : > { %v2371_v60 = vadd.f32 %v2370_v53, %v2315_v2 }
 0x289   : > { %v5974_v14 = vpop.f32.mrf.mxu2  ;;  %v2448_v41 = vpop.f32.mrf.mxu3 }
 0x28a   : > { %6623 = vst [vmem:[#allocation60_spill] sm:$0xff] %v5974_v14 }
 0x28f   : > { %v2323_v61 = vpop.f32.mrf.mxu0  ;;  %v2378_v5 = vpop.f32.mrf.mxu1 }
 0x290   : > { %v2375_v24 = vadd.f32 %v2374_v46, %v2323_v61 }
 0x291   : > { %v2408_v9 = vpop.f32.mrf.mxu2  ;;  %v2454_v58 = vpop.f32.mrf.mxu3 }
 0x292   : > { %v2409_v62 = vadd.f32 %v2408_v9, %v2371_v60 }
 0x294   : > { %v2449_v37 = vadd.f32 %v2448_v41, %v2409_v62 }
 0x297   : > { %v2331_v57 = vpop.f32.mrf.mxu0  ;;  %v2382_v47 = vpop.f32.mrf.mxu1 }
 0x298   : > { %v2379_v60 = vadd.f32 %v2378_v5, %v2331_v57 }
 0x299   : > { %v2413_v43 = vpop.f32.mrf.mxu2  ;;  %v2460_v50 = vpop.f32.mrf.mxu3 }
 0x29a   : > { %v2414_v39 = vadd.f32 %v2413_v43, %v2375_v24 }
 0x29c   : > { %v2455_v13 = vadd.f32 %v2454_v58, %v2414_v39 }
 0x29f   : > { %v2339_v42 = vpop.f32.mrf.mxu0  ;;  %v2528_v35 = vpop.f32.mrf.mxu1 }
 0x2a0   : > { %v2383_v58 = vadd.f32 %v2382_v47, %v2339_v42 }
 0x2a1   : > { %v2418_v40 = vpop.f32.mrf.mxu2  ;;  %v2466_v52 = vpop.f32.mrf.mxu3 }
 0x2a7   : > { %v2493_v22 = vpop.f32.mrf.mxu0  ;;  %v2532_v14 = vpop.f32.mrf.mxu1 }
 0x2a8   : > { %v2494_v48 = vadd.f32 %v2493_v22, %v2449_v37 }
 0x2a9   : > { %v2423_v49 = vpop.f32.mrf.mxu2  ;;  %v5976_v38 = vpop.f32.mrf.mxu3 }
 0x2aa   : > { %v2529_v56 = vadd.f32 %v2528_v35, %v2494_v48  ;;  %v2419_v48 = vadd.f32 %v2418_v40, %v2379_v60  ;;  %v2424_v62 = vadd.f32 %v2423_v49, %v2383_v58 }
 0x2ac   : > { %v2796_v54 = vsel %vm181_vm0, %v2529_v56, 0  ;;  %v2467_v42 = vadd.f32 %v2466_v52, %v2424_v62 }
 0x2ad   : > { %v5979_v12 = vand.u32 4294901760, %v2796_v54 }
 0x2af   : > { %v2826_v53 = vsub.f32 %v2796_v54, %v5979_v12  ;;  %v2497_v2 = vpop.f32.mrf.mxu0  ;;  %2885 = vmatmul.f32.vlgmr.msrb.gmra.mxu1 %v5979_v12  ;;  %v2536_v5 = vpop.f32.mrf.mxu1 }
 0x2b0   : > { %v2498_v9 = vadd.f32 %v2497_v2, %v2455_v13  ;;  %4594 = vmatpush.msk.msrb.mxu1 %vm5397_vm7, %v6536_v3 }
 0x2b1   : > { %v2827_v22 = vand.u32 4294901760, %v2826_v53  ;;  %v2567_v46 = vpop.f32.mrf.mxu2  ;;  %2923 = vmatmul.f32.vlgmr.msrb.gmra.mxu2 %v2826_v53  ;;  %v5986_v24 = vpop.f32.mrf.mxu3 }
 0x2b2   : > { %v2533_v56 = vadd.f32 %v2532_v14, %v2498_v9  ;;  %3266 = vmatpush.msrb.mxu2 %v5419_v0  ;;  %4595 = vmatpush.msk.msrb.mxu1 %vm5436_vm8, %v6536_v3  ;;  %v2461_v14 = vadd.f32 %v2460_v50, %v2419_v48 }
 0x2b3   : > { %v2828_v54 = vsub.f32 %v2826_v53, %v2827_v22  ;;  %2963 = vmatmul.f32.vlgmr.msrb.gmra.mxu3 %v2827_v22 }
 0x2b4   : > { %v2799_v13 = vsel %vm181_vm0, %v2533_v56, 0  ;;  %4596 = vmatpush.msk.msrb.mxu3 %vm5397_vm7, %v6536_v3  ;;  %3270 = vmatpush.msrb.mxu2 %v5459_v63 }
 0x2b5   : > { %v2829_v39 = vand.u32 4294901760, %v2828_v54  ;;  %v5997_v57 = vand.u32 4294901760, %v2799_v13 }
 0x2b6   : > { %4597 = vmatpush.msk.msrb.mxu3 %vm5436_vm8, %v6536_v3 }
 0x2b7   : > { %v2501_v0 = vpop.f32.mrf.mxu0  ;;  %2830 = vmatmul.f32.vlgmr.msrb.gmra.mxu0 %v2829_v39  ;;  %2889 = vmatmul.f32.gmra.mxu1 %v5997_v57  ;;  %v2834_v40 = vsub.f32 %v2799_v13, %v5997_v57  ;;  %v2540_v53 = vpop.f32.mrf.mxu1 }
 0x2b8   : > { %v2502_v43 = vadd.f32 %v2501_v0, %v2461_v14  ;;  %3181 = vmatpush.msrb.mxu0 %v5411_v30  ;;  %v2623_v0 = vadd.f32 %v5976_v38, %v2567_v46 }
 0x2b9   : > { %v2575_v15 = vpop.f32.mrf.mxu2  ;;  %2928 = vmatmul.f32.gmra.mxu2 %v2834_v40  ;;  %v2835_v63 = vand.u32 4294901760, %v2834_v40  ;;  %v2630_v41 = vpop.f32.mrf.mxu3 }
 0x2ba   : > { %v2537_v50 = vadd.f32 %v2536_v5, %v2502_v43  ;;  %3184 = vmatpush.msrb.mxu0 %v5448_v44 }
 0x2bb   : > { %2969 = vmatmul.f32.gmra.mxu3 %v2835_v63  ;;  %v2836_v10 = vsub.f32 %v2834_v40, %v2835_v63 }
 0x2bc   : > { %v2802_v61 = vsel %vm181_vm0, %v2537_v50, 0 }
 0x2bd   : > { %v6007_v37 = vand.u32 4294901760, %v2802_v61  ;;  %v2837_v35 = vand.u32 4294901760, %v2836_v10 }
 0x2bf   : > { %v2505_v47 = vpop.f32.mrf.mxu0  ;;  %2838 = vmatmul.f32.gmra.mxu0 %v2837_v35  ;;  %2893 = vmatmul.f32.gmra.mxu1 %v6007_v37  ;;  %v2842_v30 = vsub.f32 %v2802_v61, %v6007_v37  ;;  %v2700_v5 = vpop.f32.mrf.mxu1  ;;  %v2627_v35 = vadd.f32 %v5986_v24, %v2575_v15 }
 0x2c0   : > { %v2506_v2 = vadd.f32 %v2505_v47, %v2467_v42 }
 0x2c1   : > { %v2583_v49 = vpop.f32.mrf.mxu2  ;;  %2933 = vmatmul.f32.gmra.mxu2 %v2842_v30  ;;  %v2843_v60 = vand.u32 4294901760, %v2842_v30  ;;  %v2634_v22 = vpop.f32.mrf.mxu3 }
 0x2c2   : > { %v2541_v44 = vadd.f32 %v2540_v53, %v2506_v2  ;;  %v2631_v24 = vadd.f32 %v2630_v41, %v2583_v49 }
 0x2c3   : > { %2975 = vmatmul.f32.gmra.mxu3 %v2843_v60  ;;  %v2844_v9 = vsub.f32 %v2842_v30, %v2843_v60 }
 0x2c4   : > { %v2805_v48 = vsel %vm181_vm0, %v2541_v44, 0 }
 0x2c5   : > { %v6012_v56 = vand.u32 4294901760, %v2805_v48  ;;  %v2845_v54 = vand.u32 4294901760, %v2844_v9 }
 0x2c7   : > { %v2660_v52 = vpop.f32.mrf.mxu0  ;;  %2846 = vmatmul.f32.gmra.mxu0 %v2845_v54  ;;  %2897 = vmatmul.f32.gmra.mxu1 %v6012_v56  ;;  %v2850_v13 = vsub.f32 %v2805_v48, %v6012_v56  ;;  %v2706_v10 = vpop.f32.mrf.mxu1 }
 0x2c8   : > { %v2661_v43 = vadd.f32 %v2660_v52, %v2623_v0 }
 0x2c9   : > { %v2591_v39 = vpop.f32.mrf.mxu2  ;;  %2938 = vmatmul.f32.gmra.mxu2 %v2850_v13  ;;  %v2851_v14 = vand.u32 4294901760, %v2850_v13  ;;  %v2780_v58 = vpop.f32.mrf.mxu3 }
 0x2ca   : > { %v2701_v50 = vadd.f32 %v2700_v5, %v2661_v43 }
 0x2cb   : > { %2981 = vmatmul.f32.gmra.mxu3 %v2851_v14  ;;  %v2852_v40 = vsub.f32 %v2850_v13, %v2851_v14 }
 0x2cd   : > { %v2853_v63 = vand.u32 4294901760, %v2852_v40 }
 0x2cf   : > { %v2665_v62 = vpop.f32.mrf.mxu0  ;;  %2854 = vmatmul.f32.gmra.mxu0 %v2853_v63  ;;  %3043 = vmatmul.f32.vlgmr.msra.gmra.mxu1 %v5979_v12  ;;  %v2712_v54 = vpop.f32.mrf.mxu1  ;;  %v150_v63 = vld [vmem:[%s4897_s24 + $0x68] sm:$0xff] }
 0x2d0   : > { %v2666_v42 = vadd.f32 %v2665_v62, %v2627_v35  ;;  %v2635_v62 = vadd.f32 %v2634_v22, %v2591_v39 }
 0x2d1   : > { %v2745_v61 = vpop.f32.mrf.mxu2  ;;  %v2784_v30 = vpop.f32.mrf.mxu3 }
 0x2d2   : > { %v2746_v53 = vadd.f32 %v2745_v61, %v2701_v50  ;;  %v2707_v60 = vadd.f32 %v2706_v10, %v2666_v42  ;;  %v3345_v10 = vand.u32 4294901760, %v150_v63 }
 0x2d4   : > { %v2781_v47 = vadd.f32 %v2780_v58, %v2746_v53  ;;  %v3397_v53 = vsub.f32 %v150_v63, %v3345_v10 }
 0x2d6   : > { %v3060_v38 = vsel %vm181_vm0, %v2781_v47, 0 }
 0x2d7   : > { %v6020_v46 = vand.u32 4294901760, %v3060_v38  ;;  %v2670_v2 = vpop.f32.mrf.mxu0  ;;  %3008 = vmatmul.f32.vlgmr.msra.gmra.mxu0 %v5979_v12  ;;  %3047 = vmatmul.f32.gmra.mxu1 %v5997_v57  ;;  %v2718_v42 = vpop.f32.mrf.mxu1 }
 0x2d8   : > { %v2671_v52 = vadd.f32 %v2670_v2, %v2631_v24  ;;  %3346 = vmatpush.msra.mxu0 %v3345_v10 }
 0x2d9   : > { %v6025_v44 = vsub.f32 %v3060_v38, %v6020_v46  ;;  %v2749_v9 = vpop.f32.mrf.mxu2  ;;  %3149 = vmatmul.f32.vlgmr.msra.gmra.mxu3 %v6020_v46  ;;  %v2788_v40 = vpop.f32.mrf.mxu3  ;;  %v3398_v38 = vand.u32 4294901760, %v3397_v53 }
 0x2da   : > { %v2750_v15 = vadd.f32 %v2749_v9, %v2707_v60  ;;  %v2713_v41 = vadd.f32 %v2712_v54, %v2671_v52  ;;  %3481 = vmatpush.msra.mxu3 %v3345_v10 }
 0x2db   : > { %v3091_v48 = vand.u32 4294901760, %v6025_v44  ;;  %v3399_v60 = vsub.f32 %v3397_v53, %v3398_v38 }
 0x2dc   : > { %v2785_v5 = vadd.f32 %v2784_v30, %v2750_v15 }
 0x2dd   : > { %v3092_v13 = vsub.f32 %v6025_v44, %v3091_v48  ;;  %v3400_v52 = vand.u32 4294901760, %v3399_v60  ;;  %v6625_v60 = vld [vmem:[#allocation36_spill] sm:$0xff] }
 0x2de   : > { %v3063_v12 = vsel %vm181_vm0, %v2785_v5, 0 }
 0x2df   : > { %v3093_v14 = vand.u32 4294901760, %v3092_v13  ;;  %v6031_v0 = vand.u32 4294901760, %v3063_v12  ;;  %3012 = vmatmul.f32.gmra.mxu0 %v5997_v57  ;;  %3051 = vmatmul.f32.gmra.mxu1 %v6007_v37  ;;  %v2675_v58 = vpop.f32.mrf.mxu0 }
 0x2e0   : > { %v2676_v35 = vadd.f32 %v2675_v58, %v2635_v62  ;;  %3401 = vmatpush.msra.mxu1 %v3400_v52 }
 0x2e1   : > { %v6036_v49 = vsub.f32 %v3063_v12, %v6031_v0  ;;  %v2753_v43 = vpop.f32.mrf.mxu2  ;;  %3094 = vmatmul.f32.vlgmr.msra.gmra.mxu2 %v3093_v14  ;;  %3153 = vmatmul.f32.gmra.mxu3 %v6031_v0  ;;  %v2792_v15 = vpop.f32.mrf.mxu3  ;;  %v149_v14 = vld [vmem:[%s4897_s24 + $0x60] sm:$0xff] }
 0x2e2   : > { %v2754_v50 = vadd.f32 %v2753_v43, %v2713_v41  ;;  %3441 = vmatpush.msra.mxu2 %v3397_v53  ;;  %v2719_v39 = vadd.f32 %v2718_v42, %v2676_v35  ;;  %v3347_v58 = vand.u32 4294901760, %v149_v14 }
 0x2e3   : > { %v3099_v61 = vand.u32 4294901760, %v6036_v49 }
 0x2e4   : > { %v2789_v57 = vadd.f32 %v2788_v40, %v2754_v50  ;;  %v3403_v63 = vsub.f32 %v149_v14, %v3347_v58  ;;  %3348 = vmatpush.msra.mxu0 %v3347_v58  ;;  %3483 = vmatpush.msra.mxu3 %v3347_v58 }
 0x2e5   : > { %v3100_v47 = vsub.f32 %v6036_v49, %v3099_v61 }
 0x2e6   : > { %v3066_v30 = vsel %vm181_vm0, %v2789_v57, 0  ;;  %3444 = vmatpush.msra.mxu2 %v3403_v63  ;;  %v3404_v50 = vand.u32 4294901760, %v3403_v63 }
 0x2e7   : > { %v6043_v2 = vand.u32 4294901760, %v3066_v30  ;;  %3016 = vmatmul.f32.gmra.mxu0 %v6007_v37  ;;  %3055 = vmatmul.f32.gmra.mxu1 %v6012_v56  ;;  %v3101_v22 = vand.u32 4294901760, %v3100_v47 }
 0x2e8   : > { %v3405_v57 = vsub.f32 %v3403_v63, %v3404_v50 }
 0x2e9   : > { %v3106_v9 = vsub.f32 %v3066_v30, %v6043_v2  ;;  %v2757_v24 = vpop.f32.mrf.mxu2  ;;  %3102 = vmatmul.f32.gmra.mxu2 %v3101_v22  ;;  %3157 = vmatmul.f32.gmra.mxu3 %v6043_v2 }
 0x2ea   : > { %v2758_v54 = vadd.f32 %v2757_v24, %v2719_v39  ;;  %v6624_v39 = vld [vmem:[#allocation35_spill] sm:$0xff] }
 0x2eb   : > { %v3107_v5 = vand.u32 4294901760, %v3106_v9 }
 0x2ec   : > { %v2793_v13 = vadd.f32 %v2792_v15, %v2758_v54 }
 0x2ed   : > { %v3108_v12 = vsub.f32 %v3106_v9, %v3107_v5 }
 0x2ee   : > { %v3069_v37 = vsel %vm181_vm0, %v2793_v13, 0 }
 0x2ef   : > { %v3113_v40 = vand.u32 4294901760, %v3069_v37  ;;  %3020 = vmatmul.f32.gmra.mxu0 %v6012_v56  ;;  %3227 = vmatmul.f32.vlgmr.msrb.gmra.mxu1 %v3091_v48  ;;  %v3109_v41 = vand.u32 4294901760, %v3108_v12  ;;  %v3406_v56 = vand.u32 4294901760, %v3405_v57  ;;  %v152_v48 = vld [vmem:[%s4897_s24 + $0x78] sm:$0xff] }
 0x2f1   : > { %v3114_v43 = vsub.f32 %v3069_v37, %v3113_v40  ;;  %3110 = vmatmul.f32.gmra.mxu2 %v3109_v41  ;;  %3161 = vmatmul.f32.gmra.mxu3 %v3113_v40 }
 0x2f2   : > { %3407 = vmatpush.msra.mxu1 %v3406_v56 }
 0x2f3   : > { %v3115_v62 = vand.u32 4294901760, %v3114_v43 }
 0x2f4   : > { %3563 = vmatpush.msrb.mxu1 %v3345_v10 }
 0x2f5   : > { %v3116_v35 = vsub.f32 %v3114_v43, %v3115_v62 }
 0x2f6   : > { %3565 = vmatpush.msrb.mxu1 %v3347_v58 }
 0x2f7   : > { %3187 = vmatmul.f32.vlgmr.msrb.gmra.mxu0 %v6025_v44  ;;  %3233 = vmatmul.f32.gmra.mxu1 %v3099_v61  ;;  %v3117_v53 = vand.u32 4294901760, %v3116_v35  ;;  %v3597_v44 = vand.u32 4294901760, %v152_v48 }
 0x2f8   : > { %3526 = vmatpush.msrb.mxu0 %v3398_v38 }
 0x2f9   : > { %3118 = vmatmul.f32.gmra.mxu2 %v3117_v53  ;;  %3307 = vmatmul.f32.vlgmr.msrb.gmra.mxu3 %v6020_v46  ;;  %v3649_v61 = vsub.f32 %v152_v48, %v3597_v44 }
 0x2fa   : > { %3530 = vmatpush.msrb.mxu0 %v3404_v50 }
 0x2fb   : > { %v3650_v42 = vand.u32 4294901760, %v3649_v61 }
 0x2fd   : > { %v3651_v47 = vsub.f32 %v3649_v61, %v3650_v42 }
 0x2ff   : > { %3192 = vmatmul.f32.gmra.mxu0 %v6036_v49  ;;  %3239 = vmatmul.f32.gmra.mxu1 %v3107_v5  ;;  %v3652_v10 = vand.u32 4294901760, %v3651_v47 }
 0x301   : > { %3272 = vmatmul.f32.vlgmr.msrb.gmra.mxu2 %v6020_v46  ;;  %3311 = vmatmul.f32.gmra.mxu3 %v6031_v0  ;;  %v151_v46 = vld [vmem:[%s4897_s24 + $0x70] sm:$0xff] }
 0x302   : > { %3598 = vmatpush.msrb.mxu2 %v3597_v44  ;;  %3653 = vmatpush.msrb.mxu3 %v3652_v10  ;;  %v3599_v49 = vand.u32 4294901760, %v151_v46 }
 0x304   : > { %3600 = vmatpush.msrb.mxu2 %v3599_v49  ;;  %v3655_v30 = vsub.f32 %v151_v46, %v3599_v49 }
 0x306   : > { %v3656_v38 = vand.u32 4294901760, %v3655_v30 }
 0x307   : > { %3197 = vmatmul.f32.gmra.mxu0 %v3106_v9  ;;  %3245 = vmatmul.f32.gmra.mxu1 %v3115_v62 }
 0x309   : > { %3276 = vmatmul.f32.gmra.mxu2 %v6031_v0  ;;  %3315 = vmatmul.f32.gmra.mxu3 %v6043_v2  ;;  %v3657_v0 = vsub.f32 %v3655_v30, %v3656_v38 }
 0x30b   : > { %v3658_v22 = vand.u32 4294901760, %v3657_v0 }
 0x30d   : > { %3659 = vmatpush.msrb.mxu3 %v3658_v22 }
 0x30f   : > { %3202 = vmatmul.f32.gmra.mxu0 %v3114_v43  ;;  %4598 = vmatmul.msk.f32.vlgmr.msra.gmra.mxu1 %vm181_vm0, %v5682_v18 }
 0x310   : > { %3733 = vmatpush.msra.mxu1 %v3597_v44 }
 0x311   : > { %3280 = vmatmul.f32.gmra.mxu2 %v6043_v2  ;;  %3319 = vmatmul.f32.gmra.mxu3 %v3113_v40 }
 0x312   : > { %3735 = vmatpush.msra.mxu1 %v3599_v49 }
 0x317   : > { %3354 = vmatmul.f32.vlgmr.msra.gmra.mxu0 %v5730_v25  ;;  %4599 = vmatmul.msk.f32.gmra.mxu1 %vm181_vm0, %v5703_v55 }
 0x318   : > { %3693 = vmatpush.msra.mxu0 %v3649_v61 }
 0x319   : > { %3284 = vmatmul.f32.gmra.mxu2 %v3113_v40  ;;  %3487 = vmatmul.f32.vlgmr.msra.gmra.mxu3 %v5706_v36 }
 0x31a   : > { %3696 = vmatpush.msra.mxu0 %v3655_v30  ;;  %3815 = vmatpush.msra.mxu3 %v3597_v44 }
 0x31c   : > { %3817 = vmatpush.msra.mxu3 %v3599_v49 }
 0x31f   : > { %3362 = vmatmul.f32.gmra.mxu0 %v5756_v32  ;;  %4600 = vmatmul.msk.f32.gmra.mxu1 %vm181_vm0, %v5726_v23 }
 0x321   : > { %3447 = vmatmul.f32.vlgmr.msra.gmra.mxu2 %v5693_v11  ;;  %3493 = vmatmul.f32.gmra.mxu3 %v5734_v17 }
 0x322   : > { %3778 = vmatpush.msra.mxu2 %v3650_v42 }
 0x324   : > { %3782 = vmatpush.msra.mxu2 %v3656_v38 }
 0x327   : > { %3370 = vmatmul.f32.gmra.mxu0 %v5773_v28  ;;  %4601 = vmatmul.msk.f32.gmra.mxu1 %vm181_vm0, %v5750_v45 }
 0x329   : > { %3452 = vmatmul.f32.gmra.mxu2 %v5721_v7  ;;  %3499 = vmatmul.f32.gmra.mxu3 %v5753_v34 }
 0x32c   : > { %v6078_v2 = vpop.f32.mrf.mxu1 }
 0x32f   : > { %3378 = vmatmul.f32.gmra.mxu0 %v5787_v51  ;;  %4606 = vmatmul.msk.f32.vlgmr.msrb.gmra.mxu1 %vm181_vm0, %v5682_v18 }
 0x330   : > { %3917 = vmatpush.msrb.mxu1 %v6624_v39 }
 0x331   : > { %3457 = vmatmul.f32.gmra.mxu2 %v5738_v33  ;;  %3505 = vmatmul.f32.gmra.mxu3 %v5777_v1 }
 0x332   : > { %3923 = vmatpush.msrb.mxu1 %v6625_v60 }
 0x334   : > { %v6087_v9 = vpop.f32.mrf.mxu0  ;;  %v6089_v24 = vpop.f32.mrf.mxu1 }
 0x335   : > { %v6116_v5 = vpop.f32.mrf.mxu2 }
 0x336   : > { %v6091_v15 = vpop.f32.mrf.mxu3 }
 0x337   : > { %4602 = vmatmul.msk.f32.vlgmr.msrb.gmra.mxu0 %vm181_vm0, %v5682_v18  ;;  %4607 = vmatmul.msk.f32.gmra.mxu1 %vm181_vm0, %v5703_v55 }
 0x338   : > { %4622 = vmatpush.msk.msrb.mxu0 %vm5251_vm5, %v6536_v3 }
 0x339   : > { %3462 = vmatmul.f32.gmra.mxu2 %v5768_v16  ;;  %4610 = vmatmul.msk.f32.vlgmr.msrb.gmra.mxu3 %vm181_vm0, %v5682_v18 }
 0x33a   : > { %4624 = vmatpush.msk.msrb.mxu3 %vm5251_vm5, %v6536_v3  ;;  %4623 = vmatpush.msk.msrb.mxu0 %vm5269_vm6, %v6536_v3 }
 0x33c   : > { %v6109_v54 = vpop.f32.mrf.mxu0  ;;  %v6111_v52 = vpop.f32.mrf.mxu1  ;;  %4625 = vmatpush.msk.msrb.mxu3 %vm5269_vm6, %v6536_v3 }
 0x33d   : > { %v6137_v14 = vpop.f32.mrf.mxu2 }
 0x33e   : > { %v6122_v13 = vpop.f32.mrf.mxu3 }
 0x33f   : > { %4603 = vmatmul.msk.f32.gmra.mxu0 %vm181_vm0, %v5703_v55  ;;  %4608 = vmatmul.msk.f32.gmra.mxu1 %vm181_vm0, %v5726_v23 }
 0x341   : > { %3606 = vmatmul.f32.vlgmr.msrb.gmra.mxu2 %v5730_v25  ;;  %4611 = vmatmul.msk.f32.gmra.mxu3 %vm181_vm0, %v5703_v55 }
 0x342   : > { %3957 = vmatpush.msrb.mxu2 %v5266_v26 }
 0x344   : > { %v6128_v12 = vpop.f32.mrf.mxu0  ;;  %v6130_v37 = vpop.f32.mrf.mxu1  ;;  %3960 = vmatpush.msrb.mxu2 %v5286_v21 }
 0x346   : > { %v6142_v25 = vpop.f32.mrf.mxu3 }
 0x347   : > { %4604 = vmatmul.msk.f32.gmra.mxu0 %vm181_vm0, %v5726_v23  ;;  %4609 = vmatmul.msk.f32.gmra.mxu1 %vm181_vm0, %v5750_v45 }
 0x349   : > { %3614 = vmatmul.f32.gmra.mxu2 %v5756_v32  ;;  %4612 = vmatmul.msk.f32.gmra.mxu3 %vm181_vm0, %v5726_v23  ;;  %v6160_v32 = vpop.f32.mrf.mxu2 }
 0x34c   : > { %v6144_v40 = vpop.f32.mrf.mxu0  ;;  %v6146_v41 = vpop.f32.mrf.mxu1 }
 0x34f   : > { %4605 = vmatmul.msk.f32.gmra.mxu0 %vm181_vm0, %v5750_v45  ;;  %3739 = vmatmul.f32.vlgmr.msra.gmra.mxu1 %v5706_v36  ;;  %v6166_v36 = vpop.f32.mrf.mxu3 }
 0x350   : > { %4626 = vmatpush.msk.msra.mxu1 %vm5251_vm5, %v6536_v3 }
 0x351   : > { %3622 = vmatmul.f32.gmra.mxu2 %v5773_v28  ;;  %4613 = vmatmul.msk.f32.gmra.mxu3 %vm181_vm0, %v5750_v45 }
 0x352   : > { %4627 = vmatpush.msk.msra.mxu1 %vm5269_vm6, %v6536_v3 }
 0x354   : > { %v6162_v58 = vpop.f32.mrf.mxu0  ;;  %v6164_v43 = vpop.f32.mrf.mxu1 }
 0x357   : > { %3699 = vmatmul.f32.vlgmr.msra.gmra.mxu0 %v5693_v11  ;;  %3745 = vmatmul.f32.gmra.mxu1 %v5734_v17  ;;  %v6181_v11 = vpop.f32.mrf.mxu2 }
 0x358   : > { %4042 = vmatpush.msra.mxu0 %v5284_v20 }
 0x359   : > { %3630 = vmatmul.f32.gmra.mxu2 %v5787_v51  ;;  %4618 = vmatmul.msk.f32.vlgmr.msra.gmra.mxu3 %vm181_vm0, %v5682_v18 }
 0x35a   : > { %4181 = vmatpush.msra.mxu3 %v6624_v39  ;;  %4046 = vmatpush.msra.mxu0 %v5292_v8 }
 0x35c   : > { %v6176_v28 = vpop.f32.mrf.mxu0  ;;  %v6178_v63 = vpop.f32.mrf.mxu1  ;;  %4187 = vmatpush.msra.mxu3 %v6625_v60 }
 0x35d   : > { %v6183_v17 = vpop.f32.mrf.mxu3 }
 0x35e   : > { %6626 = vst [vmem:[#allocation35_spill] sm:$0xff] %v6183_v17 }
 0x35f   : > { %3704 = vmatmul.f32.gmra.mxu0 %v5721_v7  ;;  %3751 = vmatmul.f32.gmra.mxu1 %v5753_v34 }
 0x361   : > { %4614 = vmatmul.msk.f32.vlgmr.msra.gmra.mxu2 %vm181_vm0, %v5682_v18  ;;  %4619 = vmatmul.msk.f32.gmra.mxu3 %vm181_vm0, %v5703_v55 }
 0x362   : > { %4628 = vmatpush.msk.msra.mxu2 %vm5251_vm5, %v6536_v3 }
 0x364   : > { %v6194_v51 = vpop.f32.mrf.mxu0  ;;  %v6196_v62 = vpop.f32.mrf.mxu1  ;;  %4629 = vmatpush.msk.msra.mxu2 %vm5269_vm6, %v6536_v3 }
 0x365   : > { %v6201_v7 = vpop.f32.mrf.mxu2  ;;  %v6203_v34 = vpop.f32.mrf.mxu3 }
 0x366   : > { %6627 = vst [vmem:[#allocation36_spill] sm:$0xff] %v6201_v7 }
 0x367   : > { %6628 = vst [vmem:[#allocation61_spill] sm:$0xff] %v6203_v34  ;;  %3709 = vmatmul.f32.gmra.mxu0 %v5738_v33  ;;  %3757 = vmatmul.f32.gmra.mxu1 %v5777_v1 }
 0x369   : > { %4615 = vmatmul.msk.f32.gmra.mxu2 %vm181_vm0, %v5703_v55  ;;  %4620 = vmatmul.msk.f32.gmra.mxu3 %vm181_vm0, %v5726_v23 }
 0x36c   : > { %v6211_v18 = vpop.f32.mrf.mxu0  ;;  %v6213_v50 = vpop.f32.mrf.mxu1 }
 0x36d   : > { %6629 = vst [vmem:[#allocation62_spill] sm:$0xff] %v6213_v50  ;;  %v6215_v35 = vpop.f32.mrf.mxu2  ;;  %v6217_v57 = vpop.f32.mrf.mxu3 }
 0x36e   : > { %6630 = vst [vmem:[#allocation63_spill] sm:$0xff] %v6215_v35 }
 0x36f   : > { %6631 = vst [vmem:[#allocation64_spill] sm:$0xff] %v6217_v57  ;;  %3714 = vmatmul.f32.gmra.mxu0 %v5768_v16 }
 0x371   : > { %4616 = vmatmul.msk.f32.gmra.mxu2 %vm181_vm0, %v5726_v23  ;;  %4621 = vmatmul.msk.f32.gmra.mxu3 %vm181_vm0, %v5750_v45 }
 0x374   : > { %v6224_v55 = vpop.f32.mrf.mxu0  ;;  %v6226_v33 = vpop.f32.mrf.mxu1 }
 0x375   : > { %6632 = vst [vmem:[#allocation65_spill] sm:$0xff] %v6224_v55  ;;  %v6228_v1 = vpop.f32.mrf.mxu2  ;;  %v6230_v53 = vpop.f32.mrf.mxu3 }
 0x376   : > { %6633 = vst [vmem:[#allocation66_spill] sm:$0xff] %v6226_v33 }
 0x377   : > { %6634 = vst [vmem:[#allocation67_spill] sm:$0xff] %v6228_v1 }
 0x378   : > { %6635 = vst [vmem:[#allocation68_spill] sm:$0xff] %v6230_v53 }
 0x379   : > { %4617 = vmatmul.msk.f32.gmra.mxu2 %vm181_vm0, %v5750_v45 }
 0x37c   : > { %v6234_v56 = vpop.f32.mrf.mxu0  ;;  %v6236_v16 = vpop.f32.mrf.mxu1 }
 0x37d   : > { %6636 = vst [vmem:[#allocation69_spill] sm:$0xff] %v6234_v56  ;;  %v6238_v48 = vpop.f32.mrf.mxu2  ;;  %v6240_v23 = vpop.f32.mrf.mxu3 }
 0x37e   : > { %6637 = vst [vmem:[#allocation70_spill] sm:$0xff] %v6236_v16 }
 0x37f   : > { %6638 = vst [vmem:[#allocation71_spill] sm:$0xff] %v6238_v48 }
 0x380   : > { %6639 = vst [vmem:[#allocation72_spill] sm:$0xff] %v6240_v23 }
 0x384   : > { %v6242_v44 = vpop.f32.mrf.mxu0  ;;  %v6244_v61 = vpop.f32.mrf.mxu1 }
 0x385   : > { %6640 = vst [vmem:[#allocation73_spill] sm:$0xff] %v6242_v44  ;;  %v6246_v42 = vpop.f32.mrf.mxu2  ;;  %v6248_v47 = vpop.f32.mrf.mxu3 }
 0x386   : > { %6641 = vst [vmem:[#allocation74_spill] sm:$0xff] %v6244_v61 }
 0x387   : > { %6642 = vst [vmem:[#allocation75_spill] sm:$0xff] %v6246_v42 }
 0x388   : > { %6643 = vst [vmem:[#allocation76_spill] sm:$0xff] %v6248_v47 }
 0x38c   : > { %v6250_v10 = vpop.f32.mrf.mxu0  ;;  %v3410_v46 = vpop.f32.mrf.mxu1 }
 0x38d   : > { %6644 = vst [vmem:[#allocation77_spill] sm:$0xff] %v6250_v10  ;;  %v6252_v45 = vpop.f32.mrf.mxu2  ;;  %v6254_v49 = vpop.f32.mrf.mxu3 }
 0x38e   : > { %6645 = vst [vmem:[#allocation78_spill] sm:$0xff] %v6252_v45 }
 0x38f   : > { %6646 = vst [vmem:[#allocation79_spill] sm:$0xff] %v6254_v49 }
 0x394   : > { %v3355_v30 = vpop.f32.mrf.mxu0  ;;  %v3414_v38 = vpop.f32.mrf.mxu1 }
 0x395   : > { %v6256_v0 = vpop.f32.mrf.mxu2  ;;  %v6258_v22 = vpop.f32.mrf.mxu3  ;;  %v3411_v57 = vadd.f32 %v3410_v46, %v3355_v30 }
 0x396   : > { %6647 = vst [vmem:[#allocation80_spill] sm:$0xff] %v6256_v0 }
 0x397   : > { %6648 = vst [vmem:[#allocation81_spill] sm:$0xff] %v6258_v22 }
 0x39c   : > { %v3363_v39 = vpop.f32.mrf.mxu0  ;;  %v3418_v60 = vpop.f32.mrf.mxu1 }
 0x39d   : > { %v6260_v61 = vpop.f32.mrf.mxu2  ;;  %v3488_v53 = vpop.f32.mrf.mxu3  ;;  %v3415_v0 = vadd.f32 %v3414_v38, %v3363_v39 }
 0x39e   : > { %6649 = vst [vmem:[#allocation82_spill] sm:$0xff] %v6260_v61 }
 0x3a4   : > { %v3371_v48 = vpop.f32.mrf.mxu0  ;;  %v3422_v16 = vpop.f32.mrf.mxu1 }
 0x3a5   : > { %v3448_v47 = vpop.f32.mrf.mxu2  ;;  %v3494_v10 = vpop.f32.mrf.mxu3 }
 0x3a6   : > { %v3449_v33 = vadd.f32 %v3448_v47, %v3411_v57  ;;  %v3419_v57 = vadd.f32 %v3418_v60, %v3371_v48 }
 0x3a8   : > { %v3489_v23 = vadd.f32 %v3488_v53, %v3449_v33 }
 0x3ac   : > { %v3379_v44 = vpop.f32.mrf.mxu0  ;;  %v3568_v49 = vpop.f32.mrf.mxu1 }
 0x3ad   : > { %v3453_v45 = vpop.f32.mrf.mxu2  ;;  %v3500_v1 = vpop.f32.mrf.mxu3 }
 0x3ae   : > { %v3454_v35 = vadd.f32 %v3453_v45, %v3415_v0  ;;  %v3423_v45 = vadd.f32 %v3422_v16, %v3379_v44 }
 0x3b0   : > { %v3495_v7 = vadd.f32 %v3494_v10, %v3454_v35 }
 0x3b4   : > { %v3533_v56 = vpop.f32.mrf.mxu0  ;;  %v3572_v61 = vpop.f32.mrf.mxu1 }
 0x3b5   : > { %v3458_v42 = vpop.f32.mrf.mxu2  ;;  %v3534_v22 = vadd.f32 %v3533_v56, %v3489_v23  ;;  %v3506_v34 = vpop.f32.mrf.mxu3 }
 0x3b7   : > { %v3569_v50 = vadd.f32 %v3568_v49, %v3534_v22 }
 0x3b9   : > { %v3836_v55 = vsel %vm181_vm0, %v3569_v50, 0  ;;  %v3459_v50 = vadd.f32 %v3458_v42, %v3419_v57 }
 0x3ba   : > { %v6263_v17 = vand.u32 4294901760, %v3836_v55 }
 0x3bb   : > { %v3501_v42 = vadd.f32 %v3500_v1, %v3459_v50 }
 0x3bc   : > { %v3866_v46 = vsub.f32 %v3836_v55, %v6263_v17  ;;  %v3537_v30 = vpop.f32.mrf.mxu0  ;;  %3925 = vmatmul.f32.vlgmr.msrb.gmra.mxu1 %v6263_v17 }
 0x3bd   : > { %v3463_v33 = vpop.f32.mrf.mxu2  ;;  %v3538_v53 = vadd.f32 %v3537_v30, %v3495_v7  ;;  %v6267_v47 = vpop.f32.mrf.mxu3  ;;  %4630 = vmatpush.msk.msrb.mxu1 %vm5251_vm5, %v6536_v3 }
 0x3be   : > { %v3867_v56 = vand.u32 4294901760, %v3866_v46  ;;  %3963 = vmatmul.f32.vlgmr.msrb.gmra.mxu2 %v3866_v46  ;;  %v3464_v0 = vadd.f32 %v3463_v33, %v3423_v45 }
 0x3bf   : > { %v3573_v23 = vadd.f32 %v3572_v61, %v3538_v53  ;;  %4306 = vmatpush.msrb.mxu2 %v5284_v20  ;;  %4631 = vmatpush.msk.msrb.mxu1 %vm5269_vm6, %v6536_v3  ;;  %v3576_v61 = vpop.f32.mrf.mxu1 }
 0x3c0   : > { %v3868_v35 = vsub.f32 %v3866_v46, %v3867_v56  ;;  %4003 = vmatmul.f32.vlgmr.msrb.gmra.mxu3 %v3867_v56  ;;  %v3507_v60 = vadd.f32 %v3506_v34, %v3464_v0 }
 0x3c1   : > { %v3839_v7 = vsel %vm181_vm0, %v3573_v23, 0  ;;  %4632 = vmatpush.msk.msrb.mxu3 %vm5251_vm5, %v6536_v3  ;;  %4310 = vmatpush.msrb.mxu2 %v5292_v8 }
 0x3c2   : > { %v3869_v55 = vand.u32 4294901760, %v3868_v35  ;;  %v6281_v48 = vand.u32 4294901760, %v3839_v7 }
 0x3c3   : > { %4633 = vmatpush.msk.msrb.mxu3 %vm5269_vm6, %v6536_v3 }
 0x3c4   : > { %v3874_v20 = vsub.f32 %v3839_v7, %v6281_v48  ;;  %v3541_v10 = vpop.f32.mrf.mxu0  ;;  %3870 = vmatmul.f32.vlgmr.msrb.gmra.mxu0 %v3869_v55  ;;  %3929 = vmatmul.f32.gmra.mxu1 %v6281_v48 }
 0x3c5   : > { %v3542_v19 = vadd.f32 %v3541_v10, %v3501_v42  ;;  %v3607_v49 = vpop.f32.mrf.mxu2  ;;  %v3666_v38 = vpop.f32.mrf.mxu3  ;;  %4221 = vmatpush.msrb.mxu0 %v5266_v26 }
 0x3c6   : > { %3968 = vmatmul.f32.gmra.mxu2 %v3874_v20  ;;  %v3875_v8 = vand.u32 4294901760, %v3874_v20 }
 0x3c7   : > { %v3577_v1 = vadd.f32 %v3576_v61, %v3542_v19  ;;  %4224 = vmatpush.msrb.mxu0 %v5286_v21  ;;  %v3580_v26 = vpop.f32.mrf.mxu1  ;;  %v3663_v19 = vadd.f32 %v6267_v47, %v3607_v49 }
 0x3c8   : > { %4009 = vmatmul.f32.gmra.mxu3 %v3875_v8  ;;  %v3876_v3 = vsub.f32 %v3874_v20, %v3875_v8 }
 0x3c9   : > { %v3842_v27 = vsel %vm181_vm0, %v3577_v1, 0 }
 0x3ca   : > { %v6291_v22 = vand.u32 4294901760, %v3842_v27  ;;  %v3877_v39 = vand.u32 4294901760, %v3876_v3 }
 0x3cc   : > { %v3882_v16 = vsub.f32 %v3842_v27, %v6291_v22  ;;  %v3545_v44 = vpop.f32.mrf.mxu0  ;;  %3878 = vmatmul.f32.gmra.mxu0 %v3877_v39  ;;  %3933 = vmatmul.f32.gmra.mxu1 %v6291_v22 }
 0x3cd   : > { %v3546_v46 = vadd.f32 %v3545_v44, %v3507_v60  ;;  %v3615_v30 = vpop.f32.mrf.mxu2  ;;  %v3670_v57 = vpop.f32.mrf.mxu3 }
 0x3ce   : > { %3973 = vmatmul.f32.gmra.mxu2 %v3882_v16  ;;  %v3883_v21 = vand.u32 4294901760, %v3882_v16  ;;  %v3667_v60 = vadd.f32 %v3666_v38, %v3615_v30 }
 0x3cf   : > { %v3581_v33 = vadd.f32 %v3580_v26, %v3546_v46  ;;  %v3740_v10 = vpop.f32.mrf.mxu1 }
 0x3d0   : > { %4015 = vmatmul.f32.gmra.mxu3 %v3883_v21  ;;  %v3884_v53 = vsub.f32 %v3882_v16, %v3883_v21 }
 0x3d1   : > { %v3845_v56 = vsel %vm181_vm0, %v3581_v33, 0 }
 0x3d2   : > { %v6296_v50 = vand.u32 4294901760, %v3845_v56  ;;  %v3885_v34 = vand.u32 4294901760, %v3884_v53 }
 0x3d4   : > { %v3890_v23 = vsub.f32 %v3845_v56, %v6296_v50  ;;  %3886 = vmatmul.f32.gmra.mxu0 %v3885_v34  ;;  %3937 = vmatmul.f32.gmra.mxu1 %v6296_v50  ;;  %v3700_v55 = vpop.f32.mrf.mxu0 }
 0x3d5   : > { %v3623_v35 = vpop.f32.mrf.mxu2  ;;  %v3674_v61 = vpop.f32.mrf.mxu3  ;;  %v3701_v0 = vadd.f32 %v3700_v55, %v3663_v19 }
 0x3d6   : > { %3978 = vmatmul.f32.gmra.mxu2 %v3890_v23  ;;  %v3891_v7 = vand.u32 4294901760, %v3890_v23  ;;  %v3671_v38 = vadd.f32 %v3670_v57, %v3623_v35 }
 0x3d7   : > { %v3741_v3 = vadd.f32 %v3740_v10, %v3701_v0  ;;  %v3746_v27 = vpop.f32.mrf.mxu1 }
 0x3d8   : > { %4021 = vmatmul.f32.gmra.mxu3 %v3891_v7  ;;  %v3892_v42 = vsub.f32 %v3890_v23, %v3891_v7 }
 0x3da   : > { %v3893_v20 = vand.u32 4294901760, %v3892_v42 }
 0x3dc   : > { %3894 = vmatmul.f32.gmra.mxu0 %v3893_v20  ;;  %4083 = vmatmul.f32.vlgmr.msra.gmra.mxu1 %v6263_v17  ;;  %v3705_v1 = vpop.f32.mrf.mxu0 }
 0x3dd   : > { %v3631_v45 = vpop.f32.mrf.mxu2  ;;  %v3820_v8 = vpop.f32.mrf.mxu3  ;;  %v3706_v44 = vadd.f32 %v3705_v1, %v3667_v60 }
 0x3de   : > { %v3675_v57 = vadd.f32 %v3674_v61, %v3631_v45 }
 0x3df   : > { %v3747_v47 = vadd.f32 %v3746_v27, %v3706_v44  ;;  %v3752_v56 = vpop.f32.mrf.mxu1 }
 0x3e4   : > { %4048 = vmatmul.f32.vlgmr.msra.gmra.mxu0 %v6263_v17  ;;  %4087 = vmatmul.f32.gmra.mxu1 %v6281_v48  ;;  %v3710_v33 = vpop.f32.mrf.mxu0 }
 0x3e5   : > { %v3785_v39 = vpop.f32.mrf.mxu2  ;;  %v3824_v46 = vpop.f32.mrf.mxu3  ;;  %v3711_v23 = vadd.f32 %v3710_v33, %v3671_v38 }
 0x3e6   : > { %v3786_v16 = vadd.f32 %v3785_v39, %v3741_v3 }
 0x3e7   : > { %v3758_v60 = vpop.f32.mrf.mxu1 }
 0x3e8   : > { %v3821_v26 = vadd.f32 %v3820_v8, %v3786_v16 }
 0x3ea   : > { %v4100_v21 = vsel %vm181_vm0, %v3821_v26, 0 }
 0x3eb   : > { %v6305_v53 = vand.u32 4294901760, %v4100_v21 }
 0x3ec   : > { %4052 = vmatmul.f32.gmra.mxu0 %v6281_v48  ;;  %4091 = vmatmul.f32.gmra.mxu1 %v6291_v22  ;;  %v3753_v48 = vadd.f32 %v3752_v56, %v3711_v23  ;;  %v3715_v8 = vpop.f32.mrf.mxu0 }
 0x3ed   : > { %v4130_v17 = vsub.f32 %v4100_v21, %v6305_v53  ;;  %v3789_v49 = vpop.f32.mrf.mxu2  ;;  %4189 = vmatmul.f32.vlgmr.msra.gmra.mxu3 %v6305_v53  ;;  %v3828_v19 = vpop.f32.mrf.mxu3  ;;  %v3716_v27 = vadd.f32 %v3715_v8, %v3675_v57 }
 0x3ee   : > { %v3790_v30 = vadd.f32 %v3789_v49, %v3747_v47 }
 0x3ef   : > { %v4131_v34 = vand.u32 4294901760, %v4130_v17  ;;  %v3759_v21 = vadd.f32 %v3758_v60, %v3716_v27 }
 0x3f0   : > { %v3825_v7 = vadd.f32 %v3824_v46, %v3790_v30 }
 0x3f1   : > { %v4132_v55 = vsub.f32 %v4130_v17, %v4131_v34 }
 0x3f2   : > { %v4103_v42 = vsel %vm181_vm0, %v3825_v7, 0 }
 0x3f3   : > { %v4133_v20 = vand.u32 4294901760, %v4132_v55  ;;  %v4137_v10 = vand.u32 4294901760, %v4103_v42 }
 0x3f4   : > { %4056 = vmatmul.f32.gmra.mxu0 %v6291_v22  ;;  %4095 = vmatmul.f32.gmra.mxu1 %v6296_v50 }
 0x3f5   : > { %v4138_v0 = vsub.f32 %v4103_v42, %v4137_v10  ;;  %v3793_v1 = vpop.f32.mrf.mxu2  ;;  %4134 = vmatmul.f32.vlgmr.msra.gmra.mxu2 %v4133_v20  ;;  %4193 = vmatmul.f32.gmra.mxu3 %v4137_v10  ;;  %v3832_v47 = vpop.f32.mrf.mxu3 }
 0x3f6   : > { %v3794_v35 = vadd.f32 %v3793_v1, %v3753_v48  ;;  %v1775_v1 = vadd.f32 %v5802_v29, %v5658_v6  ;;  %v2891_v29 = vadd.f32 %v6089_v24, %v6109_v54 }
 0x3f7   : > { %v4139_v3 = vand.u32 4294901760, %v4138_v0 }
 0x3f8   : > { %v3829_v39 = vadd.f32 %v3828_v19, %v3794_v35 }
 0x3f9   : > { %v4140_v16 = vsub.f32 %v4138_v0, %v4139_v3 }
 0x3fa   : > { %v4106_v44 = vsel %vm181_vm0, %v3829_v39, 0 }
 0x3fb   : > { %v4145_v26 = vand.u32 4294901760, %v4106_v44  ;;  %v4141_v46 = vand.u32 4294901760, %v4140_v16  ;;  %v6650_v16 = vld [vmem:[#allocation20_spill] sm:$0xff] }
 0x3fc   : > { %4060 = vmatmul.f32.gmra.mxu0 %v6296_v50  ;;  %4267 = vmatmul.f32.vlgmr.msrb.gmra.mxu1 %v4131_v34 }
 0x3fd   : > { %v4146_v22 = vsub.f32 %v4106_v44, %v4145_v26  ;;  %v3797_v33 = vpop.f32.mrf.mxu2  ;;  %4142 = vmatmul.f32.gmra.mxu2 %v4141_v46  ;;  %4197 = vmatmul.f32.gmra.mxu3 %v4145_v26  ;;  %v1783_v44 = vadd.f32 %v6650_v16, %v5679_v31  ;;  %v2930_v31 = vadd.f32 %v6137_v14, %v2891_v29  ;;  %v6663_v29 = vld [vmem:[#allocation29_spill] sm:$0xff] }
 0x3fe   : > { %v3798_v61 = vadd.f32 %v3797_v33, %v3759_v21  ;;  %v6653_v33 = vld [vmem:[#allocation31_spill] sm:$0xff] }
 0x3ff   : > { %v4147_v45 = vand.u32 4294901760, %v4146_v22 }
 0x400   : > { %v3833_v49 = vadd.f32 %v3832_v47, %v3798_v61 }
 0x401   : > { %v4148_v38 = vsub.f32 %v4146_v22, %v4147_v45 }
 0x402   : > { %v4109_v30 = vsel %vm181_vm0, %v3833_v49, 0 }
 0x403   : > { %v4153_v56 = vand.u32 4294901760, %v4109_v30  ;;  %v4149_v23 = vand.u32 4294901760, %v4148_v38  ;;  %v6655_v38 = vld [vmem:[#allocation11_spill] sm:$0xff] }
 0x404   : > { %4227 = vmatmul.f32.vlgmr.msrb.gmra.mxu0 %v4130_v17  ;;  %4273 = vmatmul.f32.gmra.mxu1 %v4139_v3  ;;  %v1830_v3 = vadd.f32 %v5790_v59, %v1775_v1 }
 0x405   : > { %v4154_v7 = vsub.f32 %v4109_v30, %v4153_v56  ;;  %4150 = vmatmul.f32.gmra.mxu2 %v4149_v23  ;;  %4201 = vmatmul.f32.gmra.mxu3 %v4153_v56  ;;  %v6656_v30 = vld [vmem:[#allocation14_spill] sm:$0xff] }
 0x406   : > { %v1868_v39 = vadd.f32 %v5834_v4, %v1830_v3  ;;  %v6657_v23 = vld [vmem:[#allocation18_spill] sm:$0xff] }
 0x407   : > { %v4155_v50 = vand.u32 4294901760, %v4154_v7 }
 0x409   : > { %v4156_v34 = vsub.f32 %v4154_v7, %v4155_v50 }
 0x40b   : > { %v4157_v55 = vand.u32 4294901760, %v4156_v34  ;;  %v2895_v34 = vadd.f32 %v6111_v52, %v6128_v12 }
 0x40c   : > { %4232 = vmatmul.f32.gmra.mxu0 %v4138_v0  ;;  %4279 = vmatmul.f32.gmra.mxu1 %v4147_v45  ;;  %v6654_v45 = vld [vmem:[#allocation27_spill] sm:$0xff] }
 0x40d   : > { %4158 = vmatmul.f32.gmra.mxu2 %v4157_v55  ;;  %4347 = vmatmul.f32.vlgmr.msrb.gmra.mxu3 %v6305_v53  ;;  %v6658_v55 = vld [vmem:[#allocation15_spill] sm:$0xff]  ;;  %v2935_v3 = vadd.f32 %v6160_v32, %v2895_v34  ;;  %v6664_v32 = vld [vmem:[#allocation28_spill] sm:$0xff] }
 0x414   : > { %4237 = vmatmul.f32.gmra.mxu0 %v4146_v22  ;;  %4285 = vmatmul.f32.gmra.mxu1 %v4155_v50  ;;  %v2971_v50 = vadd.f32 %v6122_v13, %v2930_v31  ;;  %v6667_v31 = vld [vmem:[#allocation37_spill] sm:$0xff] }
 0x415   : > { %4312 = vmatmul.f32.vlgmr.msrb.gmra.mxu2 %v6305_v53  ;;  %4351 = vmatmul.f32.gmra.mxu3 %v4137_v10  ;;  %v2887_v53 = vadd.f32 %v6078_v2, %v6087_v9  ;;  %v6651_v2 = vld [vmem:[#allocation22_spill] sm:$0xff] }
 0x416   : > { %v1908_v9 = vadd.f32 %v6651_v2, %v1868_v39  ;;  %v6661_v39 = vld [vmem:[#allocation16_spill] sm:$0xff] }
 0x417   : > { %v2925_v27 = vadd.f32 %v6116_v5, %v2887_v53  ;;  %v6652_v5 = vld [vmem:[#allocation12_spill] sm:$0xff] }
 0x418   : > { %v1834_v22 = vadd.f32 %v6652_v5, %v1783_v44  ;;  %v1953_v47 = vadd.f32 %v6653_v33, %v1908_v9  ;;  %v6660_v53 = vld [vmem:[#allocation32_spill] sm:$0xff]  ;;  %v6666_v33 = vld [vmem:[#allocation26_spill] sm:$0xff] }
 0x419   : > { %v2965_v6 = vadd.f32 %v6091_v15, %v2925_v27 }
 0x41a   : > { %v1873_v15 = vadd.f32 %v6654_v45, %v1834_v22 }
 0x41b   : > { %v3010_v46 = vadd.f32 %v6162_v58, %v2965_v6  ;;  %v1791_v58 = vadd.f32 %v6656_v30, %v6655_v38 }
 0x41c   : > { %4242 = vmatmul.f32.gmra.mxu0 %v4154_v7  ;;  %v1988_v7 = vadd.f32 %v6657_v23, %v1953_v47 }
 0x41d   : > { %4316 = vmatmul.f32.gmra.mxu2 %v4137_v10  ;;  %4355 = vmatmul.f32.gmra.mxu3 %v4145_v26  ;;  %v3045_v49 = vadd.f32 %v6146_v41, %v3010_v46  ;;  %v3014_v41 = vadd.f32 %v6176_v28, %v2971_v50  ;;  %v6662_v28 = vld [vmem:[#allocation17_spill] sm:$0xff]  ;;  %v6670_v50 = vld [vmem:[#allocation30_spill] sm:$0xff] }
 0x41e   : > { %v1799_v2 = vadd.f32 %v6663_v29, %v6662_v28  ;;  %v6676_v28 = vld [vmem:[#allocation35_spill] sm:$0xff] }
 0x420   : > { %v1842_v47 = vadd.f32 %v6666_v33, %v1799_v2  ;;  %v6677_v2 = vld [vmem:[#allocation34_spill] sm:$0xff] }
 0x425   : > { %4320 = vmatmul.f32.gmra.mxu2 %v4145_v26  ;;  %4359 = vmatmul.f32.gmra.mxu3 %v4153_v56 }
 0x42d   : > { %4324 = vmatmul.f32.gmra.mxu2 %v4153_v56 }
 0x439   : > { %v3926_v17 = vpop.f32.mrf.mxu1 }
 0x441   : > { %v3871_v42 = vpop.f32.mrf.mxu0  ;;  %v3930_v20 = vpop.f32.mrf.mxu1 }
 0x442   : > { %v3964_v57 = vpop.f32.mrf.mxu2  ;;  %v3927_v60 = vadd.f32 %v3926_v17, %v3871_v42  ;;  %v1914_v17 = vadd.f32 %v6658_v55, %v1873_v15  ;;  %v3323_v42 = vadd.f32 %v3045_v49, %v1988_v7 }
 0x443   : > { %v4004_v8 = vpop.f32.mrf.mxu3 }
 0x444   : > { %v3965_v21 = vadd.f32 %v3964_v57, %v3927_v60  ;;  %v1957_v57 = vadd.f32 %v6660_v53, %v1914_v17  ;;  %v3049_v60 = vadd.f32 %v6164_v43, %v3014_v41 }
 0x446   : > { %v4005_v24 = vadd.f32 %v4004_v8, %v3965_v21  ;;  %v1992_v46 = vadd.f32 %v6664_v32, %v1957_v57  ;;  %v2977_v21 = vadd.f32 %v6142_v25, %v2935_v3  ;;  %v6668_v25 = vld [vmem:[#allocation33_spill] sm:$0xff] }
 0x447   : > { %v6678_v32 = vld [vmem:[#allocation65_spill] sm:$0xff] }
 0x448   : > { %v3018_v5 = vadd.f32 %v6194_v51, %v2977_v21  ;;  %v6679_v21 = vld [vmem:[#allocation45_spill] sm:$0xff] }
 0x449   : > { %v3879_v19 = vpop.f32.mrf.mxu0  ;;  %v3934_v48 = vpop.f32.mrf.mxu1 }
 0x44a   : > { %v3969_v59 = vpop.f32.mrf.mxu2  ;;  %v3931_v54 = vadd.f32 %v3930_v20, %v3879_v19  ;;  %v6659_v19 = vld [vmem:[#allocation25_spill] sm:$0xff] }
 0x44b   : > { %v4010_v10 = vpop.f32.mrf.mxu3  ;;  %v1838_v1 = vadd.f32 %v6659_v19, %v1791_v58  ;;  %v6672_v19 = vld [vmem:[#allocation38_spill] sm:$0xff] }
 0x44c   : > { %v3970_v8 = vadd.f32 %v3969_v59, %v3931_v54  ;;  %v2899_v59 = vadd.f32 %v6130_v37, %v6144_v40  ;;  %v3053_v37 = vadd.f32 %v6178_v63, %v3018_v5 }
 0x44d   : > { %v1878_v52 = vadd.f32 %v6661_v39, %v1838_v1 }
 0x44e   : > { %v4011_v16 = vadd.f32 %v4010_v10, %v3970_v8  ;;  %v3324_v10 = vadd.f32 %v3049_v60, %v1992_v46  ;;  %v2940_v15 = vadd.f32 %v6181_v11, %v2899_v59 }
 0x450   : > { %v2983_v7 = vadd.f32 %v6166_v36, %v2940_v15  ;;  %v6685_v15 = vld [vmem:[#allocation61_spill] sm:$0xff] }
 0x451   : > { %v3887_v0 = vpop.f32.mrf.mxu0  ;;  %v6323_v35 = vpop.f32.mrf.mxu1 }
 0x452   : > { %v3974_v13 = vpop.f32.mrf.mxu2  ;;  %v3935_v44 = vadd.f32 %v3934_v48, %v3887_v0  ;;  %v6665_v48 = vld [vmem:[#allocation24_spill] sm:$0xff]  ;;  %v3022_v63 = vadd.f32 %v6211_v18, %v2983_v7 }
 0x453   : > { %v4016_v61 = vpop.f32.mrf.mxu3  ;;  %v1920_v0 = vadd.f32 %v6665_v48, %v1878_v52  ;;  %v6681_v48 = vld [vmem:[#allocation39_spill] sm:$0xff] }
 0x454   : > { %v3975_v22 = vadd.f32 %v3974_v13, %v3935_v44 }
 0x455   : > { %v1961_v45 = vadd.f32 %v6667_v31, %v1920_v0 }
 0x456   : > { %v4017_v40 = vadd.f32 %v4016_v61, %v3975_v22  ;;  %v6682_v22 = vld [vmem:[#allocation62_spill] sm:$0xff] }
 0x459   : > { %v3895_v26 = vpop.f32.mrf.mxu0  ;;  %v4084_v4 = vpop.f32.mrf.mxu1 }
 0x45a   : > { %v3939_v54 = vadd.f32 %v6323_v35, %v3895_v26  ;;  %v3979_v38 = vpop.f32.mrf.mxu2  ;;  %v6671_v26 = vld [vmem:[#allocation41_spill] sm:$0xff] }
 0x45b   : > { %v4022_v6 = vpop.f32.mrf.mxu3 }
 0x45c   : > { %v3980_v61 = vadd.f32 %v3979_v38, %v3939_v54  ;;  %v6687_v54 = vld [vmem:[#allocation10_spill] sm:$0xff] }
 0x45e   : > { %v4023_v41 = vadd.f32 %v4022_v6, %v3980_v61  ;;  %v6675_v6 = vld [vmem:[#allocation36_spill] sm:$0xff]  ;;  %v6693_v61 = vld [vmem:[#allocation43_spill] sm:$0xff] }
 0x45f   : > { %v3151_v29 = vadd.f32 %v6676_v28, %v6675_v6  ;;  %v6700_v6 = vld [vmem:[#allocation40_spill] sm:$0xff] }
 0x461   : > { %v4049_v56 = vpop.f32.mrf.mxu0  ;;  %v4088_v12 = vpop.f32.mrf.mxu1  ;;  %v3189_v46 = vadd.f32 %v6678_v32, %v3151_v29  ;;  %v6701_v29 = vld [vmem:[#allocation55_spill] sm:$0xff] }
 0x462   : > { %v4050_v14 = vadd.f32 %v4049_v56, %v4005_v24  ;;  %v1883_v24 = vadd.f32 %v6668_v25, %v1842_v47  ;;  %v6669_v56 = vld [vmem:[#allocation8_spill] sm:$0xff]  ;;  %v6683_v47 = vld [vmem:[#allocation42_spill] sm:$0xff]  ;;  %v6686_v25 = vld [vmem:[#allocation75_spill] sm:$0xff] }
 0x463   : > { %v1996_v23 = vadd.f32 %v6669_v56, %v1961_v45  ;;  %v6684_v45 = vld [vmem:[#allocation63_spill] sm:$0xff] }
 0x464   : > { %v4085_v20 = vadd.f32 %v4084_v4, %v4050_v14  ;;  %v1926_v34 = vadd.f32 %v6670_v50, %v1883_v24 }
 0x465   : > { %v3325_v14 = vadd.f32 %v3053_v37, %v1996_v23  ;;  %v6689_v23 = vld [vmem:[#allocation69_spill] sm:$0xff] }
 0x466   : > { %v4363_v27 = vadd.f32 %v4085_v20, %v3323_v42  ;;  %v1965_v55 = vadd.f32 %v6671_v26, %v1926_v34  ;;  %v3057_v42 = vadd.f32 %v6196_v62, %v3022_v63  ;;  %v6674_v62 = vld [vmem:[#allocation9_spill] sm:$0xff]  ;;  %v6691_v34 = vld [vmem:[#allocation72_spill] sm:$0xff] }
 0x467   : > { %v6692_v63 = vld [vmem:[#allocation13_spill] sm:$0xff] }
 0x468   : > { %4372 = vst.msk [vmem:[%s6354_s25] sm:$0xff] %vm4371_vm13, %v4363_v27  ;;  %v2000_v1 = vadd.f32 %v6672_v19, %v1965_v55  ;;  %v6694_v55 = vld [vmem:[#allocation48_spill] sm:$0xff]  ;;  %v6696_v19 = vld [vmem:[#allocation46_spill] sm:$0xff] }
 0x469   : > { %v4053_v9 = vpop.f32.mrf.mxu0  ;;  %v4092_v30 = vpop.f32.mrf.mxu1 }
 0x46a   : > { %v4054_v43 = vadd.f32 %v4053_v9, %v4011_v16  ;;  %v3326_v3 = vadd.f32 %v3057_v42, %v2000_v1  ;;  %v6695_v42 = vld [vmem:[#allocation66_spill] sm:$0xff] }
 0x46c   : > { %v4089_v4 = vadd.f32 %v4088_v12, %v4054_v43  ;;  %v6673_v12 = vld [vmem:[#allocation19_spill] sm:$0xff]  ;;  %v6680_v43 = vld [vmem:[#allocation21_spill] sm:$0xff] }
 0x46d   : > { %v2039_v60 = vadd.f32 %v6674_v62, %v6673_v12  ;;  %v2047_v0 = vadd.f32 %v6681_v48, %v6680_v43  ;;  %v6699_v12 = vld [vmem:[#allocation78_spill] sm:$0xff]  ;;  %v6704_v43 = vld [vmem:[#allocation76_spill] sm:$0xff] }
 0x46e   : > { %v4364_v49 = vadd.f32 %v4089_v4, %v3324_v10  ;;  %v3229_v4 = vadd.f32 %v6682_v22, %v3189_v46  ;;  %v6703_v46 = vld [vmem:[#allocation53_spill] sm:$0xff]  ;;  %v6706_v22 = vld [vmem:[#allocation47_spill] sm:$0xff] }
 0x46f   : > { %v2094_v9 = vadd.f32 %v6677_v2, %v2039_v60  ;;  %v2098_v38 = vadd.f32 %v6687_v54, %v2047_v0  ;;  %v6711_v54 = vld [vmem:[#allocation68_spill] sm:$0xff] }
 0x470   : > { %4373 = vst.msk [vmem:[%s6354_s25 + $0x8] sm:$0xff] %vm4371_vm13, %v4364_v49  ;;  %v4190_v51 = vpop.f32.mrf.mxu3  ;;  %v3155_v49 = vadd.f32 %v6685_v15, %v6684_v45  ;;  %v3274_v24 = vadd.f32 %v6686_v25, %v3229_v4  ;;  %v6708_v45 = vld [vmem:[#allocation70_spill] sm:$0xff] }
 0x471   : > { %v4057_v58 = vpop.f32.mrf.mxu0  ;;  %v4096_v57 = vpop.f32.mrf.mxu1  ;;  %v2132_v59 = vadd.f32 %v6679_v21, %v2094_v9  ;;  %v6702_v9 = vld [vmem:[#allocation73_spill] sm:$0xff] }
 0x472   : > { %v4058_v11 = vadd.f32 %v4057_v58, %v4017_v40  ;;  %v6688_v58 = vld [vmem:[#allocation51_spill] sm:$0xff]  ;;  %v3194_v7 = vadd.f32 %v6689_v23, %v3155_v49 }
 0x473   : > { %v2172_v31 = vadd.f32 %v6683_v47, %v2132_v59  ;;  %v6707_v47 = vld [vmem:[#allocation52_spill] sm:$0xff] }
 0x474   : > { %v4093_v35 = vadd.f32 %v4092_v30, %v4058_v11  ;;  %v6690_v11 = vld [vmem:[#allocation49_spill] sm:$0xff] }
 0x475   : > { %v2217_v56 = vadd.f32 %v6688_v58, %v2172_v31  ;;  %v2137_v50 = vadd.f32 %v6690_v11, %v2098_v38  ;;  %v6712_v58 = vld [vmem:[#allocation80_spill] sm:$0xff] }
 0x476   : > { %v4365_v17 = vadd.f32 %v4093_v35, %v3325_v14  ;;  %v2055_v35 = vadd.f32 %v6693_v61, %v6692_v63  ;;  %v6713_v11 = vld [vmem:[#allocation44_spill] sm:$0xff]  ;;  %v6715_v63 = vld [vmem:[#allocation77_spill] sm:$0xff] }
 0x477   : > { %v2178_v1 = vadd.f32 %v6696_v19, %v2137_v50 }
 0x478   : > { %4374 = vst.msk [vmem:[%s6354_s25 + $0x10] sm:$0xff] %vm4371_vm13, %v4365_v17  ;;  %v4135_v8 = vpop.f32.mrf.mxu2  ;;  %v4194_v20 = vpop.f32.mrf.mxu3  ;;  %v2252_v17 = vadd.f32 %v6694_v55, %v2217_v56  ;;  %v2102_v28 = vadd.f32 %v6700_v6, %v2055_v35 }
 0x479   : > { %v4061_v36 = vpop.f32.mrf.mxu0  ;;  %v4268_v10 = vpop.f32.mrf.mxu1  ;;  %v4191_v33 = vadd.f32 %v4190_v51, %v4135_v8  ;;  %v3309_v51 = vadd.f32 %v6691_v34, %v3274_v24  ;;  %v2221_v2 = vadd.f32 %v6701_v29, %v2178_v1  ;;  %v6709_v24 = vld [vmem:[#allocation50_spill] sm:$0xff] }
 0x47a   : > { %v4062_v53 = vadd.f32 %v4061_v36, %v4023_v41  ;;  %v3235_v41 = vadd.f32 %v6695_v42, %v3194_v7  ;;  %v2142_v21 = vadd.f32 %v6703_v46, %v2102_v28  ;;  %v6719_v1 = vld [vmem:[#allocation74_spill] sm:$0xff]  ;;  %v6722_v28 = vld [vmem:[#allocation60_spill] sm:$0xff] }
 0x47b   : > { %v2256_v31 = vadd.f32 %v6707_v47, %v2221_v2 }
 0x47c   : > { %v4097_v18 = vadd.f32 %v4096_v57, %v4062_v53  ;;  %v6697_v53 = vld [vmem:[#allocation67_spill] sm:$0xff]  ;;  %v6698_v57 = vld [vmem:[#allocation64_spill] sm:$0xff]  ;;  %v3278_v62 = vadd.f32 %v6699_v12, %v3235_v41 }
 0x47e   : > { %v4366_v13 = vadd.f32 %v4097_v18, %v3326_v3  ;;  %v3159_v3 = vadd.f32 %v6698_v57, %v6697_v53  ;;  %v3313_v48 = vadd.f32 %v6704_v43, %v3278_v62  ;;  %v6721_v62 = vld [vmem:[#allocation82_spill] sm:$0xff] }
 0x480   : > { %4375 = vst.msk [vmem:[%s6354_s25 + $0x18] sm:$0xff] %vm4371_vm13, %v4366_v13  ;;  %v4143_v27 = vpop.f32.mrf.mxu2  ;;  %v4198_v39 = vpop.f32.mrf.mxu3  ;;  %v3327_v13 = vadd.f32 %v3309_v51, %v2252_v17  ;;  %v3199_v32 = vadd.f32 %v6702_v9, %v3159_v3  ;;  %v6714_v51 = vld [vmem:[#allocation58_spill] sm:$0xff] }
 0x481   : > { %v4228_v16 = vpop.f32.mrf.mxu0  ;;  %v4195_v8 = vadd.f32 %v4194_v20, %v4143_v27  ;;  %v4274_v18 = vpop.f32.mrf.mxu1 }
 0x482   : > { %v4229_v37 = vadd.f32 %v4228_v16, %v4191_v33  ;;  %v3241_v15 = vadd.f32 %v6708_v45, %v3199_v32 }
 0x484   : > { %v4269_v14 = vadd.f32 %v4268_v10, %v4229_v37  ;;  %v6705_v10 = vld [vmem:[#allocation23_spill] sm:$0xff]  ;;  %v2184_v37 = vadd.f32 %v6709_v24, %v2142_v21  ;;  %v3282_v56 = vadd.f32 %v6712_v58, %v3241_v15 }
 0x485   : > { %v2063_v4 = vadd.f32 %v6706_v22, %v6705_v10 }
 0x487   : > { %v2106_v50 = vadd.f32 %v6713_v11, %v2063_v4 }
 0x488   : > { %v4151_v52 = vpop.f32.mrf.mxu2  ;;  %v6387_v44 = vpop.f32.mrf.mxu3 }
 0x489   : > { %v4233_v40 = vpop.f32.mrf.mxu0  ;;  %v4199_v49 = vadd.f32 %v4198_v39, %v4151_v52  ;;  %v4280_v34 = vpop.f32.mrf.mxu1  ;;  %v6716_v52 = vld [vmem:[#allocation57_spill] sm:$0xff] }
 0x48a   : > { %v4234_v60 = vadd.f32 %v4233_v40, %v4195_v8  ;;  %v6710_v40 = vld [vmem:[#allocation71_spill] sm:$0xff]  ;;  %v2147_v35 = vadd.f32 %v6716_v52, %v2106_v50 }
 0x48b   : > { %v3163_v38 = vadd.f32 %v6711_v54, %v6710_v40 }
 0x48c   : > { %v4275_v0 = vadd.f32 %v4274_v18, %v4234_v60  ;;  %v6720_v18 = vld [vmem:[#allocation54_spill] sm:$0xff] }
 0x48d   : > { %v3204_v61 = vadd.f32 %v6715_v63, %v3163_v38 }
 0x48f   : > { %v3247_v53 = vadd.f32 %v6719_v1, %v3204_v61 }
 0x490   : > { %v6396_v5 = vpop.f32.mrf.mxu2  ;;  %v4348_v30 = vpop.f32.mrf.mxu3 }
 0x491   : > { %v4238_v20 = vpop.f32.mrf.mxu0  ;;  %v4203_v57 = vadd.f32 %v6387_v44, %v6396_v5  ;;  %v3286_v60 = vadd.f32 %v6721_v62, %v3247_v53  ;;  %v4286_v9 = vpop.f32.mrf.mxu1  ;;  %v6723_v44 = vld [vmem:[#allocation81_spill] sm:$0xff] }
 0x492   : > { %v4239_v23 = vadd.f32 %v4238_v20, %v4199_v49 }
 0x493   : > { %v3321_v5 = vadd.f32 %v6723_v44, %v3286_v60 }
 0x494   : > { %v4281_v42 = vadd.f32 %v4280_v34, %v4239_v23 }
 0x498   : > { %v4313_v26 = vpop.f32.mrf.mxu2  ;;  %v4352_v59 = vpop.f32.mrf.mxu3 }
 0x499   : > { %v4314_v36 = vadd.f32 %v4313_v26, %v4269_v14  ;;  %v2225_v14 = vadd.f32 %v6714_v51, %v2184_v37  ;;  %v6717_v26 = vld [vmem:[#allocation79_spill] sm:$0xff]  ;;  %v4243_v17 = vpop.f32.mrf.mxu0 }
 0x49a   : > { %v3317_v55 = vadd.f32 %v6717_v26, %v3282_v56 }
 0x49b   : > { %v4349_v16 = vadd.f32 %v4348_v30, %v4314_v36  ;;  %v3328_v30 = vadd.f32 %v3313_v48, %v2256_v31  ;;  %v6718_v36 = vld [vmem:[#allocation56_spill] sm:$0xff] }
 0x49c   : > { %v2260_v19 = vadd.f32 %v6718_v36, %v2225_v14 }
 0x49d   : > { %v4367_v27 = vadd.f32 %v4349_v16, %v3327_v13  ;;  %v2190_v13 = vadd.f32 %v6720_v18, %v2147_v35  ;;  %v4244_v16 = vadd.f32 %v4243_v17, %v4203_v57 }
 0x49e   : > { %v3329_v12 = vadd.f32 %v3317_v55, %v2260_v19 }
 0x49f   : > { %4376 = vst.msk [vmem:[%s6354_s25 + $0x20] sm:$0xff] %vm4371_vm13, %v4367_v27  ;;  %v2229_v29 = vadd.f32 %v6722_v28, %v2190_v13  ;;  %v4287_v32 = vadd.f32 %v4286_v9, %v4244_v16  ;;  %v6724_v27 = vld [vmem:[#allocation59_spill] sm:$0xff] }
 0x4a0   : > { %v4317_v33 = vpop.f32.mrf.mxu2  ;;  %v4356_v41 = vpop.f32.mrf.mxu3 }
 0x4a1   : > { %v4318_v25 = vadd.f32 %v4317_v33, %v4275_v0  ;;  %v2264_v46 = vadd.f32 %v6724_v27, %v2229_v29 }
 0x4a3   : > { %v4353_v7 = vadd.f32 %v4352_v59, %v4318_v25  ;;  %v3330_v43 = vadd.f32 %v3321_v5, %v2264_v46 }
 0x4a5   : > { %v4368_v39 = vadd.f32 %v4353_v7, %v3328_v30 }
 0x4a7   : > { %4377 = vst.msk [vmem:[%s6354_s25 + $0x28] sm:$0xff] %vm4371_vm13, %v4368_v39 }
 0x4a8   : > { %v4321_v8 = vpop.f32.mrf.mxu2  ;;  %v4360_v59 = vpop.f32.mrf.mxu3 }
 0x4a9   : > { %v4322_v3 = vadd.f32 %v4321_v8, %v4281_v42 }
 0x4ab   : > { %v4357_v6 = vadd.f32 %v4356_v41, %v4322_v3 }
 0x4ad   : > { %v4369_v2 = vadd.f32 %v4357_v6, %v3329_v12 }
 0x4af   : > { %4378 = vst.msk [vmem:[%s6354_s25 + $0x30] sm:$0xff] %vm4371_vm13, %v4369_v2 }
 0x4b0   : > { %v4325_v20 = vpop.f32.mrf.mxu2 }
 0x4b1   : > { %v4326_v21 = vadd.f32 %v4325_v20, %v4287_v32 }
 0x4b3   : > { %v4361_v48 = vadd.f32 %v4360_v59, %v4326_v21 }
 0x4b5   : > { %v4370_v0 = vadd.f32 %v4361_v48, %v3330_v43 }
 0x4b7   : > { %4379 = vst.msk [vmem:[%s6354_s25 + $0x38] sm:$0xff] %vm4371_vm13, %v4370_v0 }
 0x4b8   : > { %4750 = shalt.err (!%p4747_p4)
}
 0x4b9   : > { %s4795_s20 = smov 128   ;;  %s4796_s21 = smov 8  }
 0x4ba   : > { %4643 = dma.vmem_to_hbm [thread:$0]  (%p4857_p11), %s4394_s10, 1024, %s4396_s30, %s4381_s2, %s4795_s20, %s4795_s20, %s4796_s21  }
 0x4bb PF: > { %s4410_s22 = sand.u32 1, %s4777_s6   ;;  %p6725_p7 = scmp.ge.s32.totalorder %s4789_s9, 2 }
 0x4bc   : > { %s4411_s23 = scalar_lea.sflag [#allocation4], %s4410_s22 }
 0x4bd   : > { %p4650_p5 = pnand %p6725_p7, %p4861_p12 }
 0x4bf   : > { %p4651_p8 = pneg %p4650_p5 }
 0x4c1   : > { %4772 = dma.done.wait (%p4651_p8), %s4411_s23, 1024  }
 0x4c2   : > { %4774 = vsyncadd (%p4651_p8), %s4411_s23, 4294966272  ;;  %p14_p10 = scmp.ge.s32.totalorder %s4832_s12, 4   ;;  %s6726_s6 = smov %s4781_s7 }
 0x4c3   : > { %s6727_s7 = smov %s4785_s8  ;;  %s6728_s8 = smov %s4844_s15 }
 0x4c4   : > { %s6729_s9 = smov %s4832_s12  ;;  %16 = sbr.rel (!%p14_p10) target bundleno = 5 (0x5), region = 69 }
 0x4c9   :  { %4417 = vsyncpa [#allocation3], 1 }
 0x4ca   :  { %4419 = vsyncpa [#allocation3 + $0x1], 1 }
 0x4cb   :  { %4420 = vsyncpa [#allocation4], 1 }
 0x4cc   :  { %4422 = vsyncpa [#allocation4 + $0x1], 1 }

</bundles_post_ra>
